<compile_context>
chip_gen: v6e
topology: v6e:2x2x1
jax: 0.10.0
libtpu: 0.0.40
codegen_flags: <defaults>
</compile_context>

<pallas_src>
import math
import functools

import jax
import jax.numpy as jnp
from jax import lax
from jax.experimental import pallas as pl
from jax.experimental.pallas import tpu as pltpu

LN_EPS = 1e-5          # nn.LayerNorm default
NEG_INF = -1e30        # finite "-inf" for masking (NaN-safe for empty rows)


# ---------------------------------------------------------------------------
# Small helpers
# ---------------------------------------------------------------------------

def _round_up(x, m):
    return (x + m - 1) // m * m


@functools.lru_cache(maxsize=None)
def _vmem_limit():
    """Generation-aware scoped-VMEM limit (v5e/v6e: 128 MiB, v7x: 64 MiB)."""
    try:
        cap = int(pltpu.get_tpu_info().vmem_capacity_bytes)
    except Exception:
        cap = 128 * 1024 * 1024
    return int(max(16 * 1024 * 1024, min(int(cap * 0.6), 96 * 1024 * 1024)))


def _cp(n_parallel):
    return pltpu.CompilerParams(
        dimension_semantics=("parallel",) * n_parallel,
        vmem_limit_bytes=_vmem_limit())


def _batch_block(B, seq):
    """Batch elements per attention grid step (~128 query rows per step)."""
    bb = max(1, min(B, max(1, 128 // max(seq, 1))))
    nblk = -(-B // bb)
    bb = -(-B // nblk)          # balance to minimize batch padding
    return min(bb, 8)           # cap trace-time unroll of the per-element loop


def _row_tiling(M, in_width, out_width):
    """Row tile sized so the input tile is ~>=1 MiB, capped at 2048 rows."""
    Mp = _round_up(max(M, 8), 8)
    width = max(in_width, out_width, 128)
    tm = _round_up(max(256, (1 << 20) // (4 * width)), 8)
    TM = min(min(tm, 2048), Mp)
    Mp = _round_up(Mp, TM)
    return Mp, TM


def _pad_rows(x2, Mp):
    if Mp != x2.shape[0]:
        x2 = jnp.pad(x2, ((0, Mp - x2.shape[0]), (0, 0)))
    return x2


def sinusoidal_pe(max_len, d_model):
    pos = jnp.arange(max_len, dtype=jnp.float32)[:, None]
    div = jnp.exp(jnp.arange(0, d_model, 2, dtype=jnp.float32)
                  * (-math.log(10000.0) / d_model))
    pe = jnp.zeros((max_len, d_model), jnp.float32)
    pe = pe.at[:, 0::2].set(jnp.sin(pos * div))
    pe = pe.at[:, 1::2].set(jnp.cos(pos * div))
    return pe


# ---------------------------------------------------------------------------
# Kernels
# ---------------------------------------------------------------------------

def _proj_pe_kernel(x_ref, w_ref, b_ref, pe_ref, o_ref, *, bb):
    """y = x @ W + b + PE  (per-sequence positional encoding, dropout=identity)."""
    x = x_ref[...].astype(jnp.bfloat16)
    y = jnp.dot(x, w_ref[...], preferred_element_type=jnp.float32) + b_ref[...]
    y = y + jnp.tile(pe_ref[...], (bb, 1))
    o_ref[...] = y.astype(o_ref.dtype)


def _ffn_ln_kernel(x_ref, w1_ref, b1_ref, w2_ref, b2_ref, g_ref, beta_ref,
                   *rest, eps, post_ln):
    """LayerNorm(x + W2 relu(W1 x + b1) + b2), optional second (stack-final) LN."""
    if post_ln:
        g2_ref, beta2_ref, o_ref = rest
    else:
        (o_ref,) = rest
    x = x_ref[...]                                   # bf16 block
    x32 = x.astype(jnp.float32)
    h = jnp.dot(x, w1_ref[...], preferred_element_type=jnp.float32) + b1_ref[...]
    h = jnp.maximum(h, 0.0)                          # ReLU, nhid never hits HBM
    y = jnp.dot(h.astype(jnp.bfloat16), w2_ref[...],
                preferred_element_type=jnp.float32) + b2_ref[...]
    y = x32 + y                                      # residual
    mu = jnp.mean(y, axis=-1, keepdims=True)
    var = jnp.mean(jnp.square(y - mu), axis=-1, keepdims=True)
    y = (y - mu) * lax.rsqrt(var + eps) * g_ref[...] + beta_ref[...]
    if post_ln:                                      # fused encoder/decoder final norm
        mu = jnp.mean(y, axis=-1, keepdims=True)
        var = jnp.mean(jnp.square(y - mu), axis=-1, keepdims=True)
        y = (y - mu) * lax.rsqrt(var + eps) * g2_ref[...] + beta2_ref[...]
    o_ref[...] = y.astype(o_ref.dtype)


def _ln_linear_kernel(x_ref, g_ref, b_ref, w_ref, bias_ref, o_ref, *, eps):
    """Fused decoder-final LayerNorm + regressor linear."""
    x = x_ref[...].astype(jnp.float32)
    mu = jnp.mean(x, axis=-1, keepdims=True)
    var = jnp.mean(jnp.square(x - mu), axis=-1, keepdims=True)
    xn = (x - mu) * lax.rsqrt(var + eps) * g_ref[...] + b_ref[...]
    o_ref[...] = jnp.dot(xn.astype(jnp.bfloat16), w_ref[...],
                         preferred_element_type=jnp.float32) + bias_ref[...]


def _heads_softmax_pv(qb, kb, vb, bias, attn_scr, q_rows, kv_rows, qr, kr,
                      num_heads, Dh):
    """Per-head masked attention; results land in the VMEM scratch (no concat)."""
    for h in range(num_heads):
        c0 = h * Dh
        q_h = qb[qr:qr + q_rows, c0:c0 + Dh]                    # bf16 [Sq, Dh]
        k_h = kb[kr:kr + kv_rows, c0:c0 + Dh]                   # bf16 [Sk, Dh]
        v_h = vb[kr:kr + kv_rows, c0:c0 + Dh]
        # contract last dims: no explicit transpose / relayout of K
        s = lax.dot_general(q_h, k_h, (((1,), (1,)), ((), ())),
                            preferred_element_type=jnp.float32)
        s = s + bias                                            # hoisted mask bias
        m = jnp.max(s, axis=-1, keepdims=True)
        p = jnp.exp(s - m)
        denom = jnp.sum(p, axis=-1, keepdims=True)              # > 0 always
        p = p * pl.reciprocal(denom, approx=True)               # EUP slot
        attn_scr[qr:qr + q_rows, c0:c0 + Dh] = jnp.dot(
            p.astype(jnp.bfloat16), v_h, preferred_element_type=jnp.float32)


def _self_attn_ln_kernel(len_ref, x_ref, wq_ref, bq_ref, wk_ref, bk_ref,
                         wv_ref, bv_ref, wo_ref, bo_ref, g_ref, beta_ref,
                         o_ref, attn_scr, *, num_heads, bb, seq, causal, eps):
    i = pl.program_id(0)
    xm = x_ref[...]                                             # (bb*S, D) bf16
    x32 = xm.astype(jnp.float32)
    D = xm.shape[-1]
    Dh = D // num_heads

    # 1/sqrt(Dh) is already folded into wq/bq at trace time.
    q = jnp.dot(xm, wq_ref[...], preferred_element_type=jnp.float32) + bq_ref[...]
    k = jnp.dot(xm, wk_ref[...], preferred_element_type=jnp.float32) + bk_ref[...]
    v = jnp.dot(xm, wv_ref[...], preferred_element_type=jnp.float32) + bv_ref[...]
    qb, kb, vb = (q.astype(jnp.bfloat16), k.astype(jnp.bfloat16),
                  v.astype(jnp.bfloat16))

    kv_idx = lax.broadcasted_iota(jnp.int32, (seq, seq), 1)
    q_idx = lax.broadcasted_iota(jnp.int32, (seq, seq), 0)

    for e in range(bb):
        r0 = e * seq
        kv_len = len_ref[i * bb + e]                            # SMEM scalar
        valid = kv_idx < kv_len                                 # key padding
        if causal:
            valid = jnp.logical_and(valid, kv_idx <= q_idx)
        bias = jnp.where(valid, 0.0, NEG_INF)                   # once per element
        _heads_softmax_pv(qb, kb, vb, bias, attn_scr, seq, seq, r0, r0,
                          num_heads, Dh)

    attn = attn_scr[...].astype(jnp.bfloat16)
    out = jnp.dot(attn, wo_ref[...], preferred_element_type=jnp.float32) + bo_ref[...]
    y = x32 + out                                               # residual
    mu = jnp.mean(y, axis=-1, keepdims=True)
    var = jnp.mean(jnp.square(y - mu), axis=-1, keepdims=True)
    o_ref[...] = ((y - mu) * lax.rsqrt(var + eps) * g_ref[...]
                  + beta_ref[...]).astype(o_ref.dtype)


def _cross_attn_ln_kernel(len_ref, y_ref, m_ref, wq_ref, bq_ref, wk_ref, bk_ref,
                          wv_ref, bv_ref, wo_ref, bo_ref, g_ref, beta_ref,
                          o_ref, attn_scr, *, num_heads, bb, q_seq, kv_seq, eps):
    i = pl.program_id(0)
    ym = y_ref[...]                                             # (bb*St, D) bf16
    mm = m_ref[...]                                             # (bb*Ss, D) bf16
    y32 = ym.astype(jnp.float32)
    D = ym.shape[-1]
    Dh = D // num_heads

    q = jnp.dot(ym, wq_ref[...], preferred_element_type=jnp.float32) + bq_ref[...]
    k = jnp.dot(mm, wk_ref[...], preferred_element_type=jnp.float32) + bk_ref[...]
    v = jnp.dot(mm, wv_ref[...], preferred_element_type=jnp.float32) + bv_ref[...]
    qb, kb, vb = (q.astype(jnp.bfloat16), k.astype(jnp.bfloat16),
                  v.astype(jnp.bfloat16))

    kv_idx = lax.broadcasted_iota(jnp.int32, (q_seq, kv_seq), 1)

    for e in range(bb):
        qr, kr = e * q_seq, e * kv_seq
        kv_len = len_ref[i * bb + e]                            # memory padding
        bias = jnp.where(kv_idx < kv_len, 0.0, NEG_INF)
        _heads_softmax_pv(qb, kb, vb, bias, attn_scr, q_seq, kv_seq, qr, kr,
                          num_heads, Dh)

    attn = attn_scr[...].astype(jnp.bfloat16)
    out = jnp.dot(attn, wo_ref[...], preferred_element_type=jnp.float32) + bo_ref[...]
    z = y32 + out
    mu = jnp.mean(z, axis=-1, keepdims=True)
    var = jnp.mean(jnp.square(z - mu), axis=-1, keepdims=True)
    o_ref[...] = ((z - mu) * lax.rsqrt(var + eps) * g_ref[...]
                  + beta_ref[...]).astype(o_ref.dtype)


# ---------------------------------------------------------------------------
# Pallas wrappers
# ---------------------------------------------------------------------------

def project_pe(x3, w, b, pe, bb):
    """Input/output projection fused with the positional-encoding add."""
    Bp, Sp, K = x3.shape
    D = w.shape[1]
    x2 = x3.reshape(Bp * Sp, K)
    out = pl.pallas_call(
        functools.partial(_proj_pe_kernel, bb=bb),
        grid=(Bp // bb,),
        out_shape=jax.ShapeDtypeStruct((Bp * Sp, D), jnp.bfloat16),
        in_specs=[pl.BlockSpec((bb * Sp, K), lambda i: (i, 0)),
                  pl.BlockSpec((K, D), lambda i: (0, 0)),
                  pl.BlockSpec((1, D), lambda i: (0, 0)),
                  pl.BlockSpec((Sp, D), lambda i: (0, 0))],
        out_specs=pl.BlockSpec((bb * Sp, D), lambda i: (i, 0)),
        compiler_params=_cp(1),
    )(x2, w, b.reshape(1, D).astype(jnp.float32), pe)
    return out


def ffn_block(x2, w1, b1, w2, b2, g, beta, post_g=None, post_b=None):
    """LayerNorm(x + FFN(x)) (+ optional fused stack-final LayerNorm)."""
    M, D = x2.shape
    nhid = w1.shape[1]
    Mp, TM = _row_tiling(M, D, nhid)
    x2p = _pad_rows(x2, Mp)
    post_ln = post_g is not None
    in_specs = [pl.BlockSpec((TM, D), lambda i: (i, 0)),
                pl.BlockSpec((D, nhid), lambda i: (0, 0)),
                pl.BlockSpec((1, nhid), lambda i: (0, 0)),
                pl.BlockSpec((nhid, D), lambda i: (0, 0)),
                pl.BlockSpec((1, D), lambda i: (0, 0)),
                pl.BlockSpec((1, D), lambda i: (0, 0)),
                pl.BlockSpec((1, D), lambda i: (0, 0))]
    args = [x2p, w1, b1.reshape(1, nhid), w2, b2.reshape(1, D),
            g.reshape(1, D), beta.reshape(1, D)]
    if post_ln:
        in_specs += [pl.BlockSpec((1, D), lambda i: (0, 0)),
                     pl.BlockSpec((1, D), lambda i: (0, 0))]
        args += [post_g.reshape(1, D), post_b.reshape(1, D)]
    out = pl.pallas_call(
        functools.partial(_ffn_ln_kernel, eps=LN_EPS, post_ln=post_ln),
        grid=(Mp // TM,),
        out_shape=jax.ShapeDtypeStruct((Mp, D), jnp.bfloat16),
        in_specs=in_specs,
        out_specs=pl.BlockSpec((TM, D), lambda i: (i, 0)),
        compiler_params=_cp(1),
    )(*args)
    return out[:M]


def ln_linear(x2, g, beta, w, b):
    """Fused decoder-final LayerNorm + regressor linear (f32 output)."""
    M, D = x2.shape
    N = w.shape[1]
    Mp, TM = _row_tiling(M, D, N)
    x2p = _pad_rows(x2, Mp)
    out = pl.pallas_call(
        functools.partial(_ln_linear_kernel, eps=LN_EPS),
        grid=(Mp // TM,),
        out_shape=jax.ShapeDtypeStruct((Mp, N), jnp.float32),
        in_specs=[pl.BlockSpec((TM, D), lambda i: (i, 0)),
                  pl.BlockSpec((1, D), lambda i: (0, 0)),
                  pl.BlockSpec((1, D), lambda i: (0, 0)),
                  pl.BlockSpec((D, N), lambda i: (0, 0)),
                  pl.BlockSpec((1, N), lambda i: (0, 0))],
        out_specs=pl.BlockSpec((TM, N), lambda i: (i, 0)),
        compiler_params=_cp(1),
    )(x2p, g.reshape(1, D), beta.reshape(1, D), w,
      b.reshape(1, N).astype(jnp.float32))
    return out[:M]


def self_attention_block(x2, lengths, p, ln_g, ln_b, num_heads, causal, bb, seq):
    """LayerNorm(x + MHA(x, x, x)); masks built in-kernel from prefetched lengths."""
    M, D = x2.shape
    Bp = M // seq
    scale = 1.0 / math.sqrt(D // num_heads)
    wq = (p["q_w"].astype(jnp.float32) * scale).astype(jnp.bfloat16)
    bq = (p["q_b"].astype(jnp.float32) * scale).reshape(1, D)

    def mat():
        return pl.BlockSpec((D, D), lambda i, lens: (0, 0))

    def vec(n):
        return pl.BlockSpec((1, n), lambda i, lens: (0, 0))

    gs = pltpu.PrefetchScalarGridSpec(
        num_scalar_prefetch=1, grid=(Bp // bb,),
        in_specs=[pl.BlockSpec((bb * seq, D), lambda i, lens: (i, 0)),
                  mat(), vec(D), mat(), vec(D), mat(), vec(D), mat(), vec(D),
                  vec(D), vec(D)],
        out_specs=pl.BlockSpec((bb * seq, D), lambda i, lens: (i, 0)),
        scratch_shapes=[pltpu.VMEM((bb * seq, D), jnp.float32)])
    kernel = functools.partial(_self_attn_ln_kernel, num_heads=num_heads,
                               bb=bb, seq=seq, causal=causal, eps=LN_EPS)
    return pl.pallas_call(
        kernel, grid_spec=gs,
        out_shape=jax.ShapeDtypeStruct((M, D), jnp.bfloat16),
        compiler_params=_cp(1),
    )(lengths, x2, wq, bq,
      p["k_w"], p["k_b"].reshape(1, D),
      p["v_w"], p["v_b"].reshape(1, D),
      p["o_w"], p["o_b"].reshape(1, D),
      ln_g.reshape(1, D), ln_b.reshape(1, D))


def cross_attention_block(y2, mem2, src_lengths, p, ln_g, ln_b, num_heads,
                          bb, q_seq, kv_seq):
    """LayerNorm(y + MHA(y, memory, memory)) with memory key-padding mask."""
    Mq, D = y2.shape
    Bp = Mq // q_seq
    scale = 1.0 / math.sqrt(D // num_heads)
    wq = (p["q_w"].astype(jnp.float32) * scale).astype(jnp.bfloat16)
    bq = (p["q_b"].astype(jnp.float32) * scale).reshape(1, D)

    def mat():
        return pl.BlockSpec((D, D), lambda i, lens: (0, 0))

    def vec(n):
        return pl.BlockSpec((1, n), lambda i, lens: (0, 0))

    gs = pltpu.PrefetchScalarGridSpec(
        num_scalar_prefetch=1, grid=(Bp // bb,),
        in_specs=[pl.BlockSpec((bb * q_seq, D), lambda i, lens: (i, 0)),
                  pl.BlockSpec((bb * kv_seq, D), lambda i, lens: (i, 0)),
                  mat(), vec(D), mat(), vec(D), mat(), vec(D), mat(), vec(D),
                  vec(D), vec(D)],
        out_specs=pl.BlockSpec((bb * q_seq, D), lambda i, lens: (i, 0)),
        scratch_shapes=[pltpu.VMEM((bb * q_seq, D), jnp.float32)])
    kernel = functools.partial(_cross_attn_ln_kernel, num_heads=num_heads,
                               bb=bb, q_seq=q_seq, kv_seq=kv_seq, eps=LN_EPS)
    return pl.pallas_call(
        kernel, grid_spec=gs,
        out_shape=jax.ShapeDtypeStruct((Mq, D), jnp.bfloat16),
        compiler_params=_cp(1),
    )(src_lengths, y2, mem2, wq, bq,
      p["k_w"], p["k_b"].reshape(1, D),
      p["v_w"], p["v_b"].reshape(1, D),
      p["o_w"], p["o_b"].reshape(1, D),
      ln_g.reshape(1, D), ln_b.reshape(1, D))


# ---------------------------------------------------------------------------
# Full forward (post-norm, ReLU FFN — nn.Transformer defaults, eval mode)
# ---------------------------------------------------------------------------

def fmri_transformer_forward(params, input_seq, fmri_seq, src_lengths,
                             tgt_lengths, cfg):
    d, H = cfg["d_model"], cfg["nhead"]
    odim = cfg["output_dim"]
    B, Ss, _ = input_seq.shape
    St = fmri_seq.shape[1]

    Ssp, Stp = _round_up(Ss, 8), _round_up(St, 8)
    bb = _batch_block(B, max(Ssp, Stp))
    Bp = _round_up(B, bb)

    input_seq = jnp.pad(input_seq.astype(jnp.float32),
                        ((0, Bp - B), (0, Ssp - Ss), (0, 0)))
    fmri_seq = jnp.pad(fmri_seq.astype(jnp.float32),
                       ((0, Bp - B), (0, Stp - St), (0, 0)))
    src_len = jnp.pad(src_lengths.astype(jnp.int32), (0, Bp - B))
    tgt_len = jnp.pad(tgt_lengths.astype(jnp.int32), (0, Bp - B))

    pe = sinusoidal_pe(max(Ssp, Stp), d)

    # Input/output projections fused with the positional-encoding add.
    src = project_pe(input_seq, params["inp_w"], params["inp_b"], pe[:Ssp], bb)
    tgt = project_pe(fmri_seq, params["outp_w"], params["outp_b"], pe[:Stp], bb)

    # Encoder stack; final encoder LayerNorm fused into the last FFN kernel.
    x = src
    n_enc = len(params["enc_layers"])
    for li, lp in enumerate(params["enc_layers"]):
        x = self_attention_block(x, src_len, lp["sa"], lp["n1_g"], lp["n1_b"],
                                 H, causal=False, bb=bb, seq=Ssp)
        last = (li == n_enc - 1)
        x = ffn_block(x, lp["ff1_w"], lp["ff1_b"], lp["ff2_w"], lp["ff2_b"],
                      lp["n2_g"], lp["n2_b"],
                      post_g=params["enc_norm_g"] if last else None,
                      post_b=params["enc_norm_b"] if last else None)
    memory = x

    # Decoder stack; final decoder LayerNorm fused into the regressor kernel.
    y = tgt
    for lp in params["dec_layers"]:
        y = self_attention_block(y, tgt_len, lp["sa"], lp["n1_g"], lp["n1_b"],
                                 H, causal=True, bb=bb, seq=Stp)
        y = cross_attention_block(y, memory, src_len, lp["ca"],
                                  lp["n2_g"], lp["n2_b"], H,
                                  bb=bb, q_seq=Stp, kv_seq=Ssp)
        y = ffn_block(y, lp["ff1_w"], lp["ff1_b"], lp["ff2_w"], lp["ff2_b"],
                      lp["n3_g"], lp["n3_b"])

    out = ln_linear(y, params["dec_norm_g"], params["dec_norm_b"],
                    params["reg_w"], params["reg_b"])
    return out.reshape(Bp, Stp, odim)[:B, :St]


# ---------------------------------------------------------------------------
# Deterministic parameter initialization (shapes from FMRITransformerModel)
# Weights are stored pre-transposed ([in, out]) in bf16; biases / LN in f32.
# ---------------------------------------------------------------------------

def init_params(key, cfg):
    d, nhid, nlayers = cfg["d_model"], cfg["nhid"], cfg["nlayers"]
    idim, odim = cfg["input_dim"], cfg["output_dim"]
    keys = iter(jax.random.split(key, 1024))

    def w(*shape, scale=0.05):
        return (scale * jax.random.normal(next(keys), shape,
                                          jnp.float32)).astype(jnp.bfloat16)

    def b(n, scale=0.05):
        return (scale * jax.random.normal(next(keys), (n,),
                                          jnp.float32)).astype(jnp.float32)

    def attn():
        return dict(q_w=w(d, d), q_b=b(d), k_w=w(d, d), k_b=b(d),
                    v_w=w(d, d), v_b=b(d), o_w=w(d, d), o_b=b(d))

    def norm():
        return jnp.ones((d,), jnp.float32), jnp.zeros((d,), jnp.float32)

    def enc_layer():
        n1g, n1b = norm()
        n2g, n2b = norm()
        return dict(sa=attn(),
                    ff1_w=w(d, nhid), ff1_b=b(nhid),
                    ff2_w=w(nhid, d), ff2_b=b(d),
                    n1_g=n1g, n1_b=n1b, n2_g=n2g, n2_b=n2b)

    def dec_layer():
        n1g, n1b = norm()
        n2g, n2b = norm()
        n3g, n3b = norm()
        return dict(sa=attn(), ca=attn(),
                    ff1_w=w(d, nhid), ff1_b=b(nhid),
                    ff2_w=w(nhid, d), ff2_b=b(d),
                    n1_g=n1g, n1_b=n1b, n2_g=n2g, n2_b=n2b, n3_g=n3g, n3_b=n3b)

    eg, eb = norm()
    dg, db = norm()
    return dict(
        inp_w=w(idim, d), inp_b=b(d),       # nn.Linear(input_dim, d_model)
        outp_w=w(odim, d), outp_b=b(d),     # nn.Linear(output_dim, d_model)
        reg_w=w(d, odim), reg_b=b(odim),    # nn.Linear(d_model, output_dim)
        enc_layers=[enc_layer() for _ in range(nlayers)],
        dec_layers=[dec_layer() for _ in range(nlayers)],
        enc_norm_g=eg, enc_norm_b=eb,
        dec_norm_g=dg, dec_norm_b=db,
    )


# TODO(synk): autoregressive_inference (step-by-step decode loop) is not part
# of forward() and is not implemented here.

if __name__ == "__main__":
    cfg = dict(input_dim=32, output_dim=24, d_model=32, nhead=4, nhid=16,
               nlayers=2)
    B, Ss, St = 2, 8, 8

    key = jax.random.PRNGKey(0)
    k_in, k_fmri, k_params = jax.random.split(key, 3)
    input_seq = jax.random.normal(k_in, (B, Ss, cfg["input_dim"]), jnp.float32)
    fmri_seq = jax.random.normal(k_fmri, (B, St, cfg["output_dim"]), jnp.float32)
    src_lengths = jnp.array([8, 5], jnp.int32)
    tgt_lengths = jnp.array([8, 6], jnp.int32)

    params = init_params(k_params, cfg)

    fwd = jax.jit(functools.partial(fmri_transformer_forward, cfg=cfg))
    out = fwd(params, input_seq, fmri_seq, src_lengths, tgt_lengths)
    out = jax.block_until_ready(out)

    assert out.shape == (B, St, cfg["output_dim"]), out.shape
    assert bool(jnp.all(jnp.isfinite(out)))
    print("KERNEL_OK")
</pallas_src>

<mosaic_0001>
module attributes {stable_mosaic.version = 11 : i64} {
  func.func @_proj_pe_kernel(%arg0: i32, %arg1: memref<16x32xf32, #tpu.memory_space<vmem>>, %arg2: memref<32x32xbf16, #tpu.memory_space<vmem>>, %arg3: memref<1x32xf32, #tpu.memory_space<vmem>>, %arg4: memref<8x32xf32, #tpu.memory_space<vmem>>, %arg5: memref<16x32xbf16, #tpu.memory_space<vmem>>) attributes {dimension_semantics = [#tpu.dimension_semantics<parallel>], iteration_bounds = array<i64: 1>, scalar_prefetch = 0 : i64, scratch_operands = 0 : i64, tpu.core_type = #tpu.core_type<tc>, window_params = [{transform_indices = @transform_0, window_bounds = array<i64: 16, 32>}, {pipeline_mode = #tpu.pipeline_mode<synchronous>, transform_indices = @transform_1, window_bounds = array<i64: 32, 32>}, {pipeline_mode = #tpu.pipeline_mode<synchronous>, transform_indices = @transform_2, window_bounds = array<i64: 1, 32>}, {pipeline_mode = #tpu.pipeline_mode<synchronous>, transform_indices = @transform_3, window_bounds = array<i64: 8, 32>}, {transform_indices = @transform_4, window_bounds = array<i64: 16, 32>}]} {
    %c0 = arith.constant 0 : index
    %c0_0 = arith.constant 0 : index
    %0 = vector.load %arg1[%c0, %c0_0] : memref<16x32xf32, #tpu.memory_space<vmem>>, vector<16x32xf32>
    %1 = arith.truncf %0 : vector<16x32xf32> to vector<16x32xbf16>
    %c0_1 = arith.constant 0 : index
    %c0_2 = arith.constant 0 : index
    %2 = vector.load %arg2[%c0_1, %c0_2] : memref<32x32xbf16, #tpu.memory_space<vmem>>, vector<32x32xbf16>
    %cst = arith.constant dense<0.000000e+00> : vector<16x32xf32>
    %3 = tpu.matmul %1, %2, %cst {dimension_numbers = #tpu.dot_dimension_numbers<[1], [0], [0], [1], [0, 0, 1, 1], [], []>} : vector<16x32xbf16>, vector<32x32xbf16>, vector<16x32xf32> -> vector<16x32xf32>
    %c0_3 = arith.constant 0 : index
    %c0_4 = arith.constant 0 : index
    %4 = vector.load %arg3[%c0_3, %c0_4] : memref<1x32xf32, #tpu.memory_space<vmem>>, vector<1x32xf32>
    %5 = vector.broadcast %4 : vector<1x32xf32> to vector<16x32xf32>
    %6 = arith.addf %3, %5 : vector<16x32xf32>
    %c0_5 = arith.constant 0 : index
    %c0_6 = arith.constant 0 : index
    %7 = vector.load %arg4[%c0_5, %c0_6] : memref<8x32xf32, #tpu.memory_space<vmem>>, vector<8x32xf32>
    %8 = tpu.concatenate %7, %7 in 0 : vector<8x32xf32>, vector<8x32xf32> -> vector<16x32xf32>
    %9 = arith.addf %6, %8 : vector<16x32xf32>
    %10 = arith.truncf %9 : vector<16x32xf32> to vector<16x32xbf16>
    %c0_7 = arith.constant 0 : index
    %c0_8 = arith.constant 0 : index
    %11 = vector.load %arg5[%c0_7, %c0_8] : memref<16x32xbf16, #tpu.memory_space<vmem>>, vector<16x32xbf16>
    tpu.vector_store %arg5[%c0_7, %c0_8], %10 {strides = array<i32>} : memref<16x32xbf16, #tpu.memory_space<vmem>>, vector<16x32xbf16>,
    return
  }
  func.func @transform_0(%arg0: i32) -> (i32, i32) {
    %c0_i32 = arith.constant 0 : i32
    %c0_i32_0 = arith.constant 0 : i32
    return %arg0, %c0_i32 : i32, i32
  }
  func.func @transform_1(%arg0: i32) -> (i32, i32) {
    %c0_i32 = arith.constant 0 : i32
    %c0_i32_0 = arith.constant 0 : i32
    %c0_i32_1 = arith.constant 0 : i32
    return %c0_i32, %c0_i32_0 : i32, i32
  }
  func.func @transform_2(%arg0: i32) -> (i32, i32) {
    %c0_i32 = arith.constant 0 : i32
    %c0_i32_0 = arith.constant 0 : i32
    %c0_i32_1 = arith.constant 0 : i32
    return %c0_i32, %c0_i32_0 : i32, i32
  }
  func.func @transform_3(%arg0: i32) -> (i32, i32) {
    %c0_i32 = arith.constant 0 : i32
    %c0_i32_0 = arith.constant 0 : i32
    %c0_i32_1 = arith.constant 0 : i32
    return %c0_i32, %c0_i32_0 : i32, i32
  }
  func.func @transform_4(%arg0: i32) -> (i32, i32) {
    %c0_i32 = arith.constant 0 : i32
    %c0_i32_0 = arith.constant 0 : i32
    return %arg0, %c0_i32 : i32, i32
  }
}

module attributes {stable_mosaic.version = 11 : i64} {
  func.func @_self_attn_ln_kernel(%arg0: i32, %arg1: memref<2xi32, #tpu.memory_space<smem>>, %arg2: memref<16x32xbf16, #tpu.memory_space<vmem>>, %arg3: memref<32x32xbf16, #tpu.memory_space<vmem>>, %arg4: memref<1x32xf32, #tpu.memory_space<vmem>>, %arg5: memref<32x32xbf16, #tpu.memory_space<vmem>>, %arg6: memref<1x32xf32, #tpu.memory_space<vmem>>, %arg7: memref<32x32xbf16, #tpu.memory_space<vmem>>, %arg8: memref<1x32xf32, #tpu.memory_space<vmem>>, %arg9: memref<32x32xbf16, #tpu.memory_space<vmem>>, %arg10: memref<1x32xf32, #tpu.memory_space<vmem>>, %arg11: memref<1x32xf32, #tpu.memory_space<vmem>>, %arg12: memref<1x32xf32, #tpu.memory_space<vmem>>, %arg13: memref<16x32xbf16, #tpu.memory_space<vmem>>, %arg14: memref<16x32xf32, #tpu.memory_space<vmem>>) attributes {dimension_semantics = [#tpu.dimension_semantics<parallel>], iteration_bounds = array<i64: 1>, scalar_prefetch = 1 : i64, scratch_operands = 1 : i64, tpu.core_type = #tpu.core_type<tc>, window_params = [{transform_indices = @transform_0, window_bounds = array<i64: 16, 32>}, {pipeline_mode = #tpu.pipeline_mode<synchronous>, transform_indices = @transform_1, window_bounds = array<i64: 32, 32>}, {pipeline_mode = #tpu.pipeline_mode<synchronous>, transform_indices = @transform_2, window_bounds = array<i64: 1, 32>}, {pipeline_mode = #tpu.pipeline_mode<synchronous>, transform_indices = @transform_3, window_bounds = array<i64: 32, 32>}, {pipeline_mode = #tpu.pipeline_mode<synchronous>, transform_indices = @transform_4, window_bounds = array<i64: 1, 32>}, {pipeline_mode = #tpu.pipeline_mode<synchronous>, transform_indices = @transform_5, window_bounds = array<i64: 32, 32>}, {pipeline_mode = #tpu.pipeline_mode<synchronous>, transform_indices = @transform_6, window_bounds = array<i64: 1, 32>}, {pipeline_mode = #tpu.pipeline_mode<synchronous>, transform_indices = @transform_7, window_bounds = array<i64: 32, 32>}, {pipeline_mode = #tpu.pipeline_mode<synchronous>, transform_indices = @transform_8, window_bounds = array<i64: 1, 32>}, {pipeline_mode = #tpu.pipeline_mode<synchronous>, transform_indices = @transform_9, window_bounds = array<i64: 1, 32>}, {pipeline_mode = #tpu.pipeline_mode<synchronous>, transform_indices = @transform_10, window_bounds = array<i64: 1, 32>}, {transform_indices = @transform_11, window_bounds = array<i64: 16, 32>}]} {
    %c0 = arith.constant 0 : index
    %c0_0 = arith.constant 0 : index
    %0 = vector.load %arg2[%c0, %c0_0] : memref<16x32xbf16, #tpu.memory_space<vmem>>, vector<16x32xbf16>
    %1 = arith.extf %0 : vector<16x32xbf16> to vector<16x32xf32>
    %c0_1 = arith.constant 0 : index
    %c0_2 = arith.constant 0 : index
    %2 = vector.load %arg3[%c0_1, %c0_2] : memref<32x32xbf16, #tpu.memory_space<vmem>>, vector<32x32xbf16>
    %cst = arith.constant dense<0.000000e+00> : vector<16x32xf32>
    %3 = tpu.matmul %0, %2, %cst {dimension_numbers = #tpu.dot_dimension_numbers<[1], [0], [0], [1], [0, 0, 1, 1], [], []>} : vector<16x32xbf16>, vector<32x32xbf16>, vector<16x32xf32> -> vector<16x32xf32>
    %c0_3 = arith.constant 0 : index
    %c0_4 = arith.constant 0 : index
    %4 = vector.load %arg4[%c0_3, %c0_4] : memref<1x32xf32, #tpu.memory_space<vmem>>, vector<1x32xf32>
    %5 = vector.broadcast %4 : vector<1x32xf32> to vector<16x32xf32>
    %6 = arith.addf %3, %5 : vector<16x32xf32>
    %c0_5 = arith.constant 0 : index
    %c0_6 = arith.constant 0 : index
    %7 = vector.load %arg5[%c0_5, %c0_6] : memref<32x32xbf16, #tpu.memory_space<vmem>>, vector<32x32xbf16>
    %cst_7 = arith.constant dense<0.000000e+00> : vector<16x32xf32>
    %8 = tpu.matmul %0, %7, %cst_7 {dimension_numbers = #tpu.dot_dimension_numbers<[1], [0], [0], [1], [0, 0, 1, 1], [], []>} : vector<16x32xbf16>, vector<32x32xbf16>, vector<16x32xf32> -> vector<16x32xf32>
    %c0_8 = arith.constant 0 : index
    %c0_9 = arith.constant 0 : index
    %9 = vector.load %arg6[%c0_8, %c0_9] : memref<1x32xf32, #tpu.memory_space<vmem>>, vector<1x32xf32>
    %10 = vector.broadcast %9 : vector<1x32xf32> to vector<16x32xf32>
    %11 = arith.addf %8, %10 : vector<16x32xf32>
    %c0_10 = arith.constant 0 : index
    %c0_11 = arith.constant 0 : index
    %12 = vector.load %arg7[%c0_10, %c0_11] : memref<32x32xbf16, #tpu.memory_space<vmem>>, vector<32x32xbf16>
    %cst_12 = arith.constant dense<0.000000e+00> : vector<16x32xf32>
    %13 = tpu.matmul %0, %12, %cst_12 {dimension_numbers = #tpu.dot_dimension_numbers<[1], [0], [0], [1], [0, 0, 1, 1], [], []>} : vector<16x32xbf16>, vector<32x32xbf16>, vector<16x32xf32> -> vector<16x32xf32>
    %c0_13 = arith.constant 0 : index
    %c0_14 = arith.constant 0 : index
    %14 = vector.load %arg8[%c0_13, %c0_14] : memref<1x32xf32, #tpu.memory_space<vmem>>, vector<1x32xf32>
    %15 = vector.broadcast %14 : vector<1x32xf32> to vector<16x32xf32>
    %16 = arith.addf %13, %15 : vector<16x32xf32>
    %17 = arith.truncf %6 : vector<16x32xf32> to vector<16x32xbf16>
    %18 = arith.truncf %11 : vector<16x32xf32> to vector<16x32xbf16>
    %19 = arith.truncf %16 : vector<16x32xf32> to vector<16x32xbf16>
    %20 = tpu.iota {dimensions = array<i32: 1>} : vector<8x8xi32>
    %c2_i32 = arith.constant 2 : i32
    %21 = arith.muli %arg0, %c2_i32 : i32
    %c0_i32 = arith.constant 0 : i32
    %22 = arith.addi %21, %c0_i32 : i32
    %23 = arith.index_cast %22 : i32 to index
    %24 = memref.load %arg1[%23] : memref<2xi32, #tpu.memory_space<smem>>
    %25 = vector.broadcast %24 : i32 to vector<8x8xi32>
    %26 = arith.cmpi slt, %20, %25 : vector<8x8xi32>
    %cst_15 = arith.constant 0.000000e+00 : f32
    %cst_16 = arith.constant -1.000000e+30 : f32
    %27 = vector.broadcast %cst_15 : f32 to vector<8x8xf32>
    %28 = vector.broadcast %cst_16 : f32 to vector<8x8xf32>
    %29 = arith.select %26, %27, %28 : vector<8x8xi1>, vector<8x8xf32>
    %30 = vector.extract_strided_slice %17 {offsets = [0, 0], sizes = [8, 8], strides = [1, 1]} : vector<16x32xbf16> to vector<8x8xbf16>
    %31 = vector.extract_strided_slice %18 {offsets = [0, 0], sizes = [8, 8], strides = [1, 1]} : vector<16x32xbf16> to vector<8x8xbf16>
    %32 = vector.extract_strided_slice %19 {offsets = [0, 0], sizes = [8, 8], strides = [1, 1]} : vector<16x32xbf16> to vector<8x8xbf16>
    %cst_17 = arith.constant dense<0.000000e+00> : vector<8x8xf32>
    %33 = tpu.matmul %30, %31, %cst_17 {dimension_numbers = #tpu.dot_dimension_numbers<[1], [1], [0], [0], [0, 0, 1, 0], [], []>} : vector<8x8xbf16>, vector<8x8xbf16>, vector<8x8xf32> -> vector<8x8xf32>
    %34 = arith.addf %33, %29 : vector<8x8xf32>
    %cst_18 = arith.constant dense<0xFF800000> : vector<8xf32>
    %35 = vector.multi_reduction <maximumf>, %34, %cst_18 [1] : vector<8x8xf32> to vector<8xf32>
    %36 = vector.shape_cast %35 : vector<8xf32> to vector<8x1xf32>
    %37 = vector.broadcast %36 : vector<8x1xf32> to vector<8x8xf32>
    %38 = arith.subf %34, %37 : vector<8x8xf32>
    %39 = math.exp %38 : vector<8x8xf32>
    %cst_19 = arith.constant dense<0.000000e+00> : vector<8xf32>
    %40 = vector.multi_reduction <add>, %39, %cst_19 [1] : vector<8x8xf32> to vector<8xf32>
    %41 = vector.shape_cast %40 : vector<8xf32> to vector<8x1xf32>
    %42 = tpu.reciprocal %41 {approx = true} : vector<8x1xf32> -> vector<8x1xf32>
    %43 = vector.broadcast %42 : vector<8x1xf32> to vector<8x8xf32>
    %44 = arith.mulf %39, %43 : vector<8x8xf32>
    %45 = arith.truncf %44 : vector<8x8xf32> to vector<8x8xbf16>
    %cst_20 = arith.constant dense<0.000000e+00> : vector<8x8xf32>
    %46 = tpu.matmul %45, %32, %cst_20 {dimension_numbers = #tpu.dot_dimension_numbers<[1], [0], [0], [1], [0, 0, 1, 1], [], []>} : vector<8x8xbf16>, vector<8x8xbf16>, vector<8x8xf32> -> vector<8x8xf32>
    %c0_21 = arith.constant 0 : index
    %c0_22 = arith.constant 0 : index
    %47 = vector.load %arg14[%c0_21, %c0_22] : memref<16x32xf32, #tpu.memory_space<vmem>>, vector<8x8xf32>
    tpu.vector_store %arg14[%c0_21, %c0_22], %46 {strides = array<i32>} : memref<16x32xf32, #tpu.memory_space<vmem>>, vector<8x8xf32>,
    %48 = vector.extract_strided_slice %17 {offsets = [0, 8], sizes = [8, 8], strides = [1, 1]} : vector<16x32xbf16> to vector<8x8xbf16>
    %49 = vector.extract_strided_slice %18 {offsets = [0, 8], sizes = [8, 8], strides = [1, 1]} : vector<16x32xbf16> to vector<8x8xbf16>
    %50 = vector.extract_strided_slice %19 {offsets = [0, 8], sizes = [8, 8], strides = [1, 1]} : vector<16x32xbf16> to vector<8x8xbf16>
    %cst_23 = arith.constant dense<0.000000e+00> : vector<8x8xf32>
    %51 = tpu.matmul %48, %49, %cst_23 {dimension_numbers = #tpu.dot_dimension_numbers<[1], [1], [0], [0], [0, 0, 1, 0], [], []>} : vector<8x8xbf16>, vector<8x8xbf16>, vector<8x8xf32> -> vector<8x8xf32>
    %52 = arith.addf %51, %29 : vector<8x8xf32>
    %cst_24 = arith.constant dense<0xFF800000> : vector<8xf32>
    %53 = vector.multi_reduction <maximumf>, %52, %cst_24 [1] : vector<8x8xf32> to vector<8xf32>
    %54 = vector.shape_cast %53 : vector<8xf32> to vector<8x1xf32>
    %55 = vector.broadcast %54 : vector<8x1xf32> to vector<8x8xf32>
    %56 = arith.subf %52, %55 : vector<8x8xf32>
    %57 = math.exp %56 : vector<8x8xf32>
    %cst_25 = arith.constant dense<0.000000e+00> : vector<8xf32>
    %58 = vector.multi_reduction <add>, %57, %cst_25 [1] : vector<8x8xf32> to vector<8xf32>
    %59 = vector.shape_cast %58 : vector<8xf32> to vector<8x1xf32>
    %60 = tpu.reciprocal %59 {approx = true} : vector<8x1xf32> -> vector<8x1xf32>
    %61 = vector.broadcast %60 : vector<8x1xf32> to vector<8x8xf32>
    %62 = arith.mulf %57, %61 : vector<8x8xf32>
    %63 = arith.truncf %62 : vector<8x8xf32> to vector<8x8xbf16>
    %cst_26 = arith.constant dense<0.000000e+00> : vector<8x8xf32>
    %64 = tpu.matmul %63, %50, %cst_26 {dimension_numbers = #tpu.dot_dimension_numbers<[1], [0], [0], [1], [0, 0, 1, 1], [], []>} : vector<8x8xbf16>, vector<8x8xbf16>, vector<8x8xf32> -> vector<8x8xf32>
    %c0_27 = arith.constant 0 : index
    %c8 = arith.constant 8 : index
    %65 = vector.load %arg14[%c0_27, %c8] : memref<16x32xf32, #tpu.memory_space<vmem>>, vector<8x8xf32>
    tpu.vector_store %arg14[%c0_27, %c8], %64 {strides = array<i32>} : memref<16x32xf32, #tpu.memory_space<vmem>>, vector<8x8xf32>,
    %66 = vector.extract_strided_slice %17 {offsets = [0, 16], sizes = [8, 8], strides = [1, 1]} : vector<16x32xbf16> to vector<8x8xbf16>
    %67 = vector.extract_strided_slice %18 {offsets = [0, 16], sizes = [8, 8], strides = [1, 1]} : vector<16x32xbf16> to vector<8x8xbf16>
    %68 = vector.extract_strided_slice %19 {offsets = [0, 16], sizes = [8, 8], strides = [1, 1]} : vector<16x32xbf16> to vector<8x8xbf16>
    %cst_28 = arith.constant dense<0.000000e+00> : vector<8x8xf32>
    %69 = tpu.matmul %66, %67, %cst_28 {dimension_numbers = #tpu.dot_dimension_numbers<[1], [1], [0], [0], [0, 0, 1, 0], [], []>} : vector<8x8xbf16>, vector<8x8xbf16>, vector<8x8xf32> -> vector<8x8xf32>
    %70 = arith.addf %69, %29 : vector<8x8xf32>
    %cst_29 = arith.constant dense<0xFF800000> : vector<8xf32>
    %71 = vector.multi_reduction <maximumf>, %70, %cst_29 [1] : vector<8x8xf32> to vector<8xf32>
    %72 = vector.shape_cast %71 : vector<8xf32> to vector<8x1xf32>
    %73 = vector.broadcast %72 : vector<8x1xf32> to vector<8x8xf32>
    %74 = arith.subf %70, %73 : vector<8x8xf32>
    %75 = math.exp %74 : vector<8x8xf32>
    %cst_30 = arith.constant dense<0.000000e+00> : vector<8xf32>
    %76 = vector.multi_reduction <add>, %75, %cst_30 [1] : vector<8x8xf32> to vector<8xf32>
    %77 = vector.shape_cast %76 : vector<8xf32> to vector<8x1xf32>
    %78 = tpu.reciprocal %77 {approx = true} : vector<8x1xf32> -> vector<8x1xf32>
    %79 = vector.broadcast %78 : vector<8x1xf32> to vector<8x8xf32>
    %80 = arith.mulf %75, %79 : vector<8x8xf32>
    %81 = arith.truncf %80 : vector<8x8xf32> to vector<8x8xbf16>
    %cst_31 = arith.constant dense<0.000000e+00> : vector<8x8xf32>
    %82 = tpu.matmul %81, %68, %cst_31 {dimension_numbers = #tpu.dot_dimension_numbers<[1], [0], [0], [1], [0, 0, 1, 1], [], []>} : vector<8x8xbf16>, vector<8x8xbf16>, vector<8x8xf32> -> vector<8x8xf32>
    %c0_32 = arith.constant 0 : index
    %c16 = arith.constant 16 : index
    %83 = vector.load %arg14[%c0_32, %c16] : memref<16x32xf32, #tpu.memory_space<vmem>>, vector<8x8xf32>
    tpu.vector_store %arg14[%c0_32, %c16], %82 {strides = array<i32>} : memref<16x32xf32, #tpu.memory_space<vmem>>, vector<8x8xf32>,
    %84 = vector.extract_strided_slice %17 {offsets = [0, 24], sizes = [8, 8], strides = [1, 1]} : vector<16x32xbf16> to vector<8x8xbf16>
    %85 = vector.extract_strided_slice %18 {offsets = [0, 24], sizes = [8, 8], strides = [1, 1]} : vector<16x32xbf16> to vector<8x8xbf16>
    %86 = vector.extract_strided_slice %19 {offsets = [0, 24], sizes = [8, 8], strides = [1, 1]} : vector<16x32xbf16> to vector<8x8xbf16>
    %cst_33 = arith.constant dense<0.000000e+00> : vector<8x8xf32>
    %87 = tpu.matmul %84, %85, %cst_33 {dimension_numbers = #tpu.dot_dimension_numbers<[1], [1], [0], [0], [0, 0, 1, 0], [], []>} : vector<8x8xbf16>, vector<8x8xbf16>, vector<8x8xf32> -> vector<8x8xf32>
    %88 = arith.addf %87, %29 : vector<8x8xf32>
    %cst_34 = arith.constant dense<0xFF800000> : vector<8xf32>
    %89 = vector.multi_reduction <maximumf>, %88, %cst_34 [1] : vector<8x8xf32> to vector<8xf32>
    %90 = vector.shape_cast %89 : vector<8xf32> to vector<8x1xf32>
    %91 = vector.broadcast %90 : vector<8x1xf32> to vector<8x8xf32>
    %92 = arith.subf %88, %91 : vector<8x8xf32>
    %93 = math.exp %92 : vector<8x8xf32>
    %cst_35 = arith.constant dense<0.000000e+00> : vector<8xf32>
    %94 = vector.multi_reduction <add>, %93, %cst_35 [1] : vector<8x8xf32> to vector<8xf32>
    %95 = vector.shape_cast %94 : vector<8xf32> to vector<8x1xf32>
    %96 = tpu.reciprocal %95 {approx = true} : vector<8x1xf32> -> vector<8x1xf32>
    %97 = vector.broadcast %96 : vector<8x1xf32> to vector<8x8xf32>
    %98 = arith.mulf %93, %97 : vector<8x8xf32>
    %99 = arith.truncf %98 : vector<8x8xf32> to vector<8x8xbf16>
    %cst_36 = arith.constant dense<0.000000e+00> : vector<8x8xf32>
    %100 = tpu.matmul %99, %86, %cst_36 {dimension_numbers = #tpu.dot_dimension_numbers<[1], [0], [0], [1], [0, 0, 1, 1], [], []>} : vector<8x8xbf16>, vector<8x8xbf16>, vector<8x8xf32> -> vector<8x8xf32>
    %c0_37 = arith.constant 0 : index
    %c24 = arith.constant 24 : index
    %101 = vector.load %arg14[%c0_37, %c24] : memref<16x32xf32, #tpu.memory_space<vmem>>, vector<8x8xf32>
    tpu.vector_store %arg14[%c0_37, %c24], %100 {strides = array<i32>} : memref<16x32xf32, #tpu.memory_space<vmem>>, vector<8x8xf32>,
    %c2_i32_38 = arith.constant 2 : i32
    %102 = arith.muli %arg0, %c2_i32_38 : i32
    %c1_i32 = arith.constant 1 : i32
    %103 = arith.addi %102, %c1_i32 : i32
    %104 = arith.index_cast %103 : i32 to index
    %105 = memref.load %arg1[%104] : memref<2xi32, #tpu.memory_space<smem>>
    %106 = vector.broadcast %105 : i32 to vector<8x8xi32>
    %107 = arith.cmpi slt, %20, %106 : vector<8x8xi32>
    %cst_39 = arith.constant 0.000000e+00 : f32
    %cst_40 = arith.constant -1.000000e+30 : f32
    %108 = vector.broadcast %cst_39 : f32 to vector<8x8xf32>
    %109 = vector.broadcast %cst_40 : f32 to vector<8x8xf32>
    %110 = arith.select %107, %108, %109 : vector<8x8xi1>, vector<8x8xf32>
    %111 = vector.extract_strided_slice %17 {offsets = [8, 0], sizes = [8, 8], strides = [1, 1]} : vector<16x32xbf16> to vector<8x8xbf16>
    %112 = vector.extract_strided_slice %18 {offsets = [8, 0], sizes = [8, 8], strides = [1, 1]} : vector<16x32xbf16> to vector<8x8xbf16>
    %113 = vector.extract_strided_slice %19 {offsets = [8, 0], sizes = [8, 8], strides = [1, 1]} : vector<16x32xbf16> to vector<8x8xbf16>
    %cst_41 = arith.constant dense<0.000000e+00> : vector<8x8xf32>
    %114 = tpu.matmul %111, %112, %cst_41 {dimension_numbers = #tpu.dot_dimension_numbers<[1], [1], [0], [0], [0, 0, 1, 0], [], []>} : vector<8x8xbf16>, vector<8x8xbf16>, vector<8x8xf32> -> vector<8x8xf32>
    %115 = arith.addf %114, %110 : vector<8x8xf32>
    %cst_42 = arith.constant dense<0xFF800000> : vector<8xf32>
    %116 = vector.multi_reduction <maximumf>, %115, %cst_42 [1] : vector<8x8xf32> to vector<8xf32>
    %117 = vector.shape_cast %116 : vector<8xf32> to vector<8x1xf32>
    %118 = vector.broadcast %117 : vector<8x1xf32> to vector<8x8xf32>
    %119 = arith.subf %115, %118 : vector<8x8xf32>
    %120 = math.exp %119 : vector<8x8xf32>
    %cst_43 = arith.constant dense<0.000000e+00> : vector<8xf32>
    %121 = vector.multi_reduction <add>, %120, %cst_43 [1] : vector<8x8xf32> to vector<8xf32>
    %122 = vector.shape_cast %121 : vector<8xf32> to vector<8x1xf32>
    %123 = tpu.reciprocal %122 {approx = true} : vector<8x1xf32> -> vector<8x1xf32>
    %124 = vector.broadcast %123 : vector<8x1xf32> to vector<8x8xf32>
    %125 = arith.mulf %120, %124 : vector<8x8xf32>
    %126 = arith.truncf %125 : vector<8x8xf32> to vector<8x8xbf16>
    %cst_44 = arith.constant dense<0.000000e+00> : vector<8x8xf32>
    %127 = tpu.matmul %126, %113, %cst_44 {dimension_numbers = #tpu.dot_dimension_numbers<[1], [0], [0], [1], [0, 0, 1, 1], [], []>} : vector<8x8xbf16>, vector<8x8xbf16>, vector<8x8xf32> -> vector<8x8xf32>
    %c8_45 = arith.constant 8 : index
    %c0_46 = arith.constant 0 : index
    %128 = vector.load %arg14[%c8_45, %c0_46] : memref<16x32xf32, #tpu.memory_space<vmem>>, vector<8x8xf32>
    tpu.vector_store %arg14[%c8_45, %c0_46], %127 {strides = array<i32>} : memref<16x32xf32, #tpu.memory_space<vmem>>, vector<8x8xf32>,
    %129 = vector.extract_strided_slice %17 {offsets = [8, 8], sizes = [8, 8], strides = [1, 1]} : vector<16x32xbf16> to vector<8x8xbf16>
    %130 = vector.extract_strided_slice %18 {offsets = [8, 8], sizes = [8, 8], strides = [1, 1]} : vector<16x32xbf16> to vector<8x8xbf16>
    %131 = vector.extract_strided_slice %19 {offsets = [8, 8], sizes = [8, 8], strides = [1, 1]} : vector<16x32xbf16> to vector<8x8xbf16>
    %cst_47 = arith.constant dense<0.000000e+00> : vector<8x8xf32>
    %132 = tpu.matmul %129, %130, %cst_47 {dimension_numbers = #tpu.dot_dimension_numbers<[1], [1], [0], [0], [0, 0, 1, 0], [], []>} : vector<8x8xbf16>, vector<8x8xbf16>, vector<8x8xf32> -> vector<8x8xf32>
    %133 = arith.addf %132, %110 : vector<8x8xf32>
    %cst_48 = arith.constant dense<0xFF800000> : vector<8xf32>
    %134 = vector.multi_reduction <maximumf>, %133, %cst_48 [1] : vector<8x8xf32> to vector<8xf32>
    %135 = vector.shape_cast %134 : vector<8xf32> to vector<8x1xf32>
    %136 = vector.broadcast %135 : vector<8x1xf32> to vector<8x8xf32>
    %137 = arith.subf %133, %136 : vector<8x8xf32>
    %138 = math.exp %137 : vector<8x8xf32>
    %cst_49 = arith.constant dense<0.000000e+00> : vector<8xf32>
    %139 = vector.multi_reduction <add>, %138, %cst_49 [1] : vector<8x8xf32> to vector<8xf32>
    %140 = vector.shape_cast %139 : vector<8xf32> to vector<8x1xf32>
    %141 = tpu.reciprocal %140 {approx = true} : vector<8x1xf32> -> vector<8x1xf32>
    %142 = vector.broadcast %141 : vector<8x1xf32> to vector<8x8xf32>
    %143 = arith.mulf %138, %142 : vector<8x8xf32>
    %144 = arith.truncf %143 : vector<8x8xf32> to vector<8x8xbf16>
    %cst_50 = arith.constant dense<0.000000e+00> : vector<8x8xf32>
    %145 = tpu.matmul %144, %131, %cst_50 {dimension_numbers = #tpu.dot_dimension_numbers<[1], [0], [0], [1], [0, 0, 1, 1], [], []>} : vector<8x8xbf16>, vector<8x8xbf16>, vector<8x8xf32> -> vector<8x8xf32>
    %c8_51 = arith.constant 8 : index
    %c8_52 = arith.constant 8 : index
    %146 = vector.load %arg14[%c8_51, %c8_52] : memref<16x32xf32, #tpu.memory_space<vmem>>, vector<8x8xf32>
    tpu.vector_store %arg14[%c8_51, %c8_52], %145 {strides = array<i32>} : memref<16x32xf32, #tpu.memory_space<vmem>>, vector<8x8xf32>,
    %147 = vector.extract_strided_slice %17 {offsets = [8, 16], sizes = [8, 8], strides = [1, 1]} : vector<16x32xbf16> to vector<8x8xbf16>
    %148 = vector.extract_strided_slice %18 {offsets = [8, 16], sizes = [8, 8], strides = [1, 1]} : vector<16x32xbf16> to vector<8x8xbf16>
    %149 = vector.extract_strided_slice %19 {offsets = [8, 16], sizes = [8, 8], strides = [1, 1]} : vector<16x32xbf16> to vector<8x8xbf16>
    %cst_53 = arith.constant dense<0.000000e+00> : vector<8x8xf32>
    %150 = tpu.matmul %147, %148, %cst_53 {dimension_numbers = #tpu.dot_dimension_numbers<[1], [1], [0], [0], [0, 0, 1, 0], [], []>} : vector<8x8xbf16>, vector<8x8xbf16>, vector<8x8xf32> -> vector<8x8xf32>
    %151 = arith.addf %150, %110 : vector<8x8xf32>
    %cst_54 = arith.constant dense<0xFF800000> : vector<8xf32>
    %152 = vector.multi_reduction <maximumf>, %151, %cst_54 [1] : vector<8x8xf32> to vector<8xf32>
    %153 = vector.shape_cast %152 : vector<8xf32> to vector<8x1xf32>
    %154 = vector.broadcast %153 : vector<8x1xf32> to vector<8x8xf32>
    %155 = arith.subf %151, %154 : vector<8x8xf32>
    %156 = math.exp %155 : vector<8x8xf32>
    %cst_55 = arith.constant dense<0.000000e+00> : vector<8xf32>
    %157 = vector.multi_reduction <add>, %156, %cst_55 [1] : vector<8x8xf32> to vector<8xf32>
    %158 = vector.shape_cast %157 : vector<8xf32> to vector<8x1xf32>
    %159 = tpu.reciprocal %158 {approx = true} : vector<8x1xf32> -> vector<8x1xf32>
    %160 = vector.broadcast %159 : vector<8x1xf32> to vector<8x8xf32>
    %161 = arith.mulf %156, %160 : vector<8x8xf32>
    %162 = arith.truncf %161 : vector<8x8xf32> to vector<8x8xbf16>
    %cst_56 = arith.constant dense<0.000000e+00> : vector<8x8xf32>
    %163 = tpu.matmul %162, %149, %cst_56 {dimension_numbers = #tpu.dot_dimension_numbers<[1], [0], [0], [1], [0, 0, 1, 1], [], []>} : vector<8x8xbf16>, vector<8x8xbf16>, vector<8x8xf32> -> vector<8x8xf32>
    %c8_57 = arith.constant 8 : index
    %c16_58 = arith.constant 16 : index
    %164 = vector.load %arg14[%c8_57, %c16_58] : memref<16x32xf32, #tpu.memory_space<vmem>>, vector<8x8xf32>
    tpu.vector_store %arg14[%c8_57, %c16_58], %163 {strides = array<i32>} : memref<16x32xf32, #tpu.memory_space<vmem>>, vector<8x8xf32>,
    %165 = vector.extract_strided_slice %17 {offsets = [8, 24], sizes = [8, 8], strides = [1, 1]} : vector<16x32xbf16> to vector<8x8xbf16>
    %166 = vector.extract_strided_slice %18 {offsets = [8, 24], sizes = [8, 8], strides = [1, 1]} : vector<16x32xbf16> to vector<8x8xbf16>
    %167 = vector.extract_strided_slice %19 {offsets = [8, 24], sizes = [8, 8], strides = [1, 1]} : vector<16x32xbf16> to vector<8x8xbf16>
    %cst_59 = arith.constant dense<0.000000e+00> : vector<8x8xf32>
    %168 = tpu.matmul %165, %166, %cst_59 {dimension_numbers = #tpu.dot_dimension_numbers<[1], [1], [0], [0], [0, 0, 1, 0], [], []>} : vector<8x8xbf16>, vector<8x8xbf16>, vector<8x8xf32> -> vector<8x8xf32>
    %169 = arith.addf %168, %110 : vector<8x8xf32>
    %cst_60 = arith.constant dense<0xFF800000> : vector<8xf32>
    %170 = vector.multi_reduction <maximumf>, %169, %cst_60 [1] : vector<8x8xf32> to vector<8xf32>
    %171 = vector.shape_cast %170 : vector<8xf32> to vector<8x1xf32>
    %172 = vector.broadcast %171 : vector<8x1xf32> to vector<8x8xf32>
    %173 = arith.subf %169, %172 : vector<8x8xf32>
    %174 = math.exp %173 : vector<8x8xf32>
    %cst_61 = arith.constant dense<0.000000e+00> : vector<8xf32>
    %175 = vector.multi_reduction <add>, %174, %cst_61 [1] : vector<8x8xf32> to vector<8xf32>
    %176 = vector.shape_cast %175 : vector<8xf32> to vector<8x1xf32>
    %177 = tpu.reciprocal %176 {approx = true} : vector<8x1xf32> -> vector<8x1xf32>
    %178 = vector.broadcast %177 : vector<8x1xf32> to vector<8x8xf32>
    %179 = arith.mulf %174, %178 : vector<8x8xf32>
    %180 = arith.truncf %179 : vector<8x8xf32> to vector<8x8xbf16>
    %cst_62 = arith.constant dense<0.000000e+00> : vector<8x8xf32>
    %181 = tpu.matmul %180, %167, %cst_62 {dimension_numbers = #tpu.dot_dimension_numbers<[1], [0], [0], [1], [0, 0, 1, 1], [], []>} : vector<8x8xbf16>, vector<8x8xbf16>, vector<8x8xf32> -> vector<8x8xf32>
    %c8_63 = arith.constant 8 : index
    %c24_64 = arith.constant 24 : index
    %182 = vector.load %arg14[%c8_63, %c24_64] : memref<16x32xf32, #tpu.memory_space<vmem>>, vector<8x8xf32>
    tpu.vector_store %arg14[%c8_63, %c24_64], %181 {strides = array<i32>} : memref<16x32xf32, #tpu.memory_space<vmem>>, vector<8x8xf32>,
    %c0_65 = arith.constant 0 : index
    %c0_66 = arith.constant 0 : index
    %183 = vector.load %arg14[%c0_65, %c0_66] : memref<16x32xf32, #tpu.memory_space<vmem>>, vector<16x32xf32>
    %184 = arith.truncf %183 : vector<16x32xf32> to vector<16x32xbf16>
    %c0_67 = arith.constant 0 : index
    %c0_68 = arith.constant 0 : index
    %185 = vector.load %arg9[%c0_67, %c0_68] : memref<32x32xbf16, #tpu.memory_space<vmem>>, vector<32x32xbf16>
    %cst_69 = arith.constant dense<0.000000e+00> : vector<16x32xf32>
    %186 = tpu.matmul %184, %185, %cst_69 {dimension_numbers = #tpu.dot_dimension_numbers<[1], [0], [0], [1], [0, 0, 1, 1], [], []>} : vector<16x32xbf16>, vector<32x32xbf16>, vector<16x32xf32> -> vector<16x32xf32>
    %c0_70 = arith.constant 0 : index
    %c0_71 = arith.constant 0 : index
    %187 = vector.load %arg10[%c0_70, %c0_71] : memref<1x32xf32, #tpu.memory_space<vmem>>, vector<1x32xf32>
    %188 = vector.broadcast %187 : vector<1x32xf32> to vector<16x32xf32>
    %189 = arith.addf %186, %188 : vector<16x32xf32>
    %190 = arith.addf %1, %189 : vector<16x32xf32>
    %cst_72 = arith.constant dense<0.000000e+00> : vector<16xf32>
    %191 = vector.multi_reduction <add>, %190, %cst_72 [1] : vector<16x32xf32> to vector<16xf32>
    %192 = vector.shape_cast %191 : vector<16xf32> to vector<16x1xf32>
    %cst_73 = arith.constant 3.200000e+01 : f32
    %193 = vector.broadcast %cst_73 : f32 to vector<16x1xf32>
    %194 = arith.divf %192, %193 : vector<16x1xf32>
    %195 = vector.broadcast %194 : vector<16x1xf32> to vector<16x32xf32>
    %196 = arith.subf %190, %195 : vector<16x32xf32>
    %197 = arith.mulf %196, %196 : vector<16x32xf32>
    %cst_74 = arith.constant dense<0.000000e+00> : vector<16xf32>
    %198 = vector.multi_reduction <add>, %197, %cst_74 [1] : vector<16x32xf32> to vector<16xf32>
    %199 = vector.shape_cast %198 : vector<16xf32> to vector<16x1xf32>
    %cst_75 = arith.constant 3.200000e+01 : f32
    %200 = vector.broadcast %cst_75 : f32 to vector<16x1xf32>
    %201 = arith.divf %199, %200 : vector<16x1xf32>
    %202 = vector.broadcast %194 : vector<16x1xf32> to vector<16x32xf32>
    %203 = arith.subf %190, %202 : vector<16x32xf32>
    %cst_76 = arith.constant 9.99999974E-6 : f32
    %204 = vector.broadcast %cst_76 : f32 to vector<16x1xf32>
    %205 = arith.addf %201, %204 : vector<16x1xf32>
    %206 = math.rsqrt %205 : vector<16x1xf32>
    %207 = vector.broadcast %206 : vector<16x1xf32> to vector<16x32xf32>
    %208 = arith.mulf %203, %207 : vector<16x32xf32>
    %c0_77 = arith.constant 0 : index
    %c0_78 = arith.constant 0 : index
    %209 = vector.load %arg11[%c0_77, %c0_78] : memref<1x32xf32, #tpu.memory_space<vmem>>, vector<1x32xf32>
    %210 = vector.broadcast %209 : vector<1x32xf32> to vector<16x32xf32>
    %211 = arith.mulf %208, %210 : vector<16x32xf32>
    %c0_79 = arith.constant 0 : index
    %c0_80 = arith.constant 0 : index
    %212 = vector.load %arg12[%c0_79, %c0_80] : memref<1x32xf32, #tpu.memory_space<vmem>>, vector<1x32xf32>
    %213 = vector.broadcast %212 : vector<1x32xf32> to vector<16x32xf32>
    %214 = arith.addf %211, %213 : vector<16x32xf32>
    %215 = arith.truncf %214 : vector<16x32xf32> to vector<16x32xbf16>
    %c0_81 = arith.constant 0 : index
    %c0_82 = arith.constant 0 : index
    %216 = vector.load %arg13[%c0_81, %c0_82] : memref<16x32xbf16, #tpu.memory_space<vmem>>, vector<16x32xbf16>
    tpu.vector_store %arg13[%c0_81, %c0_82], %215 {strides = array<i32>} : memref<16x32xbf16, #tpu.memory_space<vmem>>, vector<16x32xbf16>,
    return
  }
  func.func @transform_0(%arg0: i32, %arg1: memref<2xi32, #tpu.memory_space<smem>>) -> (i32, i32) {
    %c0_i32 = arith.constant 0 : i32
    %c0_i32_0 = arith.constant 0 : i32
    return %arg0, %c0_i32 : i32, i32
  }
  func.func @transform_1(%arg0: i32, %arg1: memref<2xi32, #tpu.memory_space<smem>>) -> (i32, i32) {
    %c0_i32 = arith.constant 0 : i32
    %c0_i32_0 = arith.constant 0 : i32
    %c0_i32_1 = arith.constant 0 : i32
    return %c0_i32, %c0_i32_0 : i32, i32
  }
  func.func @transform_2(%arg0: i32, %arg1: memref<2xi32, #tpu.memory_space<smem>>) -> (i32, i32) {
    %c0_i32 = arith.constant 0 : i32
    %c0_i32_0 = arith.constant 0 : i32
    %c0_i32_1 = arith.constant 0 : i32
    return %c0_i32, %c0_i32_0 : i32, i32
  }
  func.func @transform_3(%arg0: i32, %arg1: memref<2xi32, #tpu.memory_space<smem>>) -> (i32, i32) {
    %c0_i32 = arith.constant 0 : i32
    %c0_i32_0 = arith.constant 0 : i32
    %c0_i32_1 = arith.constant 0 : i32
    return %c0_i32, %c0_i32_0 : i32, i32
  }
  func.func @transform_4(%arg0: i32, %arg1: memref<2xi32, #tpu.memory_space<smem>>) -> (i32, i32) {
    %c0_i32 = arith.constant 0 : i32
    %c0_i32_0 = arith.constant 0 : i32
    %c0_i32_1 = arith.constant 0 : i32
    return %c0_i32, %c0_i32_0 : i32, i32
  }
  func.func @transform_5(%arg0: i32, %arg1: memref<2xi32, #tpu.memory_space<smem>>) -> (i32, i32) {
    %c0_i32 = arith.constant 0 : i32
    %c0_i32_0 = arith.constant 0 : i32
    %c0_i32_1 = arith.constant 0 : i32
    return %c0_i32, %c0_i32_0 : i32, i32
  }
  func.func @transform_6(%arg0: i32, %arg1: memref<2xi32, #tpu.memory_space<smem>>) -> (i32, i32) {
    %c0_i32 = arith.constant 0 : i32
    %c0_i32_0 = arith.constant 0 : i32
    %c0_i32_1 = arith.constant 0 : i32
    return %c0_i32, %c0_i32_0 : i32, i32
  }
  func.func @transform_7(%arg0: i32, %arg1: memref<2xi32, #tpu.memory_space<smem>>) -> (i32, i32) {
    %c0_i32 = arith.constant 0 : i32
    %c0_i32_0 = arith.constant 0 : i32
    %c0_i32_1 = arith.constant 0 : i32
    return %c0_i32, %c0_i32_0 : i32, i32
  }
  func.func @transform_8(%arg0: i32, %arg1: memref<2xi32, #tpu.memory_space<smem>>) -> (i32, i32) {
    %c0_i32 = arith.constant 0 : i32
    %c0_i32_0 = arith.constant 0 : i32
    %c0_i32_1 = arith.constant 0 : i32
    return %c0_i32, %c0_i32_0 : i32, i32
  }
  func.func @transform_9(%arg0: i32, %arg1: memref<2xi32, #tpu.memory_space<smem>>) -> (i32, i32) {
    %c0_i32 = arith.constant 0 : i32
    %c0_i32_0 = arith.constant 0 : i32
    %c0_i32_1 = arith.constant 0 : i32
    return %c0_i32, %c0_i32_0 : i32, i32
  }
  func.func @transform_10(%arg0: i32, %arg1: memref<2xi32, #tpu.memory_space<smem>>) -> (i32, i32) {
    %c0_i32 = arith.constant 0 : i32
    %c0_i32_0 = arith.constant 0 : i32
    %c0_i32_1 = arith.constant 0 : i32
    return %c0_i32, %c0_i32_0 : i32, i32
  }
  func.func @transform_11(%arg0: i32, %arg1: memref<2xi32, #tpu.memory_space<smem>>) -> (i32, i32) {
    %c0_i32 = arith.constant 0 : i32
    %c0_i32_0 = arith.constant 0 : i32
    return %arg0, %c0_i32 : i32, i32
  }
}

module attributes {stable_mosaic.version = 11 : i64} {
  func.func @_ffn_ln_kernel(%arg0: i32, %arg1: memref<16x32xbf16, #tpu.memory_space<vmem>>, %arg2: memref<32x16xbf16, #tpu.memory_space<vmem>>, %arg3: memref<1x16xf32, #tpu.memory_space<vmem>>, %arg4: memref<16x32xbf16, #tpu.memory_space<vmem>>, %arg5: memref<1x32xf32, #tpu.memory_space<vmem>>, %arg6: memref<1x32xf32, #tpu.memory_space<vmem>>, %arg7: memref<1x32xf32, #tpu.memory_space<vmem>>, %arg8: memref<1x32xf32, #tpu.memory_space<vmem>>, %arg9: memref<1x32xf32, #tpu.memory_space<vmem>>, %arg10: memref<16x32xbf16, #tpu.memory_space<vmem>>) attributes {dimension_semantics = [#tpu.dimension_semantics<parallel>], iteration_bounds = array<i64: 1>, scalar_prefetch = 0 : i64, scratch_operands = 0 : i64, tpu.core_type = #tpu.core_type<tc>, window_params = [{transform_indices = @transform_0, window_bounds = array<i64: 16, 32>}, {pipeline_mode = #tpu.pipeline_mode<synchronous>, transform_indices = @transform_1, window_bounds = array<i64: 32, 16>}, {pipeline_mode = #tpu.pipeline_mode<synchronous>, transform_indices = @transform_2, window_bounds = array<i64: 1, 16>}, {pipeline_mode = #tpu.pipeline_mode<synchronous>, transform_indices = @transform_3, window_bounds = array<i64: 16, 32>}, {pipeline_mode = #tpu.pipeline_mode<synchronous>, transform_indices = @transform_4, window_bounds = array<i64: 1, 32>}, {pipeline_mode = #tpu.pipeline_mode<synchronous>, transform_indices = @transform_5, window_bounds = array<i64: 1, 32>}, {pipeline_mode = #tpu.pipeline_mode<synchronous>, transform_indices = @transform_6, window_bounds = array<i64: 1, 32>}, {pipeline_mode = #tpu.pipeline_mode<synchronous>, transform_indices = @transform_7, window_bounds = array<i64: 1, 32>}, {pipeline_mode = #tpu.pipeline_mode<synchronous>, transform_indices = @transform_8, window_bounds = array<i64: 1, 32>}, {transform_indices = @transform_9, window_bounds = array<i64: 16, 32>}]} {
    %c0 = arith.constant 0 : index
    %c0_0 = arith.constant 0 : index
    %0 = vector.load %arg1[%c0, %c0_0] : memref<16x32xbf16, #tpu.memory_space<vmem>>, vector<16x32xbf16>
    %1 = arith.extf %0 : vector<16x32xbf16> to vector<16x32xf32>
    %c0_1 = arith.constant 0 : index
    %c0_2 = arith.constant 0 : index
    %2 = vector.load %arg2[%c0_1, %c0_2] : memref<32x16xbf16, #tpu.memory_space<vmem>>, vector<32x16xbf16>
    %cst = arith.constant dense<0.000000e+00> : vector<16x16xf32>
    %3 = tpu.matmul %0, %2, %cst {dimension_numbers = #tpu.dot_dimension_numbers<[1], [0], [0], [1], [0, 0, 1, 1], [], []>} : vector<16x32xbf16>, vector<32x16xbf16>, vector<16x16xf32> -> vector<16x16xf32>
    %c0_3 = arith.constant 0 : index
    %c0_4 = arith.constant 0 : index
    %4 = vector.load %arg3[%c0_3, %c0_4] : memref<1x16xf32, #tpu.memory_space<vmem>>, vector<1x16xf32>
    %5 = vector.broadcast %4 : vector<1x16xf32> to vector<16x16xf32>
    %6 = arith.addf %3, %5 : vector<16x16xf32>
    %cst_5 = arith.constant 0.000000e+00 : f32
    %7 = vector.broadcast %cst_5 : f32 to vector<16x16xf32>
    %8 = arith.maximumf %6, %7 : vector<16x16xf32>
    %9 = arith.truncf %8 : vector<16x16xf32> to vector<16x16xbf16>
    %c0_6 = arith.constant 0 : index
    %c0_7 = arith.constant 0 : index
    %10 = vector.load %arg4[%c0_6, %c0_7] : memref<16x32xbf16, #tpu.memory_space<vmem>>, vector<16x32xbf16>
    %cst_8 = arith.constant dense<0.000000e+00> : vector<16x32xf32>
    %11 = tpu.matmul %9, %10, %cst_8 {dimension_numbers = #tpu.dot_dimension_numbers<[1], [0], [0], [1], [0, 0, 1, 1], [], []>} : vector<16x16xbf16>, vector<16x32xbf16>, vector<16x32xf32> -> vector<16x32xf32>
    %c0_9 = arith.constant 0 : index
    %c0_10 = arith.constant 0 : index
    %12 = vector.load %arg5[%c0_9, %c0_10] : memref<1x32xf32, #tpu.memory_space<vmem>>, vector<1x32xf32>
    %13 = vector.broadcast %12 : vector<1x32xf32> to vector<16x32xf32>
    %14 = arith.addf %11, %13 : vector<16x32xf32>
    %15 = arith.addf %1, %14 : vector<16x32xf32>
    %cst_11 = arith.constant dense<0.000000e+00> : vector<16xf32>
    %16 = vector.multi_reduction <add>, %15, %cst_11 [1] : vector<16x32xf32> to vector<16xf32>
    %17 = vector.shape_cast %16 : vector<16xf32> to vector<16x1xf32>
    %cst_12 = arith.constant 3.200000e+01 : f32
    %18 = vector.broadcast %cst_12 : f32 to vector<16x1xf32>
    %19 = arith.divf %17, %18 : vector<16x1xf32>
    %20 = vector.broadcast %19 : vector<16x1xf32> to vector<16x32xf32>
    %21 = arith.subf %15, %20 : vector<16x32xf32>
    %22 = arith.mulf %21, %21 : vector<16x32xf32>
    %cst_13 = arith.constant dense<0.000000e+00> : vector<16xf32>
    %23 = vector.multi_reduction <add>, %22, %cst_13 [1] : vector<16x32xf32> to vector<16xf32>
    %24 = vector.shape_cast %23 : vector<16xf32> to vector<16x1xf32>
    %cst_14 = arith.constant 3.200000e+01 : f32
    %25 = vector.broadcast %cst_14 : f32 to vector<16x1xf32>
    %26 = arith.divf %24, %25 : vector<16x1xf32>
    %27 = vector.broadcast %19 : vector<16x1xf32> to vector<16x32xf32>
    %28 = arith.subf %15, %27 : vector<16x32xf32>
    %cst_15 = arith.constant 9.99999974E-6 : f32
    %29 = vector.broadcast %cst_15 : f32 to vector<16x1xf32>
    %30 = arith.addf %26, %29 : vector<16x1xf32>
    %31 = math.rsqrt %30 : vector<16x1xf32>
    %32 = vector.broadcast %31 : vector<16x1xf32> to vector<16x32xf32>
    %33 = arith.mulf %28, %32 : vector<16x32xf32>
    %c0_16 = arith.constant 0 : index
    %c0_17 = arith.constant 0 : index
    %34 = vector.load %arg6[%c0_16, %c0_17] : memref<1x32xf32, #tpu.memory_space<vmem>>, vector<1x32xf32>
    %35 = vector.broadcast %34 : vector<1x32xf32> to vector<16x32xf32>
    %36 = arith.mulf %33, %35 : vector<16x32xf32>
    %c0_18 = arith.constant 0 : index
    %c0_19 = arith.constant 0 : index
    %37 = vector.load %arg7[%c0_18, %c0_19] : memref<1x32xf32, #tpu.memory_space<vmem>>, vector<1x32xf32>
    %38 = vector.broadcast %37 : vector<1x32xf32> to vector<16x32xf32>
    %39 = arith.addf %36, %38 : vector<16x32xf32>
    %cst_20 = arith.constant dense<0.000000e+00> : vector<16xf32>
    %40 = vector.multi_reduction <add>, %39, %cst_20 [1] : vector<16x32xf32> to vector<16xf32>
    %41 = vector.shape_cast %40 : vector<16xf32> to vector<16x1xf32>
    %cst_21 = arith.constant 3.200000e+01 : f32
    %42 = vector.broadcast %cst_21 : f32 to vector<16x1xf32>
    %43 = arith.divf %41, %42 : vector<16x1xf32>
    %44 = vector.broadcast %43 : vector<16x1xf32> to vector<16x32xf32>
    %45 = arith.subf %39, %44 : vector<16x32xf32>
    %46 = arith.mulf %45, %45 : vector<16x32xf32>
    %cst_22 = arith.constant dense<0.000000e+00> : vector<16xf32>
    %47 = vector.multi_reduction <add>, %46, %cst_22 [1] : vector<16x32xf32> to vector<16xf32>
    %48 = vector.shape_cast %47 : vector<16xf32> to vector<16x1xf32>
    %cst_23 = arith.constant 3.200000e+01 : f32
    %49 = vector.broadcast %cst_23 : f32 to vector<16x1xf32>
    %50 = arith.divf %48, %49 : vector<16x1xf32>
    %51 = vector.broadcast %43 : vector<16x1xf32> to vector<16x32xf32>
    %52 = arith.subf %39, %51 : vector<16x32xf32>
    %cst_24 = arith.constant 9.99999974E-6 : f32
    %53 = vector.broadcast %cst_24 : f32 to vector<16x1xf32>
    %54 = arith.addf %50, %53 : vector<16x1xf32>
    %55 = math.rsqrt %54 : vector<16x1xf32>
    %56 = vector.broadcast %55 : vector<16x1xf32> to vector<16x32xf32>
    %57 = arith.mulf %52, %56 : vector<16x32xf32>
    %c0_25 = arith.constant 0 : index
    %c0_26 = arith.constant 0 : index
    %58 = vector.load %arg8[%c0_25, %c0_26] : memref<1x32xf32, #tpu.memory_space<vmem>>, vector<1x32xf32>
    %59 = vector.broadcast %58 : vector<1x32xf32> to vector<16x32xf32>
    %60 = arith.mulf %57, %59 : vector<16x32xf32>
    %c0_27 = arith.constant 0 : index
    %c0_28 = arith.constant 0 : index
    %61 = vector.load %arg9[%c0_27, %c0_28] : memref<1x32xf32, #tpu.memory_space<vmem>>, vector<1x32xf32>
    %62 = vector.broadcast %61 : vector<1x32xf32> to vector<16x32xf32>
    %63 = arith.addf %60, %62 : vector<16x32xf32>
    %64 = arith.truncf %63 : vector<16x32xf32> to vector<16x32xbf16>
    %c0_29 = arith.constant 0 : index
    %c0_30 = arith.constant 0 : index
    %65 = vector.load %arg10[%c0_29, %c0_30] : memref<16x32xbf16, #tpu.memory_space<vmem>>, vector<16x32xbf16>
    tpu.vector_store %arg10[%c0_29, %c0_30], %64 {strides = array<i32>} : memref<16x32xbf16, #tpu.memory_space<vmem>>, vector<16x32xbf16>,
    return
  }
  func.func @transform_0(%arg0: i32) -> (i32, i32) {
    %c0_i32 = arith.constant 0 : i32
    %c0_i32_0 = arith.constant 0 : i32
    return %arg0, %c0_i32 : i32, i32
  }
  func.func @transform_1(%arg0: i32) -> (i32, i32) {
    %c0_i32 = arith.constant 0 : i32
    %c0_i32_0 = arith.constant 0 : i32
    %c0_i32_1 = arith.constant 0 : i32
    return %c0_i32, %c0_i32_0 : i32, i32
  }
  func.func @transform_2(%arg0: i32) -> (i32, i32) {
    %c0_i32 = arith.constant 0 : i32
    %c0_i32_0 = arith.constant 0 : i32
    %c0_i32_1 = arith.constant 0 : i32
    return %c0_i32, %c0_i32_0 : i32, i32
  }
  func.func @transform_3(%arg0: i32) -> (i32, i32) {
    %c0_i32 = arith.constant 0 : i32
    %c0_i32_0 = arith.constant 0 : i32
    %c0_i32_1 = arith.constant 0 : i32
    return %c0_i32, %c0_i32_0 : i32, i32
  }
  func.func @transform_4(%arg0: i32) -> (i32, i32) {
    %c0_i32 = arith.constant 0 : i32
    %c0_i32_0 = arith.constant 0 : i32
    %c0_i32_1 = arith.constant 0 : i32
    return %c0_i32, %c0_i32_0 : i32, i32
  }
  func.func @transform_5(%arg0: i32) -> (i32, i32) {
    %c0_i32 = arith.constant 0 : i32
    %c0_i32_0 = arith.constant 0 : i32
    %c0_i32_1 = arith.constant 0 : i32
    return %c0_i32, %c0_i32_0 : i32, i32
  }
  func.func @transform_6(%arg0: i32) -> (i32, i32) {
    %c0_i32 = arith.constant 0 : i32
    %c0_i32_0 = arith.constant 0 : i32
    %c0_i32_1 = arith.constant 0 : i32
    return %c0_i32, %c0_i32_0 : i32, i32
  }
  func.func @transform_7(%arg0: i32) -> (i32, i32) {
    %c0_i32 = arith.constant 0 : i32
    %c0_i32_0 = arith.constant 0 : i32
    %c0_i32_1 = arith.constant 0 : i32
    return %c0_i32, %c0_i32_0 : i32, i32
  }
  func.func @transform_8(%arg0: i32) -> (i32, i32) {
    %c0_i32 = arith.constant 0 : i32
    %c0_i32_0 = arith.constant 0 : i32
    %c0_i32_1 = arith.constant 0 : i32
    return %c0_i32, %c0_i32_0 : i32, i32
  }
  func.func @transform_9(%arg0: i32) -> (i32, i32) {
    %c0_i32 = arith.constant 0 : i32
    %c0_i32_0 = arith.constant 0 : i32
    return %arg0, %c0_i32 : i32, i32
  }
}

module attributes {stable_mosaic.version = 11 : i64} {
  func.func @_ffn_ln_kernel(%arg0: i32, %arg1: memref<16x32xbf16, #tpu.memory_space<vmem>>, %arg2: memref<32x16xbf16, #tpu.memory_space<vmem>>, %arg3: memref<1x16xf32, #tpu.memory_space<vmem>>, %arg4: memref<16x32xbf16, #tpu.memory_space<vmem>>, %arg5: memref<1x32xf32, #tpu.memory_space<vmem>>, %arg6: memref<1x32xf32, #tpu.memory_space<vmem>>, %arg7: memref<1x32xf32, #tpu.memory_space<vmem>>, %arg8: memref<16x32xbf16, #tpu.memory_space<vmem>>) attributes {dimension_semantics = [#tpu.dimension_semantics<parallel>], iteration_bounds = array<i64: 1>, scalar_prefetch = 0 : i64, scratch_operands = 0 : i64, tpu.core_type = #tpu.core_type<tc>, window_params = [{transform_indices = @transform_0, window_bounds = array<i64: 16, 32>}, {pipeline_mode = #tpu.pipeline_mode<synchronous>, transform_indices = @transform_1, window_bounds = array<i64: 32, 16>}, {pipeline_mode = #tpu.pipeline_mode<synchronous>, transform_indices = @transform_2, window_bounds = array<i64: 1, 16>}, {pipeline_mode = #tpu.pipeline_mode<synchronous>, transform_indices = @transform_3, window_bounds = array<i64: 16, 32>}, {pipeline_mode = #tpu.pipeline_mode<synchronous>, transform_indices = @transform_4, window_bounds = array<i64: 1, 32>}, {pipeline_mode = #tpu.pipeline_mode<synchronous>, transform_indices = @transform_5, window_bounds = array<i64: 1, 32>}, {pipeline_mode = #tpu.pipeline_mode<synchronous>, transform_indices = @transform_6, window_bounds = array<i64: 1, 32>}, {transform_indices = @transform_7, window_bounds = array<i64: 16, 32>}]} {
    %c0 = arith.constant 0 : index
    %c0_0 = arith.constant 0 : index
    %0 = vector.load %arg1[%c0, %c0_0] : memref<16x32xbf16, #tpu.memory_space<vmem>>, vector<16x32xbf16>
    %1 = arith.extf %0 : vector<16x32xbf16> to vector<16x32xf32>
    %c0_1 = arith.constant 0 : index
    %c0_2 = arith.constant 0 : index
    %2 = vector.load %arg2[%c0_1, %c0_2] : memref<32x16xbf16, #tpu.memory_space<vmem>>, vector<32x16xbf16>
    %cst = arith.constant dense<0.000000e+00> : vector<16x16xf32>
    %3 = tpu.matmul %0, %2, %cst {dimension_numbers = #tpu.dot_dimension_numbers<[1], [0], [0], [1], [0, 0, 1, 1], [], []>} : vector<16x32xbf16>, vector<32x16xbf16>, vector<16x16xf32> -> vector<16x16xf32>
    %c0_3 = arith.constant 0 : index
    %c0_4 = arith.constant 0 : index
    %4 = vector.load %arg3[%c0_3, %c0_4] : memref<1x16xf32, #tpu.memory_space<vmem>>, vector<1x16xf32>
    %5 = vector.broadcast %4 : vector<1x16xf32> to vector<16x16xf32>
    %6 = arith.addf %3, %5 : vector<16x16xf32>
    %cst_5 = arith.constant 0.000000e+00 : f32
    %7 = vector.broadcast %cst_5 : f32 to vector<16x16xf32>
    %8 = arith.maximumf %6, %7 : vector<16x16xf32>
    %9 = arith.truncf %8 : vector<16x16xf32> to vector<16x16xbf16>
    %c0_6 = arith.constant 0 : index
    %c0_7 = arith.constant 0 : index
    %10 = vector.load %arg4[%c0_6, %c0_7] : memref<16x32xbf16, #tpu.memory_space<vmem>>, vector<16x32xbf16>
    %cst_8 = arith.constant dense<0.000000e+00> : vector<16x32xf32>
    %11 = tpu.matmul %9, %10, %cst_8 {dimension_numbers = #tpu.dot_dimension_numbers<[1], [0], [0], [1], [0, 0, 1, 1], [], []>} : vector<16x16xbf16>, vector<16x32xbf16>, vector<16x32xf32> -> vector<16x32xf32>
    %c0_9 = arith.constant 0 : index
    %c0_10 = arith.constant 0 : index
    %12 = vector.load %arg5[%c0_9, %c0_10] : memref<1x32xf32, #tpu.memory_space<vmem>>, vector<1x32xf32>
    %13 = vector.broadcast %12 : vector<1x32xf32> to vector<16x32xf32>
    %14 = arith.addf %11, %13 : vector<16x32xf32>
    %15 = arith.addf %1, %14 : vector<16x32xf32>
    %cst_11 = arith.constant dense<0.000000e+00> : vector<16xf32>
    %16 = vector.multi_reduction <add>, %15, %cst_11 [1] : vector<16x32xf32> to vector<16xf32>
    %17 = vector.shape_cast %16 : vector<16xf32> to vector<16x1xf32>
    %cst_12 = arith.constant 3.200000e+01 : f32
    %18 = vector.broadcast %cst_12 : f32 to vector<16x1xf32>
    %19 = arith.divf %17, %18 : vector<16x1xf32>
    %20 = vector.broadcast %19 : vector<16x1xf32> to vector<16x32xf32>
    %21 = arith.subf %15, %20 : vector<16x32xf32>
    %22 = arith.mulf %21, %21 : vector<16x32xf32>
    %cst_13 = arith.constant dense<0.000000e+00> : vector<16xf32>
    %23 = vector.multi_reduction <add>, %22, %cst_13 [1] : vector<16x32xf32> to vector<16xf32>
    %24 = vector.shape_cast %23 : vector<16xf32> to vector<16x1xf32>
    %cst_14 = arith.constant 3.200000e+01 : f32
    %25 = vector.broadcast %cst_14 : f32 to vector<16x1xf32>
    %26 = arith.divf %24, %25 : vector<16x1xf32>
    %27 = vector.broadcast %19 : vector<16x1xf32> to vector<16x32xf32>
    %28 = arith.subf %15, %27 : vector<16x32xf32>
    %cst_15 = arith.constant 9.99999974E-6 : f32
    %29 = vector.broadcast %cst_15 : f32 to vector<16x1xf32>
    %30 = arith.addf %26, %29 : vector<16x1xf32>
    %31 = math.rsqrt %30 : vector<16x1xf32>
    %32 = vector.broadcast %31 : vector<16x1xf32> to vector<16x32xf32>
    %33 = arith.mulf %28, %32 : vector<16x32xf32>
    %c0_16 = arith.constant 0 : index
    %c0_17 = arith.constant 0 : index
    %34 = vector.load %arg6[%c0_16, %c0_17] : memref<1x32xf32, #tpu.memory_space<vmem>>, vector<1x32xf32>
    %35 = vector.broadcast %34 : vector<1x32xf32> to vector<16x32xf32>
    %36 = arith.mulf %33, %35 : vector<16x32xf32>
    %c0_18 = arith.constant 0 : index
    %c0_19 = arith.constant 0 : index
    %37 = vector.load %arg7[%c0_18, %c0_19] : memref<1x32xf32, #tpu.memory_space<vmem>>, vector<1x32xf32>
    %38 = vector.broadcast %37 : vector<1x32xf32> to vector<16x32xf32>
    %39 = arith.addf %36, %38 : vector<16x32xf32>
    %40 = arith.truncf %39 : vector<16x32xf32> to vector<16x32xbf16>
    %c0_20 = arith.constant 0 : index
    %c0_21 = arith.constant 0 : index
    %41 = vector.load %arg8[%c0_20, %c0_21] : memref<16x32xbf16, #tpu.memory_space<vmem>>, vector<16x32xbf16>
    tpu.vector_store %arg8[%c0_20, %c0_21], %40 {strides = array<i32>} : memref<16x32xbf16, #tpu.memory_space<vmem>>, vector<16x32xbf16>,
    return
  }
  func.func @transform_0(%arg0: i32) -> (i32, i32) {
    %c0_i32 = arith.constant 0 : i32
    %c0_i32_0 = arith.constant 0 : i32
    return %arg0, %c0_i32 : i32, i32
  }
  func.func @transform_1(%arg0: i32) -> (i32, i32) {
    %c0_i32 = arith.constant 0 : i32
    %c0_i32_0 = arith.constant 0 : i32
    %c0_i32_1 = arith.constant 0 : i32
    return %c0_i32, %c0_i32_0 : i32, i32
  }
  func.func @transform_2(%arg0: i32) -> (i32, i32) {
    %c0_i32 = arith.constant 0 : i32
    %c0_i32_0 = arith.constant 0 : i32
    %c0_i32_1 = arith.constant 0 : i32
    return %c0_i32, %c0_i32_0 : i32, i32
  }
  func.func @transform_3(%arg0: i32) -> (i32, i32) {
    %c0_i32 = arith.constant 0 : i32
    %c0_i32_0 = arith.constant 0 : i32
    %c0_i32_1 = arith.constant 0 : i32
    return %c0_i32, %c0_i32_0 : i32, i32
  }
  func.func @transform_4(%arg0: i32) -> (i32, i32) {
    %c0_i32 = arith.constant 0 : i32
    %c0_i32_0 = arith.constant 0 : i32
    %c0_i32_1 = arith.constant 0 : i32
    return %c0_i32, %c0_i32_0 : i32, i32
  }
  func.func @transform_5(%arg0: i32) -> (i32, i32) {
    %c0_i32 = arith.constant 0 : i32
    %c0_i32_0 = arith.constant 0 : i32
    %c0_i32_1 = arith.constant 0 : i32
    return %c0_i32, %c0_i32_0 : i32, i32
  }
  func.func @transform_6(%arg0: i32) -> (i32, i32) {
    %c0_i32 = arith.constant 0 : i32
    %c0_i32_0 = arith.constant 0 : i32
    %c0_i32_1 = arith.constant 0 : i32
    return %c0_i32, %c0_i32_0 : i32, i32
  }
  func.func @transform_7(%arg0: i32) -> (i32, i32) {
    %c0_i32 = arith.constant 0 : i32
    %c0_i32_0 = arith.constant 0 : i32
    return %arg0, %c0_i32 : i32, i32
  }
}

module attributes {stable_mosaic.version = 11 : i64} {
  func.func @_proj_pe_kernel(%arg0: i32, %arg1: memref<16x24xf32, #tpu.memory_space<vmem>>, %arg2: memref<24x32xbf16, #tpu.memory_space<vmem>>, %arg3: memref<1x32xf32, #tpu.memory_space<vmem>>, %arg4: memref<8x32xf32, #tpu.memory_space<vmem>>, %arg5: memref<16x32xbf16, #tpu.memory_space<vmem>>) attributes {dimension_semantics = [#tpu.dimension_semantics<parallel>], iteration_bounds = array<i64: 1>, scalar_prefetch = 0 : i64, scratch_operands = 0 : i64, tpu.core_type = #tpu.core_type<tc>, window_params = [{transform_indices = @transform_0, window_bounds = array<i64: 16, 24>}, {pipeline_mode = #tpu.pipeline_mode<synchronous>, transform_indices = @transform_1, window_bounds = array<i64: 24, 32>}, {pipeline_mode = #tpu.pipeline_mode<synchronous>, transform_indices = @transform_2, window_bounds = array<i64: 1, 32>}, {pipeline_mode = #tpu.pipeline_mode<synchronous>, transform_indices = @transform_3, window_bounds = array<i64: 8, 32>}, {transform_indices = @transform_4, window_bounds = array<i64: 16, 32>}]} {
    %c0 = arith.constant 0 : index
    %c0_0 = arith.constant 0 : index
    %0 = vector.load %arg1[%c0, %c0_0] : memref<16x24xf32, #tpu.memory_space<vmem>>, vector<16x24xf32>
    %1 = arith.truncf %0 : vector<16x24xf32> to vector<16x24xbf16>
    %c0_1 = arith.constant 0 : index
    %c0_2 = arith.constant 0 : index
    %2 = vector.load %arg2[%c0_1, %c0_2] : memref<24x32xbf16, #tpu.memory_space<vmem>>, vector<24x32xbf16>
    %cst = arith.constant dense<0.000000e+00> : vector<16x32xf32>
    %3 = tpu.matmul %1, %2, %cst {dimension_numbers = #tpu.dot_dimension_numbers<[1], [0], [0], [1], [0, 0, 1, 1], [], []>} : vector<16x24xbf16>, vector<24x32xbf16>, vector<16x32xf32> -> vector<16x32xf32>
    %c0_3 = arith.constant 0 : index
    %c0_4 = arith.constant 0 : index
    %4 = vector.load %arg3[%c0_3, %c0_4] : memref<1x32xf32, #tpu.memory_space<vmem>>, vector<1x32xf32>
    %5 = vector.broadcast %4 : vector<1x32xf32> to vector<16x32xf32>
    %6 = arith.addf %3, %5 : vector<16x32xf32>
    %c0_5 = arith.constant 0 : index
    %c0_6 = arith.constant 0 : index
    %7 = vector.load %arg4[%c0_5, %c0_6] : memref<8x32xf32, #tpu.memory_space<vmem>>, vector<8x32xf32>
    %8 = tpu.concatenate %7, %7 in 0 : vector<8x32xf32>, vector<8x32xf32> -> vector<16x32xf32>
    %9 = arith.addf %6, %8 : vector<16x32xf32>
    %10 = arith.truncf %9 : vector<16x32xf32> to vector<16x32xbf16>
    %c0_7 = arith.constant 0 : index
    %c0_8 = arith.constant 0 : index
    %11 = vector.load %arg5[%c0_7, %c0_8] : memref<16x32xbf16, #tpu.memory_space<vmem>>, vector<16x32xbf16>
    tpu.vector_store %arg5[%c0_7, %c0_8], %10 {strides = array<i32>} : memref<16x32xbf16, #tpu.memory_space<vmem>>, vector<16x32xbf16>,
    return
  }
  func.func @transform_0(%arg0: i32) -> (i32, i32) {
    %c0_i32 = arith.constant 0 : i32
    %c0_i32_0 = arith.constant 0 : i32
    return %arg0, %c0_i32 : i32, i32
  }
  func.func @transform_1(%arg0: i32) -> (i32, i32) {
    %c0_i32 = arith.constant 0 : i32
    %c0_i32_0 = arith.constant 0 : i32
    %c0_i32_1 = arith.constant 0 : i32
    return %c0_i32, %c0_i32_0 : i32, i32
  }
  func.func @transform_2(%arg0: i32) -> (i32, i32) {
    %c0_i32 = arith.constant 0 : i32
    %c0_i32_0 = arith.constant 0 : i32
    %c0_i32_1 = arith.constant 0 : i32
    return %c0_i32, %c0_i32_0 : i32, i32
  }
  func.func @transform_3(%arg0: i32) -> (i32, i32) {
    %c0_i32 = arith.constant 0 : i32
    %c0_i32_0 = arith.constant 0 : i32
    %c0_i32_1 = arith.constant 0 : i32
    return %c0_i32, %c0_i32_0 : i32, i32
  }
  func.func @transform_4(%arg0: i32) -> (i32, i32) {
    %c0_i32 = arith.constant 0 : i32
    %c0_i32_0 = arith.constant 0 : i32
    return %arg0, %c0_i32 : i32, i32
  }
}

module attributes {stable_mosaic.version = 11 : i64} {
  func.func @_self_attn_ln_kernel(%arg0: i32, %arg1: memref<2xi32, #tpu.memory_space<smem>>, %arg2: memref<16x32xbf16, #tpu.memory_space<vmem>>, %arg3: memref<32x32xbf16, #tpu.memory_space<vmem>>, %arg4: memref<1x32xf32, #tpu.memory_space<vmem>>, %arg5: memref<32x32xbf16, #tpu.memory_space<vmem>>, %arg6: memref<1x32xf32, #tpu.memory_space<vmem>>, %arg7: memref<32x32xbf16, #tpu.memory_space<vmem>>, %arg8: memref<1x32xf32, #tpu.memory_space<vmem>>, %arg9: memref<32x32xbf16, #tpu.memory_space<vmem>>, %arg10: memref<1x32xf32, #tpu.memory_space<vmem>>, %arg11: memref<1x32xf32, #tpu.memory_space<vmem>>, %arg12: memref<1x32xf32, #tpu.memory_space<vmem>>, %arg13: memref<16x32xbf16, #tpu.memory_space<vmem>>, %arg14: memref<16x32xf32, #tpu.memory_space<vmem>>) attributes {dimension_semantics = [#tpu.dimension_semantics<parallel>], iteration_bounds = array<i64: 1>, scalar_prefetch = 1 : i64, scratch_operands = 1 : i64, tpu.core_type = #tpu.core_type<tc>, window_params = [{transform_indices = @transform_0, window_bounds = array<i64: 16, 32>}, {pipeline_mode = #tpu.pipeline_mode<synchronous>, transform_indices = @transform_1, window_bounds = array<i64: 32, 32>}, {pipeline_mode = #tpu.pipeline_mode<synchronous>, transform_indices = @transform_2, window_bounds = array<i64: 1, 32>}, {pipeline_mode = #tpu.pipeline_mode<synchronous>, transform_indices = @transform_3, window_bounds = array<i64: 32, 32>}, {pipeline_mode = #tpu.pipeline_mode<synchronous>, transform_indices = @transform_4, window_bounds = array<i64: 1, 32>}, {pipeline_mode = #tpu.pipeline_mode<synchronous>, transform_indices = @transform_5, window_bounds = array<i64: 32, 32>}, {pipeline_mode = #tpu.pipeline_mode<synchronous>, transform_indices = @transform_6, window_bounds = array<i64: 1, 32>}, {pipeline_mode = #tpu.pipeline_mode<synchronous>, transform_indices = @transform_7, window_bounds = array<i64: 32, 32>}, {pipeline_mode = #tpu.pipeline_mode<synchronous>, transform_indices = @transform_8, window_bounds = array<i64: 1, 32>}, {pipeline_mode = #tpu.pipeline_mode<synchronous>, transform_indices = @transform_9, window_bounds = array<i64: 1, 32>}, {pipeline_mode = #tpu.pipeline_mode<synchronous>, transform_indices = @transform_10, window_bounds = array<i64: 1, 32>}, {transform_indices = @transform_11, window_bounds = array<i64: 16, 32>}]} {
    %c0 = arith.constant 0 : index
    %c0_0 = arith.constant 0 : index
    %0 = vector.load %arg2[%c0, %c0_0] : memref<16x32xbf16, #tpu.memory_space<vmem>>, vector<16x32xbf16>
    %1 = arith.extf %0 : vector<16x32xbf16> to vector<16x32xf32>
    %c0_1 = arith.constant 0 : index
    %c0_2 = arith.constant 0 : index
    %2 = vector.load %arg3[%c0_1, %c0_2] : memref<32x32xbf16, #tpu.memory_space<vmem>>, vector<32x32xbf16>
    %cst = arith.constant dense<0.000000e+00> : vector<16x32xf32>
    %3 = tpu.matmul %0, %2, %cst {dimension_numbers = #tpu.dot_dimension_numbers<[1], [0], [0], [1], [0, 0, 1, 1], [], []>} : vector<16x32xbf16>, vector<32x32xbf16>, vector<16x32xf32> -> vector<16x32xf32>
    %c0_3 = arith.constant 0 : index
    %c0_4 = arith.constant 0 : index
    %4 = vector.load %arg4[%c0_3, %c0_4] : memref<1x32xf32, #tpu.memory_space<vmem>>, vector<1x32xf32>
    %5 = vector.broadcast %4 : vector<1x32xf32> to vector<16x32xf32>
    %6 = arith.addf %3, %5 : vector<16x32xf32>
    %c0_5 = arith.constant 0 : index
    %c0_6 = arith.constant 0 : index
    %7 = vector.load %arg5[%c0_5, %c0_6] : memref<32x32xbf16, #tpu.memory_space<vmem>>, vector<32x32xbf16>
    %cst_7 = arith.constant dense<0.000000e+00> : vector<16x32xf32>
    %8 = tpu.matmul %0, %7, %cst_7 {dimension_numbers = #tpu.dot_dimension_numbers<[1], [0], [0], [1], [0, 0, 1, 1], [], []>} : vector<16x32xbf16>, vector<32x32xbf16>, vector<16x32xf32> -> vector<16x32xf32>
    %c0_8 = arith.constant 0 : index
    %c0_9 = arith.constant 0 : index
    %9 = vector.load %arg6[%c0_8, %c0_9] : memref<1x32xf32, #tpu.memory_space<vmem>>, vector<1x32xf32>
    %10 = vector.broadcast %9 : vector<1x32xf32> to vector<16x32xf32>
    %11 = arith.addf %8, %10 : vector<16x32xf32>
    %c0_10 = arith.constant 0 : index
    %c0_11 = arith.constant 0 : index
    %12 = vector.load %arg7[%c0_10, %c0_11] : memref<32x32xbf16, #tpu.memory_space<vmem>>, vector<32x32xbf16>
    %cst_12 = arith.constant dense<0.000000e+00> : vector<16x32xf32>
    %13 = tpu.matmul %0, %12, %cst_12 {dimension_numbers = #tpu.dot_dimension_numbers<[1], [0], [0], [1], [0, 0, 1, 1], [], []>} : vector<16x32xbf16>, vector<32x32xbf16>, vector<16x32xf32> -> vector<16x32xf32>
    %c0_13 = arith.constant 0 : index
    %c0_14 = arith.constant 0 : index
    %14 = vector.load %arg8[%c0_13, %c0_14] : memref<1x32xf32, #tpu.memory_space<vmem>>, vector<1x32xf32>
    %15 = vector.broadcast %14 : vector<1x32xf32> to vector<16x32xf32>
    %16 = arith.addf %13, %15 : vector<16x32xf32>
    %17 = arith.truncf %6 : vector<16x32xf32> to vector<16x32xbf16>
    %18 = arith.truncf %11 : vector<16x32xf32> to vector<16x32xbf16>
    %19 = arith.truncf %16 : vector<16x32xf32> to vector<16x32xbf16>
    %20 = tpu.iota {dimensions = array<i32: 1>} : vector<8x8xi32>
    %21 = tpu.iota {dimensions = array<i32: 0>} : vector<8x8xi32>
    %c2_i32 = arith.constant 2 : i32
    %22 = arith.muli %arg0, %c2_i32 : i32
    %c0_i32 = arith.constant 0 : i32
    %23 = arith.addi %22, %c0_i32 : i32
    %24 = arith.index_cast %23 : i32 to index
    %25 = memref.load %arg1[%24] : memref<2xi32, #tpu.memory_space<smem>>
    %26 = vector.broadcast %25 : i32 to vector<8x8xi32>
    %27 = arith.cmpi slt, %20, %26 : vector<8x8xi32>
    %28 = arith.cmpi sle, %20, %21 : vector<8x8xi32>
    %29 = arith.andi %27, %28 : vector<8x8xi1>
    %cst_15 = arith.constant 0.000000e+00 : f32
    %cst_16 = arith.constant -1.000000e+30 : f32
    %30 = vector.broadcast %cst_15 : f32 to vector<8x8xf32>
    %31 = vector.broadcast %cst_16 : f32 to vector<8x8xf32>
    %32 = arith.select %29, %30, %31 : vector<8x8xi1>, vector<8x8xf32>
    %33 = vector.extract_strided_slice %17 {offsets = [0, 0], sizes = [8, 8], strides = [1, 1]} : vector<16x32xbf16> to vector<8x8xbf16>
    %34 = vector.extract_strided_slice %18 {offsets = [0, 0], sizes = [8, 8], strides = [1, 1]} : vector<16x32xbf16> to vector<8x8xbf16>
    %35 = vector.extract_strided_slice %19 {offsets = [0, 0], sizes = [8, 8], strides = [1, 1]} : vector<16x32xbf16> to vector<8x8xbf16>
    %cst_17 = arith.constant dense<0.000000e+00> : vector<8x8xf32>
    %36 = tpu.matmul %33, %34, %cst_17 {dimension_numbers = #tpu.dot_dimension_numbers<[1], [1], [0], [0], [0, 0, 1, 0], [], []>} : vector<8x8xbf16>, vector<8x8xbf16>, vector<8x8xf32> -> vector<8x8xf32>
    %37 = arith.addf %36, %32 : vector<8x8xf32>
    %cst_18 = arith.constant dense<0xFF800000> : vector<8xf32>
    %38 = vector.multi_reduction <maximumf>, %37, %cst_18 [1] : vector<8x8xf32> to vector<8xf32>
    %39 = vector.shape_cast %38 : vector<8xf32> to vector<8x1xf32>
    %40 = vector.broadcast %39 : vector<8x1xf32> to vector<8x8xf32>
    %41 = arith.subf %37, %40 : vector<8x8xf32>
    %42 = math.exp %41 : vector<8x8xf32>
    %cst_19 = arith.constant dense<0.000000e+00> : vector<8xf32>
    %43 = vector.multi_reduction <add>, %42, %cst_19 [1] : vector<8x8xf32> to vector<8xf32>
    %44 = vector.shape_cast %43 : vector<8xf32> to vector<8x1xf32>
    %45 = tpu.reciprocal %44 {approx = true} : vector<8x1xf32> -> vector<8x1xf32>
    %46 = vector.broadcast %45 : vector<8x1xf32> to vector<8x8xf32>
    %47 = arith.mulf %42, %46 : vector<8x8xf32>
    %48 = arith.truncf %47 : vector<8x8xf32> to vector<8x8xbf16>
    %cst_20 = arith.constant dense<0.000000e+00> : vector<8x8xf32>
    %49 = tpu.matmul %48, %35, %cst_20 {dimension_numbers = #tpu.dot_dimension_numbers<[1], [0], [0], [1], [0, 0, 1, 1], [], []>} : vector<8x8xbf16>, vector<8x8xbf16>, vector<8x8xf32> -> vector<8x8xf32>
    %c0_21 = arith.constant 0 : index
    %c0_22 = arith.constant 0 : index
    %50 = vector.load %arg14[%c0_21, %c0_22] : memref<16x32xf32, #tpu.memory_space<vmem>>, vector<8x8xf32>
    tpu.vector_store %arg14[%c0_21, %c0_22], %49 {strides = array<i32>} : memref<16x32xf32, #tpu.memory_space<vmem>>, vector<8x8xf32>,
    %51 = vector.extract_strided_slice %17 {offsets = [0, 8], sizes = [8, 8], strides = [1, 1]} : vector<16x32xbf16> to vector<8x8xbf16>
    %52 = vector.extract_strided_slice %18 {offsets = [0, 8], sizes = [8, 8], strides = [1, 1]} : vector<16x32xbf16> to vector<8x8xbf16>
    %53 = vector.extract_strided_slice %19 {offsets = [0, 8], sizes = [8, 8], strides = [1, 1]} : vector<16x32xbf16> to vector<8x8xbf16>
    %cst_23 = arith.constant dense<0.000000e+00> : vector<8x8xf32>
    %54 = tpu.matmul %51, %52, %cst_23 {dimension_numbers = #tpu.dot_dimension_numbers<[1], [1], [0], [0], [0, 0, 1, 0], [], []>} : vector<8x8xbf16>, vector<8x8xbf16>, vector<8x8xf32> -> vector<8x8xf32>
    %55 = arith.addf %54, %32 : vector<8x8xf32>
    %cst_24 = arith.constant dense<0xFF800000> : vector<8xf32>
    %56 = vector.multi_reduction <maximumf>, %55, %cst_24 [1] : vector<8x8xf32> to vector<8xf32>
    %57 = vector.shape_cast %56 : vector<8xf32> to vector<8x1xf32>
    %58 = vector.broadcast %57 : vector<8x1xf32> to vector<8x8xf32>
    %59 = arith.subf %55, %58 : vector<8x8xf32>
    %60 = math.exp %59 : vector<8x8xf32>
    %cst_25 = arith.constant dense<0.000000e+00> : vector<8xf32>
    %61 = vector.multi_reduction <add>, %60, %cst_25 [1] : vector<8x8xf32> to vector<8xf32>
    %62 = vector.shape_cast %61 : vector<8xf32> to vector<8x1xf32>
    %63 = tpu.reciprocal %62 {approx = true} : vector<8x1xf32> -> vector<8x1xf32>
    %64 = vector.broadcast %63 : vector<8x1xf32> to vector<8x8xf32>
    %65 = arith.mulf %60, %64 : vector<8x8xf32>
    %66 = arith.truncf %65 : vector<8x8xf32> to vector<8x8xbf16>
    %cst_26 = arith.constant dense<0.000000e+00> : vector<8x8xf32>
    %67 = tpu.matmul %66, %53, %cst_26 {dimension_numbers = #tpu.dot_dimension_numbers<[1], [0], [0], [1], [0, 0, 1, 1], [], []>} : vector<8x8xbf16>, vector<8x8xbf16>, vector<8x8xf32> -> vector<8x8xf32>
    %c0_27 = arith.constant 0 : index
    %c8 = arith.constant 8 : index
    %68 = vector.load %arg14[%c0_27, %c8] : memref<16x32xf32, #tpu.memory_space<vmem>>, vector<8x8xf32>
    tpu.vector_store %arg14[%c0_27, %c8], %67 {strides = array<i32>} : memref<16x32xf32, #tpu.memory_space<vmem>>, vector<8x8xf32>,
    %69 = vector.extract_strided_slice %17 {offsets = [0, 16], sizes = [8, 8], strides = [1, 1]} : vector<16x32xbf16> to vector<8x8xbf16>
    %70 = vector.extract_strided_slice %18 {offsets = [0, 16], sizes = [8, 8], strides = [1, 1]} : vector<16x32xbf16> to vector<8x8xbf16>
    %71 = vector.extract_strided_slice %19 {offsets = [0, 16], sizes = [8, 8], strides = [1, 1]} : vector<16x32xbf16> to vector<8x8xbf16>
    %cst_28 = arith.constant dense<0.000000e+00> : vector<8x8xf32>
    %72 = tpu.matmul %69, %70, %cst_28 {dimension_numbers = #tpu.dot_dimension_numbers<[1], [1], [0], [0], [0, 0, 1, 0], [], []>} : vector<8x8xbf16>, vector<8x8xbf16>, vector<8x8xf32> -> vector<8x8xf32>
    %73 = arith.addf %72, %32 : vector<8x8xf32>
    %cst_29 = arith.constant dense<0xFF800000> : vector<8xf32>
    %74 = vector.multi_reduction <maximumf>, %73, %cst_29 [1] : vector<8x8xf32> to vector<8xf32>
    %75 = vector.shape_cast %74 : vector<8xf32> to vector<8x1xf32>
    %76 = vector.broadcast %75 : vector<8x1xf32> to vector<8x8xf32>
    %77 = arith.subf %73, %76 : vector<8x8xf32>
    %78 = math.exp %77 : vector<8x8xf32>
    %cst_30 = arith.constant dense<0.000000e+00> : vector<8xf32>
    %79 = vector.multi_reduction <add>, %78, %cst_30 [1] : vector<8x8xf32> to vector<8xf32>
    %80 = vector.shape_cast %79 : vector<8xf32> to vector<8x1xf32>
    %81 = tpu.reciprocal %80 {approx = true} : vector<8x1xf32> -> vector<8x1xf32>
    %82 = vector.broadcast %81 : vector<8x1xf32> to vector<8x8xf32>
    %83 = arith.mulf %78, %82 : vector<8x8xf32>
    %84 = arith.truncf %83 : vector<8x8xf32> to vector<8x8xbf16>
    %cst_31 = arith.constant dense<0.000000e+00> : vector<8x8xf32>
    %85 = tpu.matmul %84, %71, %cst_31 {dimension_numbers = #tpu.dot_dimension_numbers<[1], [0], [0], [1], [0, 0, 1, 1], [], []>} : vector<8x8xbf16>, vector<8x8xbf16>, vector<8x8xf32> -> vector<8x8xf32>
    %c0_32 = arith.constant 0 : index
    %c16 = arith.constant 16 : index
    %86 = vector.load %arg14[%c0_32, %c16] : memref<16x32xf32, #tpu.memory_space<vmem>>, vector<8x8xf32>
    tpu.vector_store %arg14[%c0_32, %c16], %85 {strides = array<i32>} : memref<16x32xf32, #tpu.memory_space<vmem>>, vector<8x8xf32>,
    %87 = vector.extract_strided_slice %17 {offsets = [0, 24], sizes = [8, 8], strides = [1, 1]} : vector<16x32xbf16> to vector<8x8xbf16>
    %88 = vector.extract_strided_slice %18 {offsets = [0, 24], sizes = [8, 8], strides = [1, 1]} : vector<16x32xbf16> to vector<8x8xbf16>
    %89 = vector.extract_strided_slice %19 {offsets = [0, 24], sizes = [8, 8], strides = [1, 1]} : vector<16x32xbf16> to vector<8x8xbf16>
    %cst_33 = arith.constant dense<0.000000e+00> : vector<8x8xf32>
    %90 = tpu.matmul %87, %88, %cst_33 {dimension_numbers = #tpu.dot_dimension_numbers<[1], [1], [0], [0], [0, 0, 1, 0], [], []>} : vector<8x8xbf16>, vector<8x8xbf16>, vector<8x8xf32> -> vector<8x8xf32>
    %91 = arith.addf %90, %32 : vector<8x8xf32>
    %cst_34 = arith.constant dense<0xFF800000> : vector<8xf32>
    %92 = vector.multi_reduction <maximumf>, %91, %cst_34 [1] : vector<8x8xf32> to vector<8xf32>
    %93 = vector.shape_cast %92 : vector<8xf32> to vector<8x1xf32>
    %94 = vector.broadcast %93 : vector<8x1xf32> to vector<8x8xf32>
    %95 = arith.subf %91, %94 : vector<8x8xf32>
    %96 = math.exp %95 : vector<8x8xf32>
    %cst_35 = arith.constant dense<0.000000e+00> : vector<8xf32>
    %97 = vector.multi_reduction <add>, %96, %cst_35 [1] : vector<8x8xf32> to vector<8xf32>
    %98 = vector.shape_cast %97 : vector<8xf32> to vector<8x1xf32>
    %99 = tpu.reciprocal %98 {approx = true} : vector<8x1xf32> -> vector<8x1xf32>
    %100 = vector.broadcast %99 : vector<8x1xf32> to vector<8x8xf32>
    %101 = arith.mulf %96, %100 : vector<8x8xf32>
    %102 = arith.truncf %101 : vector<8x8xf32> to vector<8x8xbf16>
    %cst_36 = arith.constant dense<0.000000e+00> : vector<8x8xf32>
    %103 = tpu.matmul %102, %89, %cst_36 {dimension_numbers = #tpu.dot_dimension_numbers<[1], [0], [0], [1], [0, 0, 1, 1], [], []>} : vector<8x8xbf16>, vector<8x8xbf16>, vector<8x8xf32> -> vector<8x8xf32>
    %c0_37 = arith.constant 0 : index
    %c24 = arith.constant 24 : index
    %104 = vector.load %arg14[%c0_37, %c24] : memref<16x32xf32, #tpu.memory_space<vmem>>, vector<8x8xf32>
    tpu.vector_store %arg14[%c0_37, %c24], %103 {strides = array<i32>} : memref<16x32xf32, #tpu.memory_space<vmem>>, vector<8x8xf32>,
    %c2_i32_38 = arith.constant 2 : i32
    %105 = arith.muli %arg0, %c2_i32_38 : i32
    %c1_i32 = arith.constant 1 : i32
    %106 = arith.addi %105, %c1_i32 : i32
    %107 = arith.index_cast %106 : i32 to index
    %108 = memref.load %arg1[%107] : memref<2xi32, #tpu.memory_space<smem>>
    %109 = vector.broadcast %108 : i32 to vector<8x8xi32>
    %110 = arith.cmpi slt, %20, %109 : vector<8x8xi32>
    %111 = arith.cmpi sle, %20, %21 : vector<8x8xi32>
    %112 = arith.andi %110, %111 : vector<8x8xi1>
    %cst_39 = arith.constant 0.000000e+00 : f32
    %cst_40 = arith.constant -1.000000e+30 : f32
    %113 = vector.broadcast %cst_39 : f32 to vector<8x8xf32>
    %114 = vector.broadcast %cst_40 : f32 to vector<8x8xf32>
    %115 = arith.select %112, %113, %114 : vector<8x8xi1>, vector<8x8xf32>
    %116 = vector.extract_strided_slice %17 {offsets = [8, 0], sizes = [8, 8], strides = [1, 1]} : vector<16x32xbf16> to vector<8x8xbf16>
    %117 = vector.extract_strided_slice %18 {offsets = [8, 0], sizes = [8, 8], strides = [1, 1]} : vector<16x32xbf16> to vector<8x8xbf16>
    %118 = vector.extract_strided_slice %19 {offsets = [8, 0], sizes = [8, 8], strides = [1, 1]} : vector<16x32xbf16> to vector<8x8xbf16>
    %cst_41 = arith.constant dense<0.000000e+00> : vector<8x8xf32>
    %119 = tpu.matmul %116, %117, %cst_41 {dimension_numbers = #tpu.dot_dimension_numbers<[1], [1], [0], [0], [0, 0, 1, 0], [], []>} : vector<8x8xbf16>, vector<8x8xbf16>, vector<8x8xf32> -> vector<8x8xf32>
    %120 = arith.addf %119, %115 : vector<8x8xf32>
    %cst_42 = arith.constant dense<0xFF800000> : vector<8xf32>
    %121 = vector.multi_reduction <maximumf>, %120, %cst_42 [1] : vector<8x8xf32> to vector<8xf32>
    %122 = vector.shape_cast %121 : vector<8xf32> to vector<8x1xf32>
    %123 = vector.broadcast %122 : vector<8x1xf32> to vector<8x8xf32>
    %124 = arith.subf %120, %123 : vector<8x8xf32>
    %125 = math.exp %124 : vector<8x8xf32>
    %cst_43 = arith.constant dense<0.000000e+00> : vector<8xf32>
    %126 = vector.multi_reduction <add>, %125, %cst_43 [1] : vector<8x8xf32> to vector<8xf32>
    %127 = vector.shape_cast %126 : vector<8xf32> to vector<8x1xf32>
    %128 = tpu.reciprocal %127 {approx = true} : vector<8x1xf32> -> vector<8x1xf32>
    %129 = vector.broadcast %128 : vector<8x1xf32> to vector<8x8xf32>
    %130 = arith.mulf %125, %129 : vector<8x8xf32>
    %131 = arith.truncf %130 : vector<8x8xf32> to vector<8x8xbf16>
    %cst_44 = arith.constant dense<0.000000e+00> : vector<8x8xf32>
    %132 = tpu.matmul %131, %118, %cst_44 {dimension_numbers = #tpu.dot_dimension_numbers<[1], [0], [0], [1], [0, 0, 1, 1], [], []>} : vector<8x8xbf16>, vector<8x8xbf16>, vector<8x8xf32> -> vector<8x8xf32>
    %c8_45 = arith.constant 8 : index
    %c0_46 = arith.constant 0 : index
    %133 = vector.load %arg14[%c8_45, %c0_46] : memref<16x32xf32, #tpu.memory_space<vmem>>, vector<8x8xf32>
    tpu.vector_store %arg14[%c8_45, %c0_46], %132 {strides = array<i32>} : memref<16x32xf32, #tpu.memory_space<vmem>>, vector<8x8xf32>,
    %134 = vector.extract_strided_slice %17 {offsets = [8, 8], sizes = [8, 8], strides = [1, 1]} : vector<16x32xbf16> to vector<8x8xbf16>
    %135 = vector.extract_strided_slice %18 {offsets = [8, 8], sizes = [8, 8], strides = [1, 1]} : vector<16x32xbf16> to vector<8x8xbf16>
    %136 = vector.extract_strided_slice %19 {offsets = [8, 8], sizes = [8, 8], strides = [1, 1]} : vector<16x32xbf16> to vector<8x8xbf16>
    %cst_47 = arith.constant dense<0.000000e+00> : vector<8x8xf32>
    %137 = tpu.matmul %134, %135, %cst_47 {dimension_numbers = #tpu.dot_dimension_numbers<[1], [1], [0], [0], [0, 0, 1, 0], [], []>} : vector<8x8xbf16>, vector<8x8xbf16>, vector<8x8xf32> -> vector<8x8xf32>
    %138 = arith.addf %137, %115 : vector<8x8xf32>
    %cst_48 = arith.constant dense<0xFF800000> : vector<8xf32>
    %139 = vector.multi_reduction <maximumf>, %138, %cst_48 [1] : vector<8x8xf32> to vector<8xf32>
    %140 = vector.shape_cast %139 : vector<8xf32> to vector<8x1xf32>
    %141 = vector.broadcast %140 : vector<8x1xf32> to vector<8x8xf32>
    %142 = arith.subf %138, %141 : vector<8x8xf32>
    %143 = math.exp %142 : vector<8x8xf32>
    %cst_49 = arith.constant dense<0.000000e+00> : vector<8xf32>
    %144 = vector.multi_reduction <add>, %143, %cst_49 [1] : vector<8x8xf32> to vector<8xf32>
    %145 = vector.shape_cast %144 : vector<8xf32> to vector<8x1xf32>
    %146 = tpu.reciprocal %145 {approx = true} : vector<8x1xf32> -> vector<8x1xf32>
    %147 = vector.broadcast %146 : vector<8x1xf32> to vector<8x8xf32>
    %148 = arith.mulf %143, %147 : vector<8x8xf32>
    %149 = arith.truncf %148 : vector<8x8xf32> to vector<8x8xbf16>
    %cst_50 = arith.constant dense<0.000000e+00> : vector<8x8xf32>
    %150 = tpu.matmul %149, %136, %cst_50 {dimension_numbers = #tpu.dot_dimension_numbers<[1], [0], [0], [1], [0, 0, 1, 1], [], []>} : vector<8x8xbf16>, vector<8x8xbf16>, vector<8x8xf32> -> vector<8x8xf32>
    %c8_51 = arith.constant 8 : index
    %c8_52 = arith.constant 8 : index
    %151 = vector.load %arg14[%c8_51, %c8_52] : memref<16x32xf32, #tpu.memory_space<vmem>>, vector<8x8xf32>
    tpu.vector_store %arg14[%c8_51, %c8_52], %150 {strides = array<i32>} : memref<16x32xf32, #tpu.memory_space<vmem>>, vector<8x8xf32>,
    %152 = vector.extract_strided_slice %17 {offsets = [8, 16], sizes = [8, 8], strides = [1, 1]} : vector<16x32xbf16> to vector<8x8xbf16>
    %153 = vector.extract_strided_slice %18 {offsets = [8, 16], sizes = [8, 8], strides = [1, 1]} : vector<16x32xbf16> to vector<8x8xbf16>
    %154 = vector.extract_strided_slice %19 {offsets = [8, 16], sizes = [8, 8], strides = [1, 1]} : vector<16x32xbf16> to vector<8x8xbf16>
    %cst_53 = arith.constant dense<0.000000e+00> : vector<8x8xf32>
    %155 = tpu.matmul %152, %153, %cst_53 {dimension_numbers = #tpu.dot_dimension_numbers<[1], [1], [0], [0], [0, 0, 1, 0], [], []>} : vector<8x8xbf16>, vector<8x8xbf16>, vector<8x8xf32> -> vector<8x8xf32>
    %156 = arith.addf %155, %115 : vector<8x8xf32>
    %cst_54 = arith.constant dense<0xFF800000> : vector<8xf32>
    %157 = vector.multi_reduction <maximumf>, %156, %cst_54 [1] : vector<8x8xf32> to vector<8xf32>
    %158 = vector.shape_cast %157 : vector<8xf32> to vector<8x1xf32>
    %159 = vector.broadcast %158 : vector<8x1xf32> to vector<8x8xf32>
    %160 = arith.subf %156, %159 : vector<8x8xf32>
    %161 = math.exp %160 : vector<8x8xf32>
    %cst_55 = arith.constant dense<0.000000e+00> : vector<8xf32>
    %162 = vector.multi_reduction <add>, %161, %cst_55 [1] : vector<8x8xf32> to vector<8xf32>
    %163 = vector.shape_cast %162 : vector<8xf32> to vector<8x1xf32>
    %164 = tpu.reciprocal %163 {approx = true} : vector<8x1xf32> -> vector<8x1xf32>
    %165 = vector.broadcast %164 : vector<8x1xf32> to vector<8x8xf32>
    %166 = arith.mulf %161, %165 : vector<8x8xf32>
    %167 = arith.truncf %166 : vector<8x8xf32> to vector<8x8xbf16>
    %cst_56 = arith.constant dense<0.000000e+00> : vector<8x8xf32>
    %168 = tpu.matmul %167, %154, %cst_56 {dimension_numbers = #tpu.dot_dimension_numbers<[1], [0], [0], [1], [0, 0, 1, 1], [], []>} : vector<8x8xbf16>, vector<8x8xbf16>, vector<8x8xf32> -> vector<8x8xf32>
    %c8_57 = arith.constant 8 : index
    %c16_58 = arith.constant 16 : index
    %169 = vector.load %arg14[%c8_57, %c16_58] : memref<16x32xf32, #tpu.memory_space<vmem>>, vector<8x8xf32>
    tpu.vector_store %arg14[%c8_57, %c16_58], %168 {strides = array<i32>} : memref<16x32xf32, #tpu.memory_space<vmem>>, vector<8x8xf32>,
    %170 = vector.extract_strided_slice %17 {offsets = [8, 24], sizes = [8, 8], strides = [1, 1]} : vector<16x32xbf16> to vector<8x8xbf16>
    %171 = vector.extract_strided_slice %18 {offsets = [8, 24], sizes = [8, 8], strides = [1, 1]} : vector<16x32xbf16> to vector<8x8xbf16>
    %172 = vector.extract_strided_slice %19 {offsets = [8, 24], sizes = [8, 8], strides = [1, 1]} : vector<16x32xbf16> to vector<8x8xbf16>
    %cst_59 = arith.constant dense<0.000000e+00> : vector<8x8xf32>
    %173 = tpu.matmul %170, %171, %cst_59 {dimension_numbers = #tpu.dot_dimension_numbers<[1], [1], [0], [0], [0, 0, 1, 0], [], []>} : vector<8x8xbf16>, vector<8x8xbf16>, vector<8x8xf32> -> vector<8x8xf32>
    %174 = arith.addf %173, %115 : vector<8x8xf32>
    %cst_60 = arith.constant dense<0xFF800000> : vector<8xf32>
    %175 = vector.multi_reduction <maximumf>, %174, %cst_60 [1] : vector<8x8xf32> to vector<8xf32>
    %176 = vector.shape_cast %175 : vector<8xf32> to vector<8x1xf32>
    %177 = vector.broadcast %176 : vector<8x1xf32> to vector<8x8xf32>
    %178 = arith.subf %174, %177 : vector<8x8xf32>
    %179 = math.exp %178 : vector<8x8xf32>
    %cst_61 = arith.constant dense<0.000000e+00> : vector<8xf32>
    %180 = vector.multi_reduction <add>, %179, %cst_61 [1] : vector<8x8xf32> to vector<8xf32>
    %181 = vector.shape_cast %180 : vector<8xf32> to vector<8x1xf32>
    %182 = tpu.reciprocal %181 {approx = true} : vector<8x1xf32> -> vector<8x1xf32>
    %183 = vector.broadcast %182 : vector<8x1xf32> to vector<8x8xf32>
    %184 = arith.mulf %179, %183 : vector<8x8xf32>
    %185 = arith.truncf %184 : vector<8x8xf32> to vector<8x8xbf16>
    %cst_62 = arith.constant dense<0.000000e+00> : vector<8x8xf32>
    %186 = tpu.matmul %185, %172, %cst_62 {dimension_numbers = #tpu.dot_dimension_numbers<[1], [0], [0], [1], [0, 0, 1, 1], [], []>} : vector<8x8xbf16>, vector<8x8xbf16>, vector<8x8xf32> -> vector<8x8xf32>
    %c8_63 = arith.constant 8 : index
    %c24_64 = arith.constant 24 : index
    %187 = vector.load %arg14[%c8_63, %c24_64] : memref<16x32xf32, #tpu.memory_space<vmem>>, vector<8x8xf32>
    tpu.vector_store %arg14[%c8_63, %c24_64], %186 {strides = array<i32>} : memref<16x32xf32, #tpu.memory_space<vmem>>, vector<8x8xf32>,
    %c0_65 = arith.constant 0 : index
    %c0_66 = arith.constant 0 : index
    %188 = vector.load %arg14[%c0_65, %c0_66] : memref<16x32xf32, #tpu.memory_space<vmem>>, vector<16x32xf32>
    %189 = arith.truncf %188 : vector<16x32xf32> to vector<16x32xbf16>
    %c0_67 = arith.constant 0 : index
    %c0_68 = arith.constant 0 : index
    %190 = vector.load %arg9[%c0_67, %c0_68] : memref<32x32xbf16, #tpu.memory_space<vmem>>, vector<32x32xbf16>
    %cst_69 = arith.constant dense<0.000000e+00> : vector<16x32xf32>
    %191 = tpu.matmul %189, %190, %cst_69 {dimension_numbers = #tpu.dot_dimension_numbers<[1], [0], [0], [1], [0, 0, 1, 1], [], []>} : vector<16x32xbf16>, vector<32x32xbf16>, vector<16x32xf32> -> vector<16x32xf32>
    %c0_70 = arith.constant 0 : index
    %c0_71 = arith.constant 0 : index
    %192 = vector.load %arg10[%c0_70, %c0_71] : memref<1x32xf32, #tpu.memory_space<vmem>>, vector<1x32xf32>
    %193 = vector.broadcast %192 : vector<1x32xf32> to vector<16x32xf32>
    %194 = arith.addf %191, %193 : vector<16x32xf32>
    %195 = arith.addf %1, %194 : vector<16x32xf32>
    %cst_72 = arith.constant dense<0.000000e+00> : vector<16xf32>
    %196 = vector.multi_reduction <add>, %195, %cst_72 [1] : vector<16x32xf32> to vector<16xf32>
    %197 = vector.shape_cast %196 : vector<16xf32> to vector<16x1xf32>
    %cst_73 = arith.constant 3.200000e+01 : f32
    %198 = vector.broadcast %cst_73 : f32 to vector<16x1xf32>
    %199 = arith.divf %197, %198 : vector<16x1xf32>
    %200 = vector.broadcast %199 : vector<16x1xf32> to vector<16x32xf32>
    %201 = arith.subf %195, %200 : vector<16x32xf32>
    %202 = arith.mulf %201, %201 : vector<16x32xf32>
    %cst_74 = arith.constant dense<0.000000e+00> : vector<16xf32>
    %203 = vector.multi_reduction <add>, %202, %cst_74 [1] : vector<16x32xf32> to vector<16xf32>
    %204 = vector.shape_cast %203 : vector<16xf32> to vector<16x1xf32>
    %cst_75 = arith.constant 3.200000e+01 : f32
    %205 = vector.broadcast %cst_75 : f32 to vector<16x1xf32>
    %206 = arith.divf %204, %205 : vector<16x1xf32>
    %207 = vector.broadcast %199 : vector<16x1xf32> to vector<16x32xf32>
    %208 = arith.subf %195, %207 : vector<16x32xf32>
    %cst_76 = arith.constant 9.99999974E-6 : f32
    %209 = vector.broadcast %cst_76 : f32 to vector<16x1xf32>
    %210 = arith.addf %206, %209 : vector<16x1xf32>
    %211 = math.rsqrt %210 : vector<16x1xf32>
    %212 = vector.broadcast %211 : vector<16x1xf32> to vector<16x32xf32>
    %213 = arith.mulf %208, %212 : vector<16x32xf32>
    %c0_77 = arith.constant 0 : index
    %c0_78 = arith.constant 0 : index
    %214 = vector.load %arg11[%c0_77, %c0_78] : memref<1x32xf32, #tpu.memory_space<vmem>>, vector<1x32xf32>
    %215 = vector.broadcast %214 : vector<1x32xf32> to vector<16x32xf32>
    %216 = arith.mulf %213, %215 : vector<16x32xf32>
    %c0_79 = arith.constant 0 : index
    %c0_80 = arith.constant 0 : index
    %217 = vector.load %arg12[%c0_79, %c0_80] : memref<1x32xf32, #tpu.memory_space<vmem>>, vector<1x32xf32>
    %218 = vector.broadcast %217 : vector<1x32xf32> to vector<16x32xf32>
    %219 = arith.addf %216, %218 : vector<16x32xf32>
    %220 = arith.truncf %219 : vector<16x32xf32> to vector<16x32xbf16>
    %c0_81 = arith.constant 0 : index
    %c0_82 = arith.constant 0 : index
    %221 = vector.load %arg13[%c0_81, %c0_82] : memref<16x32xbf16, #tpu.memory_space<vmem>>, vector<16x32xbf16>
    tpu.vector_store %arg13[%c0_81, %c0_82], %220 {strides = array<i32>} : memref<16x32xbf16, #tpu.memory_space<vmem>>, vector<16x32xbf16>,
    return
  }
  func.func @transform_0(%arg0: i32, %arg1: memref<2xi32, #tpu.memory_space<smem>>) -> (i32, i32) {
    %c0_i32 = arith.constant 0 : i32
    %c0_i32_0 = arith.constant 0 : i32
    return %arg0, %c0_i32 : i32, i32
  }
  func.func @transform_1(%arg0: i32, %arg1: memref<2xi32, #tpu.memory_space<smem>>) -> (i32, i32) {
    %c0_i32 = arith.constant 0 : i32
    %c0_i32_0 = arith.constant 0 : i32
    %c0_i32_1 = arith.constant 0 : i32
    return %c0_i32, %c0_i32_0 : i32, i32
  }
  func.func @transform_2(%arg0: i32, %arg1: memref<2xi32, #tpu.memory_space<smem>>) -> (i32, i32) {
    %c0_i32 = arith.constant 0 : i32
    %c0_i32_0 = arith.constant 0 : i32
    %c0_i32_1 = arith.constant 0 : i32
    return %c0_i32, %c0_i32_0 : i32, i32
  }
  func.func @transform_3(%arg0: i32, %arg1: memref<2xi32, #tpu.memory_space<smem>>) -> (i32, i32) {
    %c0_i32 = arith.constant 0 : i32
    %c0_i32_0 = arith.constant 0 : i32
    %c0_i32_1 = arith.constant 0 : i32
    return %c0_i32, %c0_i32_0 : i32, i32
  }
  func.func @transform_4(%arg0: i32, %arg1: memref<2xi32, #tpu.memory_space<smem>>) -> (i32, i32) {
    %c0_i32 = arith.constant 0 : i32
    %c0_i32_0 = arith.constant 0 : i32
    %c0_i32_1 = arith.constant 0 : i32
    return %c0_i32, %c0_i32_0 : i32, i32
  }
  func.func @transform_5(%arg0: i32, %arg1: memref<2xi32, #tpu.memory_space<smem>>) -> (i32, i32) {
    %c0_i32 = arith.constant 0 : i32
    %c0_i32_0 = arith.constant 0 : i32
    %c0_i32_1 = arith.constant 0 : i32
    return %c0_i32, %c0_i32_0 : i32, i32
  }
  func.func @transform_6(%arg0: i32, %arg1: memref<2xi32, #tpu.memory_space<smem>>) -> (i32, i32) {
    %c0_i32 = arith.constant 0 : i32
    %c0_i32_0 = arith.constant 0 : i32
    %c0_i32_1 = arith.constant 0 : i32
    return %c0_i32, %c0_i32_0 : i32, i32
  }
  func.func @transform_7(%arg0: i32, %arg1: memref<2xi32, #tpu.memory_space<smem>>) -> (i32, i32) {
    %c0_i32 = arith.constant 0 : i32
    %c0_i32_0 = arith.constant 0 : i32
    %c0_i32_1 = arith.constant 0 : i32
    return %c0_i32, %c0_i32_0 : i32, i32
  }
  func.func @transform_8(%arg0: i32, %arg1: memref<2xi32, #tpu.memory_space<smem>>) -> (i32, i32) {
    %c0_i32 = arith.constant 0 : i32
    %c0_i32_0 = arith.constant 0 : i32
    %c0_i32_1 = arith.constant 0 : i32
    return %c0_i32, %c0_i32_0 : i32, i32
  }
  func.func @transform_9(%arg0: i32, %arg1: memref<2xi32, #tpu.memory_space<smem>>) -> (i32, i32) {
    %c0_i32 = arith.constant 0 : i32
    %c0_i32_0 = arith.constant 0 : i32
    %c0_i32_1 = arith.constant 0 : i32
    return %c0_i32, %c0_i32_0 : i32, i32
  }
  func.func @transform_10(%arg0: i32, %arg1: memref<2xi32, #tpu.memory_space<smem>>) -> (i32, i32) {
    %c0_i32 = arith.constant 0 : i32
    %c0_i32_0 = arith.constant 0 : i32
    %c0_i32_1 = arith.constant 0 : i32
    return %c0_i32, %c0_i32_0 : i32, i32
  }
  func.func @transform_11(%arg0: i32, %arg1: memref<2xi32, #tpu.memory_space<smem>>) -> (i32, i32) {
    %c0_i32 = arith.constant 0 : i32
    %c0_i32_0 = arith.constant 0 : i32
    return %arg0, %c0_i32 : i32, i32
  }
}

module attributes {stable_mosaic.version = 11 : i64} {
  func.func @_cross_attn_ln_kernel(%arg0: i32, %arg1: memref<2xi32, #tpu.memory_space<smem>>, %arg2: memref<16x32xbf16, #tpu.memory_space<vmem>>, %arg3: memref<16x32xbf16, #tpu.memory_space<vmem>>, %arg4: memref<32x32xbf16, #tpu.memory_space<vmem>>, %arg5: memref<1x32xf32, #tpu.memory_space<vmem>>, %arg6: memref<32x32xbf16, #tpu.memory_space<vmem>>, %arg7: memref<1x32xf32, #tpu.memory_space<vmem>>, %arg8: memref<32x32xbf16, #tpu.memory_space<vmem>>, %arg9: memref<1x32xf32, #tpu.memory_space<vmem>>, %arg10: memref<32x32xbf16, #tpu.memory_space<vmem>>, %arg11: memref<1x32xf32, #tpu.memory_space<vmem>>, %arg12: memref<1x32xf32, #tpu.memory_space<vmem>>, %arg13: memref<1x32xf32, #tpu.memory_space<vmem>>, %arg14: memref<16x32xbf16, #tpu.memory_space<vmem>>, %arg15: memref<16x32xf32, #tpu.memory_space<vmem>>) attributes {dimension_semantics = [#tpu.dimension_semantics<parallel>], iteration_bounds = array<i64: 1>, scalar_prefetch = 1 : i64, scratch_operands = 1 : i64, tpu.core_type = #tpu.core_type<tc>, window_params = [{transform_indices = @transform_0, window_bounds = array<i64: 16, 32>}, {transform_indices = @transform_1, window_bounds = array<i64: 16, 32>}, {pipeline_mode = #tpu.pipeline_mode<synchronous>, transform_indices = @transform_2, window_bounds = array<i64: 32, 32>}, {pipeline_mode = #tpu.pipeline_mode<synchronous>, transform_indices = @transform_3, window_bounds = array<i64: 1, 32>}, {pipeline_mode = #tpu.pipeline_mode<synchronous>, transform_indices = @transform_4, window_bounds = array<i64: 32, 32>}, {pipeline_mode = #tpu.pipeline_mode<synchronous>, transform_indices = @transform_5, window_bounds = array<i64: 1, 32>}, {pipeline_mode = #tpu.pipeline_mode<synchronous>, transform_indices = @transform_6, window_bounds = array<i64: 32, 32>}, {pipeline_mode = #tpu.pipeline_mode<synchronous>, transform_indices = @transform_7, window_bounds = array<i64: 1, 32>}, {pipeline_mode = #tpu.pipeline_mode<synchronous>, transform_indices = @transform_8, window_bounds = array<i64: 32, 32>}, {pipeline_mode = #tpu.pipeline_mode<synchronous>, transform_indices = @transform_9, window_bounds = array<i64: 1, 32>}, {pipeline_mode = #tpu.pipeline_mode<synchronous>, transform_indices = @transform_10, window_bounds = array<i64: 1, 32>}, {pipeline_mode = #tpu.pipeline_mode<synchronous>, transform_indices = @transform_11, window_bounds = array<i64: 1, 32>}, {transform_indices = @transform_12, window_bounds = array<i64: 16, 32>}]} {
    %c0 = arith.constant 0 : index
    %c0_0 = arith.constant 0 : index
    %0 = vector.load %arg2[%c0, %c0_0] : memref<16x32xbf16, #tpu.memory_space<vmem>>, vector<16x32xbf16>
    %c0_1 = arith.constant 0 : index
    %c0_2 = arith.constant 0 : index
    %1 = vector.load %arg3[%c0_1, %c0_2] : memref<16x32xbf16, #tpu.memory_space<vmem>>, vector<16x32xbf16>
    %2 = arith.extf %0 : vector<16x32xbf16> to vector<16x32xf32>
    %c0_3 = arith.constant 0 : index
    %c0_4 = arith.constant 0 : index
    %3 = vector.load %arg4[%c0_3, %c0_4] : memref<32x32xbf16, #tpu.memory_space<vmem>>, vector<32x32xbf16>
    %cst = arith.constant dense<0.000000e+00> : vector<16x32xf32>
    %4 = tpu.matmul %0, %3, %cst {dimension_numbers = #tpu.dot_dimension_numbers<[1], [0], [0], [1], [0, 0, 1, 1], [], []>} : vector<16x32xbf16>, vector<32x32xbf16>, vector<16x32xf32> -> vector<16x32xf32>
    %c0_5 = arith.constant 0 : index
    %c0_6 = arith.constant 0 : index
    %5 = vector.load %arg5[%c0_5, %c0_6] : memref<1x32xf32, #tpu.memory_space<vmem>>, vector<1x32xf32>
    %6 = vector.broadcast %5 : vector<1x32xf32> to vector<16x32xf32>
    %7 = arith.addf %4, %6 : vector<16x32xf32>
    %c0_7 = arith.constant 0 : index
    %c0_8 = arith.constant 0 : index
    %8 = vector.load %arg6[%c0_7, %c0_8] : memref<32x32xbf16, #tpu.memory_space<vmem>>, vector<32x32xbf16>
    %cst_9 = arith.constant dense<0.000000e+00> : vector<16x32xf32>
    %9 = tpu.matmul %1, %8, %cst_9 {dimension_numbers = #tpu.dot_dimension_numbers<[1], [0], [0], [1], [0, 0, 1, 1], [], []>} : vector<16x32xbf16>, vector<32x32xbf16>, vector<16x32xf32> -> vector<16x32xf32>
    %c0_10 = arith.constant 0 : index
    %c0_11 = arith.constant 0 : index
    %10 = vector.load %arg7[%c0_10, %c0_11] : memref<1x32xf32, #tpu.memory_space<vmem>>, vector<1x32xf32>
    %11 = vector.broadcast %10 : vector<1x32xf32> to vector<16x32xf32>
    %12 = arith.addf %9, %11 : vector<16x32xf32>
    %c0_12 = arith.constant 0 : index
    %c0_13 = arith.constant 0 : index
    %13 = vector.load %arg8[%c0_12, %c0_13] : memref<32x32xbf16, #tpu.memory_space<vmem>>, vector<32x32xbf16>
    %cst_14 = arith.constant dense<0.000000e+00> : vector<16x32xf32>
    %14 = tpu.matmul %1, %13, %cst_14 {dimension_numbers = #tpu.dot_dimension_numbers<[1], [0], [0], [1], [0, 0, 1, 1], [], []>} : vector<16x32xbf16>, vector<32x32xbf16>, vector<16x32xf32> -> vector<16x32xf32>
    %c0_15 = arith.constant 0 : index
    %c0_16 = arith.constant 0 : index
    %15 = vector.load %arg9[%c0_15, %c0_16] : memref<1x32xf32, #tpu.memory_space<vmem>>, vector<1x32xf32>
    %16 = vector.broadcast %15 : vector<1x32xf32> to vector<16x32xf32>
    %17 = arith.addf %14, %16 : vector<16x32xf32>
    %18 = arith.truncf %7 : vector<16x32xf32> to vector<16x32xbf16>
    %19 = arith.truncf %12 : vector<16x32xf32> to vector<16x32xbf16>
    %20 = arith.truncf %17 : vector<16x32xf32> to vector<16x32xbf16>
    %21 = tpu.iota {dimensions = array<i32: 1>} : vector<8x8xi32>
    %c2_i32 = arith.constant 2 : i32
    %22 = arith.muli %arg0, %c2_i32 : i32
    %c0_i32 = arith.constant 0 : i32
    %23 = arith.addi %22, %c0_i32 : i32
    %24 = arith.index_cast %23 : i32 to index
    %25 = memref.load %arg1[%24] : memref<2xi32, #tpu.memory_space<smem>>
    %26 = vector.broadcast %25 : i32 to vector<8x8xi32>
    %27 = arith.cmpi slt, %21, %26 : vector<8x8xi32>
    %cst_17 = arith.constant 0.000000e+00 : f32
    %cst_18 = arith.constant -1.000000e+30 : f32
    %28 = vector.broadcast %cst_17 : f32 to vector<8x8xf32>
    %29 = vector.broadcast %cst_18 : f32 to vector<8x8xf32>
    %30 = arith.select %27, %28, %29 : vector<8x8xi1>, vector<8x8xf32>
    %31 = vector.extract_strided_slice %18 {offsets = [0, 0], sizes = [8, 8], strides = [1, 1]} : vector<16x32xbf16> to vector<8x8xbf16>
    %32 = vector.extract_strided_slice %19 {offsets = [0, 0], sizes = [8, 8], strides = [1, 1]} : vector<16x32xbf16> to vector<8x8xbf16>
    %33 = vector.extract_strided_slice %20 {offsets = [0, 0], sizes = [8, 8], strides = [1, 1]} : vector<16x32xbf16> to vector<8x8xbf16>
    %cst_19 = arith.constant dense<0.000000e+00> : vector<8x8xf32>
    %34 = tpu.matmul %31, %32, %cst_19 {dimension_numbers = #tpu.dot_dimension_numbers<[1], [1], [0], [0], [0, 0, 1, 0], [], []>} : vector<8x8xbf16>, vector<8x8xbf16>, vector<8x8xf32> -> vector<8x8xf32>
    %35 = arith.addf %34, %30 : vector<8x8xf32>
    %cst_20 = arith.constant dense<0xFF800000> : vector<8xf32>
    %36 = vector.multi_reduction <maximumf>, %35, %cst_20 [1] : vector<8x8xf32> to vector<8xf32>
    %37 = vector.shape_cast %36 : vector<8xf32> to vector<8x1xf32>
    %38 = vector.broadcast %37 : vector<8x1xf32> to vector<8x8xf32>
    %39 = arith.subf %35, %38 : vector<8x8xf32>
    %40 = math.exp %39 : vector<8x8xf32>
    %cst_21 = arith.constant dense<0.000000e+00> : vector<8xf32>
    %41 = vector.multi_reduction <add>, %40, %cst_21 [1] : vector<8x8xf32> to vector<8xf32>
    %42 = vector.shape_cast %41 : vector<8xf32> to vector<8x1xf32>
    %43 = tpu.reciprocal %42 {approx = true} : vector<8x1xf32> -> vector<8x1xf32>
    %44 = vector.broadcast %43 : vector<8x1xf32> to vector<8x8xf32>
    %45 = arith.mulf %40, %44 : vector<8x8xf32>
    %46 = arith.truncf %45 : vector<8x8xf32> to vector<8x8xbf16>
    %cst_22 = arith.constant dense<0.000000e+00> : vector<8x8xf32>
    %47 = tpu.matmul %46, %33, %cst_22 {dimension_numbers = #tpu.dot_dimension_numbers<[1], [0], [0], [1], [0, 0, 1, 1], [], []>} : vector<8x8xbf16>, vector<8x8xbf16>, vector<8x8xf32> -> vector<8x8xf32>
    %c0_23 = arith.constant 0 : index
    %c0_24 = arith.constant 0 : index
    %48 = vector.load %arg15[%c0_23, %c0_24] : memref<16x32xf32, #tpu.memory_space<vmem>>, vector<8x8xf32>
    tpu.vector_store %arg15[%c0_23, %c0_24], %47 {strides = array<i32>} : memref<16x32xf32, #tpu.memory_space<vmem>>, vector<8x8xf32>,
    %49 = vector.extract_strided_slice %18 {offsets = [0, 8], sizes = [8, 8], strides = [1, 1]} : vector<16x32xbf16> to vector<8x8xbf16>
    %50 = vector.extract_strided_slice %19 {offsets = [0, 8], sizes = [8, 8], strides = [1, 1]} : vector<16x32xbf16> to vector<8x8xbf16>
    %51 = vector.extract_strided_slice %20 {offsets = [0, 8], sizes = [8, 8], strides = [1, 1]} : vector<16x32xbf16> to vector<8x8xbf16>
    %cst_25 = arith.constant dense<0.000000e+00> : vector<8x8xf32>
    %52 = tpu.matmul %49, %50, %cst_25 {dimension_numbers = #tpu.dot_dimension_numbers<[1], [1], [0], [0], [0, 0, 1, 0], [], []>} : vector<8x8xbf16>, vector<8x8xbf16>, vector<8x8xf32> -> vector<8x8xf32>
    %53 = arith.addf %52, %30 : vector<8x8xf32>
    %cst_26 = arith.constant dense<0xFF800000> : vector<8xf32>
    %54 = vector.multi_reduction <maximumf>, %53, %cst_26 [1] : vector<8x8xf32> to vector<8xf32>
    %55 = vector.shape_cast %54 : vector<8xf32> to vector<8x1xf32>
    %56 = vector.broadcast %55 : vector<8x1xf32> to vector<8x8xf32>
    %57 = arith.subf %53, %56 : vector<8x8xf32>
    %58 = math.exp %57 : vector<8x8xf32>
    %cst_27 = arith.constant dense<0.000000e+00> : vector<8xf32>
    %59 = vector.multi_reduction <add>, %58, %cst_27 [1] : vector<8x8xf32> to vector<8xf32>
    %60 = vector.shape_cast %59 : vector<8xf32> to vector<8x1xf32>
    %61 = tpu.reciprocal %60 {approx = true} : vector<8x1xf32> -> vector<8x1xf32>
    %62 = vector.broadcast %61 : vector<8x1xf32> to vector<8x8xf32>
    %63 = arith.mulf %58, %62 : vector<8x8xf32>
    %64 = arith.truncf %63 : vector<8x8xf32> to vector<8x8xbf16>
    %cst_28 = arith.constant dense<0.000000e+00> : vector<8x8xf32>
    %65 = tpu.matmul %64, %51, %cst_28 {dimension_numbers = #tpu.dot_dimension_numbers<[1], [0], [0], [1], [0, 0, 1, 1], [], []>} : vector<8x8xbf16>, vector<8x8xbf16>, vector<8x8xf32> -> vector<8x8xf32>
    %c0_29 = arith.constant 0 : index
    %c8 = arith.constant 8 : index
    %66 = vector.load %arg15[%c0_29, %c8] : memref<16x32xf32, #tpu.memory_space<vmem>>, vector<8x8xf32>
    tpu.vector_store %arg15[%c0_29, %c8], %65 {strides = array<i32>} : memref<16x32xf32, #tpu.memory_space<vmem>>, vector<8x8xf32>,
    %67 = vector.extract_strided_slice %18 {offsets = [0, 16], sizes = [8, 8], strides = [1, 1]} : vector<16x32xbf16> to vector<8x8xbf16>
    %68 = vector.extract_strided_slice %19 {offsets = [0, 16], sizes = [8, 8], strides = [1, 1]} : vector<16x32xbf16> to vector<8x8xbf16>
    %69 = vector.extract_strided_slice %20 {offsets = [0, 16], sizes = [8, 8], strides = [1, 1]} : vector<16x32xbf16> to vector<8x8xbf16>
    %cst_30 = arith.constant dense<0.000000e+00> : vector<8x8xf32>
    %70 = tpu.matmul %67, %68, %cst_30 {dimension_numbers = #tpu.dot_dimension_numbers<[1], [1], [0], [0], [0, 0, 1, 0], [], []>} : vector<8x8xbf16>, vector<8x8xbf16>, vector<8x8xf32> -> vector<8x8xf32>
    %71 = arith.addf %70, %30 : vector<8x8xf32>
    %cst_31 = arith.constant dense<0xFF800000> : vector<8xf32>
    %72 = vector.multi_reduction <maximumf>, %71, %cst_31 [1] : vector<8x8xf32> to vector<8xf32>
    %73 = vector.shape_cast %72 : vector<8xf32> to vector<8x1xf32>
    %74 = vector.broadcast %73 : vector<8x1xf32> to vector<8x8xf32>
    %75 = arith.subf %71, %74 : vector<8x8xf32>
    %76 = math.exp %75 : vector<8x8xf32>
    %cst_32 = arith.constant dense<0.000000e+00> : vector<8xf32>
    %77 = vector.multi_reduction <add>, %76, %cst_32 [1] : vector<8x8xf32> to vector<8xf32>
    %78 = vector.shape_cast %77 : vector<8xf32> to vector<8x1xf32>
    %79 = tpu.reciprocal %78 {approx = true} : vector<8x1xf32> -> vector<8x1xf32>
    %80 = vector.broadcast %79 : vector<8x1xf32> to vector<8x8xf32>
    %81 = arith.mulf %76, %80 : vector<8x8xf32>
    %82 = arith.truncf %81 : vector<8x8xf32> to vector<8x8xbf16>
    %cst_33 = arith.constant dense<0.000000e+00> : vector<8x8xf32>
    %83 = tpu.matmul %82, %69, %cst_33 {dimension_numbers = #tpu.dot_dimension_numbers<[1], [0], [0], [1], [0, 0, 1, 1], [], []>} : vector<8x8xbf16>, vector<8x8xbf16>, vector<8x8xf32> -> vector<8x8xf32>
    %c0_34 = arith.constant 0 : index
    %c16 = arith.constant 16 : index
    %84 = vector.load %arg15[%c0_34, %c16] : memref<16x32xf32, #tpu.memory_space<vmem>>, vector<8x8xf32>
    tpu.vector_store %arg15[%c0_34, %c16], %83 {strides = array<i32>} : memref<16x32xf32, #tpu.memory_space<vmem>>, vector<8x8xf32>,
    %85 = vector.extract_strided_slice %18 {offsets = [0, 24], sizes = [8, 8], strides = [1, 1]} : vector<16x32xbf16> to vector<8x8xbf16>
    %86 = vector.extract_strided_slice %19 {offsets = [0, 24], sizes = [8, 8], strides = [1, 1]} : vector<16x32xbf16> to vector<8x8xbf16>
    %87 = vector.extract_strided_slice %20 {offsets = [0, 24], sizes = [8, 8], strides = [1, 1]} : vector<16x32xbf16> to vector<8x8xbf16>
    %cst_35 = arith.constant dense<0.000000e+00> : vector<8x8xf32>
    %88 = tpu.matmul %85, %86, %cst_35 {dimension_numbers = #tpu.dot_dimension_numbers<[1], [1], [0], [0], [0, 0, 1, 0], [], []>} : vector<8x8xbf16>, vector<8x8xbf16>, vector<8x8xf32> -> vector<8x8xf32>
    %89 = arith.addf %88, %30 : vector<8x8xf32>
    %cst_36 = arith.constant dense<0xFF800000> : vector<8xf32>
    %90 = vector.multi_reduction <maximumf>, %89, %cst_36 [1] : vector<8x8xf32> to vector<8xf32>
    %91 = vector.shape_cast %90 : vector<8xf32> to vector<8x1xf32>
    %92 = vector.broadcast %91 : vector<8x1xf32> to vector<8x8xf32>
    %93 = arith.subf %89, %92 : vector<8x8xf32>
    %94 = math.exp %93 : vector<8x8xf32>
    %cst_37 = arith.constant dense<0.000000e+00> : vector<8xf32>
    %95 = vector.multi_reduction <add>, %94, %cst_37 [1] : vector<8x8xf32> to vector<8xf32>
    %96 = vector.shape_cast %95 : vector<8xf32> to vector<8x1xf32>
    %97 = tpu.reciprocal %96 {approx = true} : vector<8x1xf32> -> vector<8x1xf32>
    %98 = vector.broadcast %97 : vector<8x1xf32> to vector<8x8xf32>
    %99 = arith.mulf %94, %98 : vector<8x8xf32>
    %100 = arith.truncf %99 : vector<8x8xf32> to vector<8x8xbf16>
    %cst_38 = arith.constant dense<0.000000e+00> : vector<8x8xf32>
    %101 = tpu.matmul %100, %87, %cst_38 {dimension_numbers = #tpu.dot_dimension_numbers<[1], [0], [0], [1], [0, 0, 1, 1], [], []>} : vector<8x8xbf16>, vector<8x8xbf16>, vector<8x8xf32> -> vector<8x8xf32>
    %c0_39 = arith.constant 0 : index
    %c24 = arith.constant 24 : index
    %102 = vector.load %arg15[%c0_39, %c24] : memref<16x32xf32, #tpu.memory_space<vmem>>, vector<8x8xf32>
    tpu.vector_store %arg15[%c0_39, %c24], %101 {strides = array<i32>} : memref<16x32xf32, #tpu.memory_space<vmem>>, vector<8x8xf32>,
    %c2_i32_40 = arith.constant 2 : i32
    %103 = arith.muli %arg0, %c2_i32_40 : i32
    %c1_i32 = arith.constant 1 : i32
    %104 = arith.addi %103, %c1_i32 : i32
    %105 = arith.index_cast %104 : i32 to index
    %106 = memref.load %arg1[%105] : memref<2xi32, #tpu.memory_space<smem>>
    %107 = vector.broadcast %106 : i32 to vector<8x8xi32>
    %108 = arith.cmpi slt, %21, %107 : vector<8x8xi32>
    %cst_41 = arith.constant 0.000000e+00 : f32
    %cst_42 = arith.constant -1.000000e+30 : f32
    %109 = vector.broadcast %cst_41 : f32 to vector<8x8xf32>
    %110 = vector.broadcast %cst_42 : f32 to vector<8x8xf32>
    %111 = arith.select %108, %109, %110 : vector<8x8xi1>, vector<8x8xf32>
    %112 = vector.extract_strided_slice %18 {offsets = [8, 0], sizes = [8, 8], strides = [1, 1]} : vector<16x32xbf16> to vector<8x8xbf16>
    %113 = vector.extract_strided_slice %19 {offsets = [8, 0], sizes = [8, 8], strides = [1, 1]} : vector<16x32xbf16> to vector<8x8xbf16>
    %114 = vector.extract_strided_slice %20 {offsets = [8, 0], sizes = [8, 8], strides = [1, 1]} : vector<16x32xbf16> to vector<8x8xbf16>
    %cst_43 = arith.constant dense<0.000000e+00> : vector<8x8xf32>
    %115 = tpu.matmul %112, %113, %cst_43 {dimension_numbers = #tpu.dot_dimension_numbers<[1], [1], [0], [0], [0, 0, 1, 0], [], []>} : vector<8x8xbf16>, vector<8x8xbf16>, vector<8x8xf32> -> vector<8x8xf32>
    %116 = arith.addf %115, %111 : vector<8x8xf32>
    %cst_44 = arith.constant dense<0xFF800000> : vector<8xf32>
    %117 = vector.multi_reduction <maximumf>, %116, %cst_44 [1] : vector<8x8xf32> to vector<8xf32>
    %118 = vector.shape_cast %117 : vector<8xf32> to vector<8x1xf32>
    %119 = vector.broadcast %118 : vector<8x1xf32> to vector<8x8xf32>
    %120 = arith.subf %116, %119 : vector<8x8xf32>
    %121 = math.exp %120 : vector<8x8xf32>
    %cst_45 = arith.constant dense<0.000000e+00> : vector<8xf32>
    %122 = vector.multi_reduction <add>, %121, %cst_45 [1] : vector<8x8xf32> to vector<8xf32>
    %123 = vector.shape_cast %122 : vector<8xf32> to vector<8x1xf32>
    %124 = tpu.reciprocal %123 {approx = true} : vector<8x1xf32> -> vector<8x1xf32>
    %125 = vector.broadcast %124 : vector<8x1xf32> to vector<8x8xf32>
    %126 = arith.mulf %121, %125 : vector<8x8xf32>
    %127 = arith.truncf %126 : vector<8x8xf32> to vector<8x8xbf16>
    %cst_46 = arith.constant dense<0.000000e+00> : vector<8x8xf32>
    %128 = tpu.matmul %127, %114, %cst_46 {dimension_numbers = #tpu.dot_dimension_numbers<[1], [0], [0], [1], [0, 0, 1, 1], [], []>} : vector<8x8xbf16>, vector<8x8xbf16>, vector<8x8xf32> -> vector<8x8xf32>
    %c8_47 = arith.constant 8 : index
    %c0_48 = arith.constant 0 : index
    %129 = vector.load %arg15[%c8_47, %c0_48] : memref<16x32xf32, #tpu.memory_space<vmem>>, vector<8x8xf32>
    tpu.vector_store %arg15[%c8_47, %c0_48], %128 {strides = array<i32>} : memref<16x32xf32, #tpu.memory_space<vmem>>, vector<8x8xf32>,
    %130 = vector.extract_strided_slice %18 {offsets = [8, 8], sizes = [8, 8], strides = [1, 1]} : vector<16x32xbf16> to vector<8x8xbf16>
    %131 = vector.extract_strided_slice %19 {offsets = [8, 8], sizes = [8, 8], strides = [1, 1]} : vector<16x32xbf16> to vector<8x8xbf16>
    %132 = vector.extract_strided_slice %20 {offsets = [8, 8], sizes = [8, 8], strides = [1, 1]} : vector<16x32xbf16> to vector<8x8xbf16>
    %cst_49 = arith.constant dense<0.000000e+00> : vector<8x8xf32>
    %133 = tpu.matmul %130, %131, %cst_49 {dimension_numbers = #tpu.dot_dimension_numbers<[1], [1], [0], [0], [0, 0, 1, 0], [], []>} : vector<8x8xbf16>, vector<8x8xbf16>, vector<8x8xf32> -> vector<8x8xf32>
    %134 = arith.addf %133, %111 : vector<8x8xf32>
    %cst_50 = arith.constant dense<0xFF800000> : vector<8xf32>
    %135 = vector.multi_reduction <maximumf>, %134, %cst_50 [1] : vector<8x8xf32> to vector<8xf32>
    %136 = vector.shape_cast %135 : vector<8xf32> to vector<8x1xf32>
    %137 = vector.broadcast %136 : vector<8x1xf32> to vector<8x8xf32>
    %138 = arith.subf %134, %137 : vector<8x8xf32>
    %139 = math.exp %138 : vector<8x8xf32>
    %cst_51 = arith.constant dense<0.000000e+00> : vector<8xf32>
    %140 = vector.multi_reduction <add>, %139, %cst_51 [1] : vector<8x8xf32> to vector<8xf32>
    %141 = vector.shape_cast %140 : vector<8xf32> to vector<8x1xf32>
    %142 = tpu.reciprocal %141 {approx = true} : vector<8x1xf32> -> vector<8x1xf32>
    %143 = vector.broadcast %142 : vector<8x1xf32> to vector<8x8xf32>
    %144 = arith.mulf %139, %143 : vector<8x8xf32>
    %145 = arith.truncf %144 : vector<8x8xf32> to vector<8x8xbf16>
    %cst_52 = arith.constant dense<0.000000e+00> : vector<8x8xf32>
    %146 = tpu.matmul %145, %132, %cst_52 {dimension_numbers = #tpu.dot_dimension_numbers<[1], [0], [0], [1], [0, 0, 1, 1], [], []>} : vector<8x8xbf16>, vector<8x8xbf16>, vector<8x8xf32> -> vector<8x8xf32>
    %c8_53 = arith.constant 8 : index
    %c8_54 = arith.constant 8 : index
    %147 = vector.load %arg15[%c8_53, %c8_54] : memref<16x32xf32, #tpu.memory_space<vmem>>, vector<8x8xf32>
    tpu.vector_store %arg15[%c8_53, %c8_54], %146 {strides = array<i32>} : memref<16x32xf32, #tpu.memory_space<vmem>>, vector<8x8xf32>,
    %148 = vector.extract_strided_slice %18 {offsets = [8, 16], sizes = [8, 8], strides = [1, 1]} : vector<16x32xbf16> to vector<8x8xbf16>
    %149 = vector.extract_strided_slice %19 {offsets = [8, 16], sizes = [8, 8], strides = [1, 1]} : vector<16x32xbf16> to vector<8x8xbf16>
    %150 = vector.extract_strided_slice %20 {offsets = [8, 16], sizes = [8, 8], strides = [1, 1]} : vector<16x32xbf16> to vector<8x8xbf16>
    %cst_55 = arith.constant dense<0.000000e+00> : vector<8x8xf32>
    %151 = tpu.matmul %148, %149, %cst_55 {dimension_numbers = #tpu.dot_dimension_numbers<[1], [1], [0], [0], [0, 0, 1, 0], [], []>} : vector<8x8xbf16>, vector<8x8xbf16>, vector<8x8xf32> -> vector<8x8xf32>
    %152 = arith.addf %151, %111 : vector<8x8xf32>
    %cst_56 = arith.constant dense<0xFF800000> : vector<8xf32>
    %153 = vector.multi_reduction <maximumf>, %152, %cst_56 [1] : vector<8x8xf32> to vector<8xf32>
    %154 = vector.shape_cast %153 : vector<8xf32> to vector<8x1xf32>
    %155 = vector.broadcast %154 : vector<8x1xf32> to vector<8x8xf32>
    %156 = arith.subf %152, %155 : vector<8x8xf32>
    %157 = math.exp %156 : vector<8x8xf32>
    %cst_57 = arith.constant dense<0.000000e+00> : vector<8xf32>
    %158 = vector.multi_reduction <add>, %157, %cst_57 [1] : vector<8x8xf32> to vector<8xf32>
    %159 = vector.shape_cast %158 : vector<8xf32> to vector<8x1xf32>
    %160 = tpu.reciprocal %159 {approx = true} : vector<8x1xf32> -> vector<8x1xf32>
    %161 = vector.broadcast %160 : vector<8x1xf32> to vector<8x8xf32>
    %162 = arith.mulf %157, %161 : vector<8x8xf32>
    %163 = arith.truncf %162 : vector<8x8xf32> to vector<8x8xbf16>
    %cst_58 = arith.constant dense<0.000000e+00> : vector<8x8xf32>
    %164 = tpu.matmul %163, %150, %cst_58 {dimension_numbers = #tpu.dot_dimension_numbers<[1], [0], [0], [1], [0, 0, 1, 1], [], []>} : vector<8x8xbf16>, vector<8x8xbf16>, vector<8x8xf32> -> vector<8x8xf32>
    %c8_59 = arith.constant 8 : index
    %c16_60 = arith.constant 16 : index
    %165 = vector.load %arg15[%c8_59, %c16_60] : memref<16x32xf32, #tpu.memory_space<vmem>>, vector<8x8xf32>
    tpu.vector_store %arg15[%c8_59, %c16_60], %164 {strides = array<i32>} : memref<16x32xf32, #tpu.memory_space<vmem>>, vector<8x8xf32>,
    %166 = vector.extract_strided_slice %18 {offsets = [8, 24], sizes = [8, 8], strides = [1, 1]} : vector<16x32xbf16> to vector<8x8xbf16>
    %167 = vector.extract_strided_slice %19 {offsets = [8, 24], sizes = [8, 8], strides = [1, 1]} : vector<16x32xbf16> to vector<8x8xbf16>
    %168 = vector.extract_strided_slice %20 {offsets = [8, 24], sizes = [8, 8], strides = [1, 1]} : vector<16x32xbf16> to vector<8x8xbf16>
    %cst_61 = arith.constant dense<0.000000e+00> : vector<8x8xf32>
    %169 = tpu.matmul %166, %167, %cst_61 {dimension_numbers = #tpu.dot_dimension_numbers<[1], [1], [0], [0], [0, 0, 1, 0], [], []>} : vector<8x8xbf16>, vector<8x8xbf16>, vector<8x8xf32> -> vector<8x8xf32>
    %170 = arith.addf %169, %111 : vector<8x8xf32>
    %cst_62 = arith.constant dense<0xFF800000> : vector<8xf32>
    %171 = vector.multi_reduction <maximumf>, %170, %cst_62 [1] : vector<8x8xf32> to vector<8xf32>
    %172 = vector.shape_cast %171 : vector<8xf32> to vector<8x1xf32>
    %173 = vector.broadcast %172 : vector<8x1xf32> to vector<8x8xf32>
    %174 = arith.subf %170, %173 : vector<8x8xf32>
    %175 = math.exp %174 : vector<8x8xf32>
    %cst_63 = arith.constant dense<0.000000e+00> : vector<8xf32>
    %176 = vector.multi_reduction <add>, %175, %cst_63 [1] : vector<8x8xf32> to vector<8xf32>
    %177 = vector.shape_cast %176 : vector<8xf32> to vector<8x1xf32>
    %178 = tpu.reciprocal %177 {approx = true} : vector<8x1xf32> -> vector<8x1xf32>
    %179 = vector.broadcast %178 : vector<8x1xf32> to vector<8x8xf32>
    %180 = arith.mulf %175, %179 : vector<8x8xf32>
    %181 = arith.truncf %180 : vector<8x8xf32> to vector<8x8xbf16>
    %cst_64 = arith.constant dense<0.000000e+00> : vector<8x8xf32>
    %182 = tpu.matmul %181, %168, %cst_64 {dimension_numbers = #tpu.dot_dimension_numbers<[1], [0], [0], [1], [0, 0, 1, 1], [], []>} : vector<8x8xbf16>, vector<8x8xbf16>, vector<8x8xf32> -> vector<8x8xf32>
    %c8_65 = arith.constant 8 : index
    %c24_66 = arith.constant 24 : index
    %183 = vector.load %arg15[%c8_65, %c24_66] : memref<16x32xf32, #tpu.memory_space<vmem>>, vector<8x8xf32>
    tpu.vector_store %arg15[%c8_65, %c24_66], %182 {strides = array<i32>} : memref<16x32xf32, #tpu.memory_space<vmem>>, vector<8x8xf32>,
    %c0_67 = arith.constant 0 : index
    %c0_68 = arith.constant 0 : index
    %184 = vector.load %arg15[%c0_67, %c0_68] : memref<16x32xf32, #tpu.memory_space<vmem>>, vector<16x32xf32>
    %185 = arith.truncf %184 : vector<16x32xf32> to vector<16x32xbf16>
    %c0_69 = arith.constant 0 : index
    %c0_70 = arith.constant 0 : index
    %186 = vector.load %arg10[%c0_69, %c0_70] : memref<32x32xbf16, #tpu.memory_space<vmem>>, vector<32x32xbf16>
    %cst_71 = arith.constant dense<0.000000e+00> : vector<16x32xf32>
    %187 = tpu.matmul %185, %186, %cst_71 {dimension_numbers = #tpu.dot_dimension_numbers<[1], [0], [0], [1], [0, 0, 1, 1], [], []>} : vector<16x32xbf16>, vector<32x32xbf16>, vector<16x32xf32> -> vector<16x32xf32>
    %c0_72 = arith.constant 0 : index
    %c0_73 = arith.constant 0 : index
    %188 = vector.load %arg11[%c0_72, %c0_73] : memref<1x32xf32, #tpu.memory_space<vmem>>, vector<1x32xf32>
    %189 = vector.broadcast %188 : vector<1x32xf32> to vector<16x32xf32>
    %190 = arith.addf %187, %189 : vector<16x32xf32>
    %191 = arith.addf %2, %190 : vector<16x32xf32>
    %cst_74 = arith.constant dense<0.000000e+00> : vector<16xf32>
    %192 = vector.multi_reduction <add>, %191, %cst_74 [1] : vector<16x32xf32> to vector<16xf32>
    %193 = vector.shape_cast %192 : vector<16xf32> to vector<16x1xf32>
    %cst_75 = arith.constant 3.200000e+01 : f32
    %194 = vector.broadcast %cst_75 : f32 to vector<16x1xf32>
    %195 = arith.divf %193, %194 : vector<16x1xf32>
    %196 = vector.broadcast %195 : vector<16x1xf32> to vector<16x32xf32>
    %197 = arith.subf %191, %196 : vector<16x32xf32>
    %198 = arith.mulf %197, %197 : vector<16x32xf32>
    %cst_76 = arith.constant dense<0.000000e+00> : vector<16xf32>
    %199 = vector.multi_reduction <add>, %198, %cst_76 [1] : vector<16x32xf32> to vector<16xf32>
    %200 = vector.shape_cast %199 : vector<16xf32> to vector<16x1xf32>
    %cst_77 = arith.constant 3.200000e+01 : f32
    %201 = vector.broadcast %cst_77 : f32 to vector<16x1xf32>
    %202 = arith.divf %200, %201 : vector<16x1xf32>
    %203 = vector.broadcast %195 : vector<16x1xf32> to vector<16x32xf32>
    %204 = arith.subf %191, %203 : vector<16x32xf32>
    %cst_78 = arith.constant 9.99999974E-6 : f32
    %205 = vector.broadcast %cst_78 : f32 to vector<16x1xf32>
    %206 = arith.addf %202, %205 : vector<16x1xf32>
    %207 = math.rsqrt %206 : vector<16x1xf32>
    %208 = vector.broadcast %207 : vector<16x1xf32> to vector<16x32xf32>
    %209 = arith.mulf %204, %208 : vector<16x32xf32>
    %c0_79 = arith.constant 0 : index
    %c0_80 = arith.constant 0 : index
    %210 = vector.load %arg12[%c0_79, %c0_80] : memref<1x32xf32, #tpu.memory_space<vmem>>, vector<1x32xf32>
    %211 = vector.broadcast %210 : vector<1x32xf32> to vector<16x32xf32>
    %212 = arith.mulf %209, %211 : vector<16x32xf32>
    %c0_81 = arith.constant 0 : index
    %c0_82 = arith.constant 0 : index
    %213 = vector.load %arg13[%c0_81, %c0_82] : memref<1x32xf32, #tpu.memory_space<vmem>>, vector<1x32xf32>
    %214 = vector.broadcast %213 : vector<1x32xf32> to vector<16x32xf32>
    %215 = arith.addf %212, %214 : vector<16x32xf32>
    %216 = arith.truncf %215 : vector<16x32xf32> to vector<16x32xbf16>
    %c0_83 = arith.constant 0 : index
    %c0_84 = arith.constant 0 : index
    %217 = vector.load %arg14[%c0_83, %c0_84] : memref<16x32xbf16, #tpu.memory_space<vmem>>, vector<16x32xbf16>
    tpu.vector_store %arg14[%c0_83, %c0_84], %216 {strides = array<i32>} : memref<16x32xbf16, #tpu.memory_space<vmem>>, vector<16x32xbf16>,
    return
  }
  func.func @transform_0(%arg0: i32, %arg1: memref<2xi32, #tpu.memory_space<smem>>) -> (i32, i32) {
    %c0_i32 = arith.constant 0 : i32
    %c0_i32_0 = arith.constant 0 : i32
    return %arg0, %c0_i32 : i32, i32
  }
  func.func @transform_1(%arg0: i32, %arg1: memref<2xi32, #tpu.memory_space<smem>>) -> (i32, i32) {
    %c0_i32 = arith.constant 0 : i32
    %c0_i32_0 = arith.constant 0 : i32
    return %arg0, %c0_i32 : i32, i32
  }
  func.func @transform_2(%arg0: i32, %arg1: memref<2xi32, #tpu.memory_space<smem>>) -> (i32, i32) {
    %c0_i32 = arith.constant 0 : i32
    %c0_i32_0 = arith.constant 0 : i32
    %c0_i32_1 = arith.constant 0 : i32
    return %c0_i32, %c0_i32_0 : i32, i32
  }
  func.func @transform_3(%arg0: i32, %arg1: memref<2xi32, #tpu.memory_space<smem>>) -> (i32, i32) {
    %c0_i32 = arith.constant 0 : i32
    %c0_i32_0 = arith.constant 0 : i32
    %c0_i32_1 = arith.constant 0 : i32
    return %c0_i32, %c0_i32_0 : i32, i32
  }
  func.func @transform_4(%arg0: i32, %arg1: memref<2xi32, #tpu.memory_space<smem>>) -> (i32, i32) {
    %c0_i32 = arith.constant 0 : i32
    %c0_i32_0 = arith.constant 0 : i32
    %c0_i32_1 = arith.constant 0 : i32
    return %c0_i32, %c0_i32_0 : i32, i32
  }
  func.func @transform_5(%arg0: i32, %arg1: memref<2xi32, #tpu.memory_space<smem>>) -> (i32, i32) {
    %c0_i32 = arith.constant 0 : i32
    %c0_i32_0 = arith.constant 0 : i32
    %c0_i32_1 = arith.constant 0 : i32
    return %c0_i32, %c0_i32_0 : i32, i32
  }
  func.func @transform_6(%arg0: i32, %arg1: memref<2xi32, #tpu.memory_space<smem>>) -> (i32, i32) {
    %c0_i32 = arith.constant 0 : i32
    %c0_i32_0 = arith.constant 0 : i32
    %c0_i32_1 = arith.constant 0 : i32
    return %c0_i32, %c0_i32_0 : i32, i32
  }
  func.func @transform_7(%arg0: i32, %arg1: memref<2xi32, #tpu.memory_space<smem>>) -> (i32, i32) {
    %c0_i32 = arith.constant 0 : i32
    %c0_i32_0 = arith.constant 0 : i32
    %c0_i32_1 = arith.constant 0 : i32
    return %c0_i32, %c0_i32_0 : i32, i32
  }
  func.func @transform_8(%arg0: i32, %arg1: memref<2xi32, #tpu.memory_space<smem>>) -> (i32, i32) {
    %c0_i32 = arith.constant 0 : i32
    %c0_i32_0 = arith.constant 0 : i32
    %c0_i32_1 = arith.constant 0 : i32
    return %c0_i32, %c0_i32_0 : i32, i32
  }
  func.func @transform_9(%arg0: i32, %arg1: memref<2xi32, #tpu.memory_space<smem>>) -> (i32, i32) {
    %c0_i32 = arith.constant 0 : i32
    %c0_i32_0 = arith.constant 0 : i32
    %c0_i32_1 = arith.constant 0 : i32
    return %c0_i32, %c0_i32_0 : i32, i32
  }
  func.func @transform_10(%arg0: i32, %arg1: memref<2xi32, #tpu.memory_space<smem>>) -> (i32, i32) {
    %c0_i32 = arith.constant 0 : i32
    %c0_i32_0 = arith.constant 0 : i32
    %c0_i32_1 = arith.constant 0 : i32
    return %c0_i32, %c0_i32_0 : i32, i32
  }
  func.func @transform_11(%arg0: i32, %arg1: memref<2xi32, #tpu.memory_space<smem>>) -> (i32, i32) {
    %c0_i32 = arith.constant 0 : i32
    %c0_i32_0 = arith.constant 0 : i32
    %c0_i32_1 = arith.constant 0 : i32
    return %c0_i32, %c0_i32_0 : i32, i32
  }
  func.func @transform_12(%arg0: i32, %arg1: memref<2xi32, #tpu.memory_space<smem>>) -> (i32, i32) {
    %c0_i32 = arith.constant 0 : i32
    %c0_i32_0 = arith.constant 0 : i32
    return %arg0, %c0_i32 : i32, i32
  }
}

module attributes {stable_mosaic.version = 11 : i64} {
  func.func @_ln_linear_kernel(%arg0: i32, %arg1: memref<16x32xbf16, #tpu.memory_space<vmem>>, %arg2: memref<1x32xf32, #tpu.memory_space<vmem>>, %arg3: memref<1x32xf32, #tpu.memory_space<vmem>>, %arg4: memref<32x24xbf16, #tpu.memory_space<vmem>>, %arg5: memref<1x24xf32, #tpu.memory_space<vmem>>, %arg6: memref<16x24xf32, #tpu.memory_space<vmem>>) attributes {dimension_semantics = [#tpu.dimension_semantics<parallel>], iteration_bounds = array<i64: 1>, scalar_prefetch = 0 : i64, scratch_operands = 0 : i64, tpu.core_type = #tpu.core_type<tc>, window_params = [{transform_indices = @transform_0, window_bounds = array<i64: 16, 32>}, {pipeline_mode = #tpu.pipeline_mode<synchronous>, transform_indices = @transform_1, window_bounds = array<i64: 1, 32>}, {pipeline_mode = #tpu.pipeline_mode<synchronous>, transform_indices = @transform_2, window_bounds = array<i64: 1, 32>}, {pipeline_mode = #tpu.pipeline_mode<synchronous>, transform_indices = @transform_3, window_bounds = array<i64: 32, 24>}, {pipeline_mode = #tpu.pipeline_mode<synchronous>, transform_indices = @transform_4, window_bounds = array<i64: 1, 24>}, {transform_indices = @transform_5, window_bounds = array<i64: 16, 24>}]} {
    %c0 = arith.constant 0 : index
    %c0_0 = arith.constant 0 : index
    %0 = vector.load %arg1[%c0, %c0_0] : memref<16x32xbf16, #tpu.memory_space<vmem>>, vector<16x32xbf16>
    %1 = arith.extf %0 : vector<16x32xbf16> to vector<16x32xf32>
    %cst = arith.constant dense<0.000000e+00> : vector<16xf32>
    %2 = vector.multi_reduction <add>, %1, %cst [1] : vector<16x32xf32> to vector<16xf32>
    %3 = vector.shape_cast %2 : vector<16xf32> to vector<16x1xf32>
    %cst_1 = arith.constant 3.200000e+01 : f32
    %4 = vector.broadcast %cst_1 : f32 to vector<16x1xf32>
    %5 = arith.divf %3, %4 : vector<16x1xf32>
    %6 = vector.broadcast %5 : vector<16x1xf32> to vector<16x32xf32>
    %7 = arith.subf %1, %6 : vector<16x32xf32>
    %8 = arith.mulf %7, %7 : vector<16x32xf32>
    %cst_2 = arith.constant dense<0.000000e+00> : vector<16xf32>
    %9 = vector.multi_reduction <add>, %8, %cst_2 [1] : vector<16x32xf32> to vector<16xf32>
    %10 = vector.shape_cast %9 : vector<16xf32> to vector<16x1xf32>
    %cst_3 = arith.constant 3.200000e+01 : f32
    %11 = vector.broadcast %cst_3 : f32 to vector<16x1xf32>
    %12 = arith.divf %10, %11 : vector<16x1xf32>
    %13 = vector.broadcast %5 : vector<16x1xf32> to vector<16x32xf32>
    %14 = arith.subf %1, %13 : vector<16x32xf32>
    %cst_4 = arith.constant 9.99999974E-6 : f32
    %15 = vector.broadcast %cst_4 : f32 to vector<16x1xf32>
    %16 = arith.addf %12, %15 : vector<16x1xf32>
    %17 = math.rsqrt %16 : vector<16x1xf32>
    %18 = vector.broadcast %17 : vector<16x1xf32> to vector<16x32xf32>
    %19 = arith.mulf %14, %18 : vector<16x32xf32>
    %c0_5 = arith.constant 0 : index
    %c0_6 = arith.constant 0 : index
    %20 = vector.load %arg2[%c0_5, %c0_6] : memref<1x32xf32, #tpu.memory_space<vmem>>, vector<1x32xf32>
    %21 = vector.broadcast %20 : vector<1x32xf32> to vector<16x32xf32>
    %22 = arith.mulf %19, %21 : vector<16x32xf32>
    %c0_7 = arith.constant 0 : index
    %c0_8 = arith.constant 0 : index
    %23 = vector.load %arg3[%c0_7, %c0_8] : memref<1x32xf32, #tpu.memory_space<vmem>>, vector<1x32xf32>
    %24 = vector.broadcast %23 : vector<1x32xf32> to vector<16x32xf32>
    %25 = arith.addf %22, %24 : vector<16x32xf32>
    %26 = arith.truncf %25 : vector<16x32xf32> to vector<16x32xbf16>
    %c0_9 = arith.constant 0 : index
    %c0_10 = arith.constant 0 : index
    %27 = vector.load %arg4[%c0_9, %c0_10] : memref<32x24xbf16, #tpu.memory_space<vmem>>, vector<32x24xbf16>
    %cst_11 = arith.constant dense<0.000000e+00> : vector<16x24xf32>
    %28 = tpu.matmul %26, %27, %cst_11 {dimension_numbers = #tpu.dot_dimension_numbers<[1], [0], [0], [1], [0, 0, 1, 1], [], []>} : vector<16x32xbf16>, vector<32x24xbf16>, vector<16x24xf32> -> vector<16x24xf32>
    %c0_12 = arith.constant 0 : index
    %c0_13 = arith.constant 0 : index
    %29 = vector.load %arg5[%c0_12, %c0_13] : memref<1x24xf32, #tpu.memory_space<vmem>>, vector<1x24xf32>
    %30 = vector.broadcast %29 : vector<1x24xf32> to vector<16x24xf32>
    %31 = arith.addf %28, %30 : vector<16x24xf32>
    %c0_14 = arith.constant 0 : index
    %c0_15 = arith.constant 0 : index
    %32 = vector.load %arg6[%c0_14, %c0_15] : memref<16x24xf32, #tpu.memory_space<vmem>>, vector<16x24xf32>
    tpu.vector_store %arg6[%c0_14, %c0_15], %31 {strides = array<i32>} : memref<16x24xf32, #tpu.memory_space<vmem>>, vector<16x24xf32>,
    return
  }
  func.func @transform_0(%arg0: i32) -> (i32, i32) {
    %c0_i32 = arith.constant 0 : i32
    %c0_i32_0 = arith.constant 0 : i32
    return %arg0, %c0_i32 : i32, i32
  }
  func.func @transform_1(%arg0: i32) -> (i32, i32) {
    %c0_i32 = arith.constant 0 : i32
    %c0_i32_0 = arith.constant 0 : i32
    %c0_i32_1 = arith.constant 0 : i32
    return %c0_i32, %c0_i32_0 : i32, i32
  }
  func.func @transform_2(%arg0: i32) -> (i32, i32) {
    %c0_i32 = arith.constant 0 : i32
    %c0_i32_0 = arith.constant 0 : i32
    %c0_i32_1 = arith.constant 0 : i32
    return %c0_i32, %c0_i32_0 : i32, i32
  }
  func.func @transform_3(%arg0: i32) -> (i32, i32) {
    %c0_i32 = arith.constant 0 : i32
    %c0_i32_0 = arith.constant 0 : i32
    %c0_i32_1 = arith.constant 0 : i32
    return %c0_i32, %c0_i32_0 : i32, i32
  }
  func.func @transform_4(%arg0: i32) -> (i32, i32) {
    %c0_i32 = arith.constant 0 : i32
    %c0_i32_0 = arith.constant 0 : i32
    %c0_i32_1 = arith.constant 0 : i32
    return %c0_i32, %c0_i32_0 : i32, i32
  }
  func.func @transform_5(%arg0: i32) -> (i32, i32) {
    %c0_i32 = arith.constant 0 : i32
    %c0_i32_0 = arith.constant 0 : i32
    return %arg0, %c0_i32 : i32, i32
  }
}

</mosaic_0001>

<bundles_post_ra>
// kernel: fmri_transformer_forward.13
= control target key start
LH: loop header
LB: loop body
LE: loop exit
PB: predicated region body
PF: predicated region fallthrough
CT: control target
= control target key end

     0   :  { %v130_v0 = vmov 0.0   ;;  %vm131_vm0 = vmmov 0   ;;  %vm44_vm1 = vcmask 261120   ;;  %vm100_vm2 = vcmask 257024   ;;  %s181_s1 = inlined_call_operand.vmem [shape: bf16[32,32], index: 1, kind: input, shape index: {}]   ;;  %s182_s0 = inlined_call_operand.vmem [shape: f32[16,32], index: 0, kind: input, shape index: {}]   ;;  %s183_s2 = inlined_call_operand.vmem [shape: f32[1,32], index: 2, kind: input, shape index: {}]   ;;  %s184_s3 = inlined_call_operand.vmem [shape: f32[8,32], index: 3, kind: input, shape index: {}]   ;;  %s185_s4 = inlined_call_operand.vmem [shape: bf16[16,32], index: 4, kind: output, shape index: {}]  }
   0x1   :  { %118 = vmatprep.subr.bf16.mxu0 %v130_v0  ;;  %v128_v1 = vld [vmem:[%s181_s1 + $0x8] sm:$0xff]   ;;  %122 = vmatprep.mubr.msk.bf16.mxu0 %vm131_vm0, %v130_v0  ;;  %v129_v2 = vld [vmem:[%s181_s1] sm:$0xff]  }
   0x2   :  { %119 = vmatpush3.bf16.msra.mxu0 %v128_v1  ;;  %v18_v3 = vld [vmem:[%s182_s0] sm:$0xff]  ;;  %v19_v4 = vld [vmem:[%s182_s0 + $0x8] sm:$0xff] }
   0x3   :  { %120 = vmatprep.subr.bf16.mxu0 %v130_v0  ;;  %v20_v5 = vpack.c.bf16 %v19_v4, %v18_v3  ;;  %v107_v6 = vld [vmem:[%s183_s2] ss:$0 sm:$0xff] }
   0x4   :  { %v89_v8 = vld [vmem:[%s184_s3] sm:$0xff] }
   0x6   :  { %121 = vmatpush3.bf16.msra.mxu0 %v129_v2 }
   0x9   :  { %123 = vmatmul.mubr.msk.bf16.vlgmr.msra.gmra.mxu0 %vm44_vm1, %v20_v5 }
  0xc9   :  { %v82_v7 = vpop.f32.mrf.mxu0 }
  0xca   :  { %v83_v9 = vadd.f32 %v107_v6, %v82_v7 }
  0xcb   :  { %v124_v10 = vpop.f32.mrf.mxu0 }
  0xcc   :  { %v90_v11 = vadd.f32 %v89_v8, %v83_v9 }
  0xcd   :  { %v85_v12 = vpop.f32.mrf.mxu0 }
  0xce   :  { %v113_v13 = vpack.c.bf16 %v90_v11, %v90_v11  ;;  %v86_v14 = vadd.f32 %v107_v6, %v85_v12 }
  0xcf   :  { %v125_v15 = vpop.f32.mrf.mxu0 }
  0xd0   :  { %101 = vst.msk [vmem:[%s185_s4] sm:$0xf] %vm100_vm2, %v113_v13  ;;  %v91_v16 = vadd.f32 %v89_v8, %v86_v14 }
  0xd2   :  { %v114_v17 = vpack.c.bf16 %v91_v16, %v91_v16 }
  0xd4   :  { %102 = vst.msk [vmem:[%s185_s4 + $0x4] sm:$0xf] %vm100_vm2, %v114_v17 }

// kernel: fmri_transformer_forward.16
= control target key start
LH: loop header
LB: loop body
LE: loop exit
PB: predicated region body
PF: predicated region fallthrough
CT: control target
= control target key end

     0   :  { %v273_v0 = vmov 0.0   ;;  %vm274_vm0 = vmmov 0   ;;  %vm59_vm1 = vcmask 261120   ;;  %vm122_vm2 = vcmask 130048   ;;  %s350_s1 = inlined_call_operand.vmem [shape: bf16[32,16], index: 1, kind: input, shape index: {}]   ;;  %s351_s0 = inlined_call_operand.vmem [shape: bf16[16,32], index: 0, kind: input, shape index: {}]   ;;  %s352_s3 = inlined_call_operand.vmem [shape: bf16[16,32], index: 3, kind: input, shape index: {}]   ;;  %s353_s2 = inlined_call_operand.vmem [shape: f32[1,16], index: 2, kind: input, shape index: {}]   ;;  %s354_s4 = inlined_call_operand.vmem [shape: f32[1,32], index: 4, kind: input, shape index: {}]   ;;  %s355_s5 = inlined_call_operand.vmem [shape: f32[1,32], index: 5, kind: input, shape index: {}]   ;;  %s356_s6 = inlined_call_operand.vmem [shape: f32[1,32], index: 6, kind: input, shape index: {}]   ;;  %s357_s7 = inlined_call_operand.vmem [shape: bf16[16,32], index: 7, kind: output, shape index: {}]  }
   0x1   :  { %248 = vmatprep.subr.bf16.mxu0 %v273_v0  ;;  %v264_v1 = vld [vmem:[%s350_s1 + $0x8] sm:$0xff]   ;;  %252 = vmatprep.mubr.msk.bf16.mxu0 %vm274_vm0, %v273_v0  ;;  %v265_v2 = vld [vmem:[%s350_s1] sm:$0xff]   ;;  %vm222_vm3 = vcmask 257024  }
   0x2   :  { %256 = vmatprep.subr.bf16.mxu1 %v273_v0  ;;  %258 = vmatprep.mubr.msk.bf16.mxu1 %vm274_vm0, %v273_v0  ;;  %v27_v3 = vld [vmem:[%s351_s0] sm:$0xff]  }
   0x3   :  { %249 = vmatpush3.bf16.msra.mxu0 %v264_v1  ;;  %v267_v4 = vld [vmem:[%s352_s3] sm:$0xff]   ;;  %v29_v16 = vunpack.c.l.bf16 %v27_v3  ;;  %v30_v21 = vunpack.c.h.bf16 %v27_v3 }
   0x4   :  { %250 = vmatprep.subr.bf16.mxu0 %v273_v0  ;;  %257 = vmatpush3.bf16.msra.mxu1 %v267_v4  ;;  %v229_v5 = vld [vmem:[%s353_s2] ss:$0 sm:$0xff] }
   0x5   :  { %v234_v15 = vld [vmem:[%s354_s4] ss:$0 sm:$0xff] }
   0x6   :  { %v237_v45 = vld [vmem:[%s355_s5] ss:$0 sm:$0xff] }
   0x7   :  { %251 = vmatpush3.bf16.msra.mxu0 %v265_v2  ;;  %v238_v47 = vld [vmem:[%s356_s6] ss:$0 sm:$0xff] }
   0xa   :  { %253 = vmatmul.mubr.msk.bf16.vlgmr.msra.gmra.mxu0 %vm59_vm1, %v27_v3 }
  0xca   :  { %v97_v6 = vpop.f32.mrf.mxu0 }
  0xcb   :  { %v98_v8 = vadd.f32 %v229_v5, %v97_v6 }
  0xcc   :  { %v254_v7 = vpop.f32.mrf.mxu0 }
  0xcd   :  { %v104_v12 = vmax.f32 %v98_v8, 0.0 }
  0xce   :  { %v100_v9 = vpop.f32.mrf.mxu0 }
  0xcf   :  { %v101_v10 = vadd.f32 %v229_v5, %v100_v9 }
  0xd0   :  { %v255_v11 = vpop.f32.mrf.mxu0 }
  0xd1   :  { %v105_v13 = vmax.f32 %v101_v10, 0.0 }
  0xd3   :  { %v106_v14 = vpack.c.bf16 %v105_v13, %v104_v12 }
  0xd5   :  { %259 = vmatmul.mubr.msk.bf16.vlgmr.msra.gmra.mxu1 %vm122_vm2, %v106_v14 }
 0x195   :  { %v160_v17 = vpop.f32.mrf.mxu1 }
 0x196   :  { %v161_v18 = vadd.f32 %v234_v15, %v160_v17 }
 0x197   :  { %v260_v19 = vpop.f32.mrf.mxu1 }
 0x198   :  { %v167_v20 = vadd.f32 %v161_v18, %v29_v16 }
 0x199   :  { %v163_v22 = vpop.f32.mrf.mxu1 }
 0x19a   :  { %v164_v23 = vadd.f32 %v234_v15, %v163_v22  ;;  %v169_v24 = vsel %vm59_vm1, %v167_v20, 0.0 }
 0x19b   :  { %v261_v25 = vpop.f32.mrf.mxu1  ;;  %170 = vadd.xlane.f32.xlu0 %v169_v24 }
 0x19c   :  { %v168_v26 = vadd.f32 %v164_v23, %v30_v21 }
 0x19e   :  { %v172_v27 = vsel %vm59_vm1, %v168_v26, 0.0 }
 0x19f   :  { %173 = vadd.xlane.f32.xlu0 %v172_v27 }
 0x224   :  { %v171_v28 = vpop.xlane.xlu0 %170 }
 0x225   :  { %v176_v29 = vmul.f32 0.03125, %v171_v28 }
 0x227   :  { %v178_v30 = vsub.f32 %v167_v20, %v176_v29 }
 0x228   :  { %v174_v31 = vpop.xlane.xlu0 %173 }
 0x229   :  { %v177_v32 = vmul.f32 0.03125, %v174_v31  ;;  %v180_v33 = vmul.f32 %v178_v30, %v178_v30 }
 0x22b   :  { %v179_v34 = vsub.f32 %v168_v26, %v177_v32  ;;  %v182_v35 = vsel %vm59_vm1, %v180_v33, 0.0 }
 0x22c   :  { %183 = vadd.xlane.f32.xlu1 %v182_v35 }
 0x22d   :  { %v181_v36 = vmul.f32 %v179_v34, %v179_v34 }
 0x22f   :  { %v185_v37 = vsel %vm59_vm1, %v181_v36, 0.0 }
 0x230   :  { %186 = vadd.xlane.f32.xlu1 %v185_v37 }
 0x2b5   :  { %v184_v38 = vpop.xlane.xlu1 %183 }
 0x2b6   :  { %v188_v39 = vmul.f32 0.03125, %v184_v38 }
 0x2b8   :  { %v190_v40 = vadd.f32 1e-05, %v188_v39 }
 0x2b9   :  { %v187_v41 = vpop.xlane.xlu1 %186 }
 0x2ba   :  { %269 = vrsqrt.f32 %v190_v40  ;;  %v189_v42 = vmul.f32 0.03125, %v187_v41 }
 0x2bc   :  { %v191_v43 = vadd.f32 1e-05, %v189_v42 }
 0x2be   :  { %271 = vrsqrt.f32 %v191_v43 }
 0x2c7   :  { %v270_v44 = vpop.eup %269 }
 0x2c8   :  { %v194_v46 = vmul.f32 %v270_v44, %v178_v30 }
 0x2ca   :  { %v203_v48 = vmul.f32 %v237_v45, %v194_v46 }
 0x2cb   :  { %v272_v49 = vpop.eup %271 }
 0x2cc   :  { %v212_v50 = vadd.f32 %v238_v47, %v203_v48  ;;  %v195_v51 = vmul.f32 %v272_v49, %v179_v34 }
 0x2ce   :  { %v241_v52 = vpack.c.bf16 %v212_v50, %v212_v50  ;;  %v204_v53 = vmul.f32 %v237_v45, %v195_v51 }
 0x2d0   :  { %223 = vst.msk [vmem:[%s357_s7] sm:$0xf] %vm222_vm3, %v241_v52  ;;  %v213_v54 = vadd.f32 %v238_v47, %v204_v53 }
 0x2d2   :  { %v242_v55 = vpack.c.bf16 %v213_v54, %v213_v54 }
 0x2d4   :  { %224 = vst.msk [vmem:[%s357_s7 + $0x4] sm:$0xf] %vm222_vm3, %v242_v55 }

// kernel: fmri_transformer_forward.14
= control target key start
LH: loop header
LB: loop body
LE: loop exit
PB: predicated region body
PF: predicated region fallthrough
CT: control target
= control target key end

     0   :  { %vm44_vm0 = vcmask 1043456   ;;  %v130_v0 = vmov 0.0   ;;  %vm131_vm1 = vmmov 0   ;;  %vm40_vm2 = vcmask 195584   ;;  %s181_s1 = inlined_call_operand.vmem [shape: bf16[24,32], index: 1, kind: input, shape index: {}]   ;;  %s182_s0 = inlined_call_operand.vmem [shape: f32[16,24], index: 0, kind: input, shape index: {}]   ;;  %s183_s2 = inlined_call_operand.vmem [shape: f32[1,32], index: 2, kind: input, shape index: {}]   ;;  %s184_s3 = inlined_call_operand.vmem [shape: f32[8,32], index: 3, kind: input, shape index: {}]   ;;  %s185_s4 = inlined_call_operand.vmem [shape: bf16[16,32], index: 4, kind: output, shape index: {}]  }
   0x1   :  { %118 = vmatprep.subr.bf16.mxu0 %v130_v0  ;;  %v128_v1 = vld [vmem:[%s181_s1 + $0x8] ss:$0 sps:$4 sm:$0xff]   ;;  %122 = vmatprep.mubr.msk.bf16.mxu0 %vm131_vm1, %v130_v0  ;;  %v129_v3 = vld [vmem:[%s181_s1] sm:$0xff]   ;;  %vm100_vm3 = vcmask 257024  }
   0x2   :  { %v46_v2 = vsel %vm44_vm0, %v128_v1, 0  ;;  %v18_v4 = vld [vmem:[%s182_s0] sm:$0xff]  ;;  %v19_v5 = vld [vmem:[%s182_s0 + $0x8] sm:$0xff] }
   0x3   :  { %119 = vmatpush3.bf16.msra.mxu0 %v46_v2  ;;  %v20_v6 = vpack.c.bf16 %v19_v5, %v18_v4  ;;  %v107_v7 = vld [vmem:[%s183_s2] ss:$0 sm:$0xff] }
   0x4   :  { %120 = vmatprep.subr.bf16.mxu0 %v130_v0  ;;  %v89_v9 = vld [vmem:[%s184_s3] sm:$0xff] }
   0x7   :  { %121 = vmatpush3.bf16.msra.mxu0 %v129_v3 }
   0xa   :  { %123 = vmatmul.mubr.msk.bf16.vlgmr.msra.gmra.mxu0 %vm40_vm2, %v20_v6 }
  0xca   :  { %v82_v8 = vpop.f32.mrf.mxu0 }
  0xcb   :  { %v83_v10 = vadd.f32 %v107_v7, %v82_v8 }
  0xcc   :  { %v124_v11 = vpop.f32.mrf.mxu0 }
  0xcd   :  { %v90_v12 = vadd.f32 %v89_v9, %v83_v10 }
  0xce   :  { %v85_v13 = vpop.f32.mrf.mxu0 }
  0xcf   :  { %v113_v14 = vpack.c.bf16 %v90_v12, %v90_v12  ;;  %v86_v15 = vadd.f32 %v107_v7, %v85_v13 }
  0xd0   :  { %v125_v16 = vpop.f32.mrf.mxu0 }
  0xd1   :  { %101 = vst.msk [vmem:[%s185_s4] sm:$0xf] %vm100_vm3, %v113_v14  ;;  %v91_v17 = vadd.f32 %v89_v9, %v86_v15 }
  0xd3   :  { %v114_v18 = vpack.c.bf16 %v91_v17, %v91_v17 }
  0xd5   :  { %102 = vst.msk [vmem:[%s185_s4 + $0x4] sm:$0xf] %vm100_vm3, %v114_v18 }

// kernel: fmri_transformer_forward.18
= control target key start
LH: loop header
LB: loop body
LE: loop exit
PB: predicated region body
PF: predicated region fallthrough
CT: control target
= control target key end

     0   :  { %v329_v0 = vmov 0.0   ;;  %vm330_vm0 = vmmov 0   ;;  %vm65_vm1 = vcmask 261120   ;;  %vm128_vm2 = vcmask 130048   ;;  %s426_s1 = inlined_call_operand.vmem [shape: bf16[32,16], index: 1, kind: input, shape index: {}]   ;;  %s427_s0 = inlined_call_operand.vmem [shape: bf16[16,32], index: 0, kind: input, shape index: {}]   ;;  %s428_s3 = inlined_call_operand.vmem [shape: bf16[16,32], index: 3, kind: input, shape index: {}]   ;;  %s429_s2 = inlined_call_operand.vmem [shape: f32[1,16], index: 2, kind: input, shape index: {}]   ;;  %s430_s4 = inlined_call_operand.vmem [shape: f32[1,32], index: 4, kind: input, shape index: {}]   ;;  %s431_s5 = inlined_call_operand.vmem [shape: f32[1,32], index: 5, kind: input, shape index: {}]   ;;  %s432_s6 = inlined_call_operand.vmem [shape: f32[1,32], index: 6, kind: input, shape index: {}]   ;;  %s433_s7 = inlined_call_operand.vmem [shape: f32[1,32], index: 7, kind: input, shape index: {}]   ;;  %s434_s8 = inlined_call_operand.vmem [shape: f32[1,32], index: 8, kind: input, shape index: {}]   ;;  %s435_s9 = inlined_call_operand.vmem [shape: bf16[16,32], index: 9, kind: output, shape index: {}]  }
   0x1   :  { %300 = vmatprep.subr.bf16.mxu0 %v329_v0  ;;  %v316_v1 = vld [vmem:[%s426_s1 + $0x8] sm:$0xff]   ;;  %304 = vmatprep.mubr.msk.bf16.mxu0 %vm330_vm0, %v329_v0  ;;  %v317_v2 = vld [vmem:[%s426_s1] sm:$0xff]   ;;  %vm272_vm3 = vcmask 257024  }
   0x2   :  { %308 = vmatprep.subr.bf16.mxu1 %v329_v0  ;;  %310 = vmatprep.mubr.msk.bf16.mxu1 %vm330_vm0, %v329_v0  ;;  %v33_v3 = vld [vmem:[%s427_s0] sm:$0xff]  }
   0x3   :  { %301 = vmatpush3.bf16.msra.mxu0 %v316_v1  ;;  %v319_v4 = vld [vmem:[%s428_s3] sm:$0xff]   ;;  %v35_v16 = vunpack.c.l.bf16 %v33_v3  ;;  %v36_v21 = vunpack.c.h.bf16 %v33_v3 }
   0x4   :  { %302 = vmatprep.subr.bf16.mxu0 %v329_v0  ;;  %309 = vmatpush3.bf16.msra.mxu1 %v319_v4  ;;  %v279_v5 = vld [vmem:[%s429_s2] ss:$0 sm:$0xff] }
   0x5   :  { %v284_v15 = vld [vmem:[%s430_s4] ss:$0 sm:$0xff] }
   0x6   :  { %v287_v45 = vld [vmem:[%s431_s5] ss:$0 sm:$0xff] }
   0x7   :  { %303 = vmatpush3.bf16.msra.mxu0 %v317_v2  ;;  %v288_v47 = vld [vmem:[%s432_s6] ss:$0 sm:$0xff] }
   0xa   :  { %305 = vmatmul.mubr.msk.bf16.vlgmr.msra.gmra.mxu0 %vm65_vm1, %v33_v3 }
  0xca   :  { %v103_v6 = vpop.f32.mrf.mxu0 }
  0xcb   :  { %v104_v8 = vadd.f32 %v279_v5, %v103_v6 }
  0xcc   :  { %v306_v7 = vpop.f32.mrf.mxu0 }
  0xcd   :  { %v110_v12 = vmax.f32 %v104_v8, 0.0 }
  0xce   :  { %v106_v9 = vpop.f32.mrf.mxu0 }
  0xcf   :  { %v107_v10 = vadd.f32 %v279_v5, %v106_v9  ;;  %v289_v9 = vld [vmem:[%s433_s7] ss:$0 sm:$0xff] }
  0xd0   :  { %v307_v11 = vpop.f32.mrf.mxu0 }
  0xd1   :  { %v111_v13 = vmax.f32 %v107_v10, 0.0  ;;  %v290_v11 = vld [vmem:[%s434_s8] ss:$0 sm:$0xff] }
  0xd3   :  { %v112_v14 = vpack.c.bf16 %v111_v13, %v110_v12 }
  0xd5   :  { %311 = vmatmul.mubr.msk.bf16.vlgmr.msra.gmra.mxu1 %vm128_vm2, %v112_v14 }
 0x195   :  { %v166_v17 = vpop.f32.mrf.mxu1 }
 0x196   :  { %v167_v18 = vadd.f32 %v284_v15, %v166_v17 }
 0x197   :  { %v312_v19 = vpop.f32.mrf.mxu1 }
 0x198   :  { %v173_v20 = vadd.f32 %v167_v18, %v35_v16 }
 0x199   :  { %v169_v22 = vpop.f32.mrf.mxu1 }
 0x19a   :  { %v170_v23 = vadd.f32 %v284_v15, %v169_v22  ;;  %v175_v24 = vsel %vm65_vm1, %v173_v20, 0.0 }
 0x19b   :  { %v313_v25 = vpop.f32.mrf.mxu1  ;;  %176 = vadd.xlane.f32.xlu0 %v175_v24 }
 0x19c   :  { %v174_v26 = vadd.f32 %v170_v23, %v36_v21 }
 0x19e   :  { %v178_v27 = vsel %vm65_vm1, %v174_v26, 0.0 }
 0x19f   :  { %179 = vadd.xlane.f32.xlu0 %v178_v27 }
 0x224   :  { %v177_v28 = vpop.xlane.xlu0 %176 }
 0x225   :  { %v182_v29 = vmul.f32 0.03125, %v177_v28 }
 0x227   :  { %v184_v30 = vsub.f32 %v173_v20, %v182_v29 }
 0x228   :  { %v180_v31 = vpop.xlane.xlu0 %179 }
 0x229   :  { %v183_v32 = vmul.f32 0.03125, %v180_v31  ;;  %v186_v33 = vmul.f32 %v184_v30, %v184_v30 }
 0x22b   :  { %v185_v34 = vsub.f32 %v174_v26, %v183_v32  ;;  %v188_v35 = vsel %vm65_vm1, %v186_v33, 0.0 }
 0x22c   :  { %189 = vadd.xlane.f32.xlu1 %v188_v35 }
 0x22d   :  { %v187_v36 = vmul.f32 %v185_v34, %v185_v34 }
 0x22f   :  { %v191_v37 = vsel %vm65_vm1, %v187_v36, 0.0 }
 0x230   :  { %192 = vadd.xlane.f32.xlu1 %v191_v37 }
 0x2b5   :  { %v190_v38 = vpop.xlane.xlu1 %189 }
 0x2b6   :  { %v194_v39 = vmul.f32 0.03125, %v190_v38 }
 0x2b8   :  { %v196_v40 = vadd.f32 1e-05, %v194_v39 }
 0x2b9   :  { %v193_v41 = vpop.xlane.xlu1 %192 }
 0x2ba   :  { %321 = vrsqrt.f32 %v196_v40  ;;  %v195_v42 = vmul.f32 0.03125, %v193_v41 }
 0x2bc   :  { %v197_v43 = vadd.f32 1e-05, %v195_v42 }
 0x2be   :  { %323 = vrsqrt.f32 %v197_v43 }
 0x2c7   :  { %v322_v44 = vpop.eup %321 }
 0x2c8   :  { %v200_v46 = vmul.f32 %v322_v44, %v184_v30 }
 0x2ca   :  { %v209_v48 = vmul.f32 %v287_v45, %v200_v46 }
 0x2cb   :  { %v324_v49 = vpop.eup %323 }
 0x2cc   :  { %v218_v50 = vadd.f32 %v288_v47, %v209_v48  ;;  %v201_v51 = vmul.f32 %v324_v49, %v185_v34 }
 0x2ce   :  { %v220_v52 = vsel %vm65_vm1, %v218_v50, 0.0  ;;  %v210_v53 = vmul.f32 %v287_v45, %v201_v51 }
 0x2cf   :  { %221 = vadd.xlane.f32.xlu0 %v220_v52 }
 0x2d0   :  { %v219_v54 = vadd.f32 %v288_v47, %v210_v53 }
 0x2d2   :  { %v223_v55 = vsel %vm65_vm1, %v219_v54, 0.0 }
 0x2d3   :  { %224 = vadd.xlane.f32.xlu1 %v223_v55 }
 0x358   :  { %v222_v56 = vpop.xlane.xlu0 %221 }
 0x359   :  { %v226_v57 = vmul.f32 0.03125, %v222_v56 }
 0x35b   :  { %v228_v58 = vsub.f32 %v218_v50, %v226_v57 }
 0x35c   :  { %v225_v59 = vpop.xlane.xlu1 %224 }
 0x35d   :  { %v227_v60 = vmul.f32 0.03125, %v225_v59  ;;  %v230_v61 = vmul.f32 %v228_v58, %v228_v58 }
 0x35f   :  { %v229_v62 = vsub.f32 %v219_v54, %v227_v60  ;;  %v232_v63 = vsel %vm65_vm1, %v230_v61, 0.0 }
 0x360   :  { %233 = vadd.xlane.f32.xlu0 %v232_v63 }
 0x361   :  { %v231_v0 = vmul.f32 %v229_v62, %v229_v62 }
 0x363   :  { %v235_v1 = vsel %vm65_vm1, %v231_v0, 0.0 }
 0x364   :  { %236 = vadd.xlane.f32.xlu1 %v235_v1 }
 0x3e9   :  { %v234_v2 = vpop.xlane.xlu0 %233 }
 0x3ea   :  { %v238_v3 = vmul.f32 0.03125, %v234_v2 }
 0x3ec   :  { %v240_v4 = vadd.f32 1e-05, %v238_v3 }
 0x3ed   :  { %v237_v5 = vpop.xlane.xlu1 %236 }
 0x3ee   :  { %325 = vrsqrt.f32 %v240_v4  ;;  %v239_v6 = vmul.f32 0.03125, %v237_v5 }
 0x3f0   :  { %v241_v7 = vadd.f32 1e-05, %v239_v6 }
 0x3f2   :  { %327 = vrsqrt.f32 %v241_v7 }
 0x3fb   :  { %v326_v8 = vpop.eup %325 }
 0x3fc   :  { %v244_v10 = vmul.f32 %v326_v8, %v228_v58 }
 0x3fe   :  { %v253_v12 = vmul.f32 %v289_v9, %v244_v10 }
 0x3ff   :  { %v328_v13 = vpop.eup %327 }
 0x400   :  { %v262_v14 = vadd.f32 %v290_v11, %v253_v12  ;;  %v245_v15 = vmul.f32 %v328_v13, %v229_v62 }
 0x402   :  { %v293_v16 = vpack.c.bf16 %v262_v14, %v262_v14  ;;  %v254_v17 = vmul.f32 %v289_v9, %v245_v15 }
 0x404   :  { %273 = vst.msk [vmem:[%s435_s9] sm:$0xf] %vm272_vm3, %v293_v16  ;;  %v263_v18 = vadd.f32 %v290_v11, %v254_v17 }
 0x406   :  { %v294_v19 = vpack.c.bf16 %v263_v18, %v263_v18 }
 0x408   :  { %274 = vst.msk [vmem:[%s435_s9 + $0x4] sm:$0xf] %vm272_vm3, %v294_v19 }

// kernel: fmri_transformer_forward.15
= control target key start
LH: loop header
LB: loop body
LE: loop exit
PB: predicated region body
PF: predicated region fallthrough
CT: control target
= control target key end

     0   :  { %s1918_s0 = inlined_call_operand.vmem [shape: s32[2], index: 0, kind: input, shape index: {}]   ;;  %s1919_s1 = inlined_call_operand.vmem [shape: bf16[16,32], index: 1, kind: input, shape index: {}]   ;;  %s1920_s2 = inlined_call_operand.vmem [shape: bf16[32,32], index: 2, kind: input, shape index: {}]   ;;  %s1921_s3 = inlined_call_operand.vmem [shape: f32[1,32], index: 3, kind: input, shape index: {}]   ;;  %s1922_s4 = inlined_call_operand.vmem [shape: bf16[32,32], index: 4, kind: input, shape index: {}]   ;;  %s1923_s5 = inlined_call_operand.vmem [shape: f32[1,32], index: 5, kind: input, shape index: {}]   ;;  %s1924_s6 = inlined_call_operand.vmem [shape: bf16[32,32], index: 6, kind: input, shape index: {}]   ;;  %s1925_s7 = inlined_call_operand.vmem [shape: f32[1,32], index: 7, kind: input, shape index: {}]   ;;  %s1926_s8 = inlined_call_operand.vmem [shape: bf16[32,32], index: 8, kind: input, shape index: {}]   ;;  %s1927_s9 = inlined_call_operand.vmem [shape: f32[1,32], index: 9, kind: input, shape index: {}]   ;;  %s1928_s10 = inlined_call_operand.vmem [shape: f32[1,32], index: 10, kind: input, shape index: {}]   ;;  %s1929_s11 = inlined_call_operand.vmem [shape: f32[1,32], index: 11, kind: input, shape index: {}]   ;;  %s1930_s12 = inlined_call_operand.vmem [shape: bf16[16,32], index: 12, kind: output, shape index: {}]  }
   0x1   :  { %s17_s23 = sshll.u32 %s1918_s0, 4  ;;  %s18_s23 = int_to_ptr.vmem [resolvable:$true] %s17_s23 }
   0x2   :  { %s1577_s24 = scalar_lea.vmem %s18_s23, 16  ;;  %p1582_p1 = scmp.lt.s32.totalorder %s18_s23, %s18_s23 }
   0x3   :  { %p1578_p0 = scmp.ne.s32.totalorder %s18_s23, %s1577_s24  ;;  %p1583_p2 = scmp.lt.s32.totalorder %s1577_s24, %s1577_s24 }
   0x5   :  { %p1584_p3 = por %p1583_p2, %p1582_p1 }
   0x7   :  { %p1585_p4 = pnand %p1584_p3, %p1578_p0 }
   0x9   :  { %1588 = shalt.err (!%p1585_p4)  }
   0xa   :  { %s1591_s25 = smov [#allocation4]  }
   0xb   :  { %20 = dma.vmem_to_smem %s18_s23, 16, %s1591_s25, [#allocation3] }
   0xc   :  { %1589 = dma.done.wait [#allocation3], 16 }
   0xd   :  { %1590 = vsyncadd [#allocation3], 4294967280 }
   0xe   :  { %22 = sfence }
   0xf   :  { %v1531_v0 = vld [vmem:[%s1922_s4 + $0x8] sm:$0xff]   ;;  %v1592_v1 = vmov 0.0   ;;  %v1533_v3 = vld [vmem:[%s1922_s4] sm:$0xff]   ;;  %vm1593_vm0 = vmmov 0   ;;  %vm78_vm1 = vcmask 261120   ;;  %vm261_vm2 = vcmask 64512  }
  0x10   :  { %1401 = vmatprep.subr.bf16.mxu1 %v1592_v1  ;;  %1393 = vmatprep.subr.bf16.mxu0 %v1592_v1  ;;  %v1532_v2 = vld [vmem:[%s1920_s2 + $0x8] sm:$0xff]   ;;  %v1534_v4 = vld [vmem:[%s1920_s2] sm:$0xff]   ;;  %s1594_s18 = smov 112   ;;  %v254_v46 = vlaneseq  ;;  %v1597_v49 = vmov -1e+30   ;;  %s1330_s23 = sld [smem:[#allocation4 + $0x1]] }
  0x11   :  { %1402 = vmatpush3.bf16.msra.mxu1 %v1531_v0  ;;  %1405 = vmatprep.mubr.msk.bf16.mxu1 %vm1593_vm0, %v1592_v1  ;;  %v1690_v5 = vld [vmem:[%s1919_s1] sm:$0xff]   ;;  %v1536_v25 = vld [vmem:[%s1924_s6 + $0x8] sm:$0xff]   ;;  %vm323_vm5 = vcmask 1043456   ;;  %s1599_s26 = smov 16   ;;  %s1600_s27 = smov 24   ;;  %vm485_vm6 = vcmask 130112  }
  0x12   :  { %1394 = vmatpush3.bf16.msra.mxu0 %v1532_v2  ;;  %1403 = vmatprep.subr.bf16.mxu1 %v1592_v1  ;;  %v1314_v8 = vld [vmem:[%s1923_s5] ss:$0 sm:$0xff]  ;;  %s1595_s5 = smov 120   ;;  %v255_v47 = vand.u32 127, %v254_v46  ;;  %vm601_vm7 = vcmask 195712   ;;  %vm717_vm8 = vcmask 261312  }
  0x13   :  { %1395 = vmatprep.subr.bf16.mxu0 %v1592_v1  ;;  %1397 = vmatprep.mubr.msk.bf16.mxu0 %vm1593_vm0, %v1592_v1  ;;  %v1309_v10 = vld [vmem:[%s1921_s3] ss:$0 sm:$0xff]  ;;  %s1596_s3 = smov 104   ;;  %vm1302_vm9 = vcmask 257024  }
  0x14   :  { %v1537_v26 = vld [vmem:[%s1924_s6] sm:$0xff]   ;;  %s257_s6 = sld [smem:[#allocation4]] }
  0x15   :  { %1404 = vmatpush3.bf16.msra.mxu1 %v1533_v3 }
  0x16   :  { %1396 = vmatpush3.bf16.msra.mxu0 %v1534_v4  ;;  %1417 = vmatprep.subr.bf16.mxu1 %v1592_v1 }
  0x17   :  { %1409 = vmatprep.subr.bf16.mxu0 %v1592_v1 }
  0x18   :  { %1406 = vmatmul.mubr.msk.bf16.vlgmr.msra.gmra.mxu1 %vm78_vm1, %v1690_v5 }
  0x19   :  { %1398 = vmatmul.mubr.msk.bf16.vlgmr.msra.gmra.mxu0 %vm78_vm1, %v1690_v5  ;;  %1419 = vmatprep.mubr.msk.bf16.mxu1 %vm1593_vm0, %v1592_v1 }
  0x1a   :  { %1413 = vmatprep.mubr.msk.bf16.mxu0 %vm1593_vm0, %v1592_v1  ;;  %1410 = vmatpush3.bf16.msra.mxu0 %v1536_v25  ;;  %v258_v48 = vstv %s257_s6 }
  0x1b   :  { %1411 = vmatprep.subr.bf16.mxu0 %v1592_v1  ;;  %vm259_vm3 = vcmp.lt.s32.totalorder %v255_v47, %v258_v48 }
  0x1c   :  { %v260_v50 = vsel %vm259_vm3, 0.0, %v1597_v49 }
  0x1e   :  { %1412 = vmatpush3.bf16.msra.mxu0 %v1537_v26 }
  0x1f   :  { %1423 = vmatprep.subr.bf16.mxu0 %v1592_v1 }
  0x21   :  { %1414 = vmatmul.mubr.msk.bf16.vlgmr.msra.gmra.mxu0 %vm78_vm1, %v1690_v5 }
  0x22   :  { %1425 = vmatprep.mubr.msk.bf16.mxu0 %vm1593_vm0, %v1592_v1 }
  0xd8   :  { %v180_v6 = vpop.f32.mrf.mxu1 }
  0xd9   :  { %v116_v7 = vpop.f32.mrf.mxu0  ;;  %v181_v13 = vadd.f32 %v1314_v8, %v180_v6 }
  0xda   :  { %v1407_v9 = vpop.f32.mrf.mxu1  ;;  %v117_v14 = vadd.f32 %v1309_v10, %v116_v7 }
  0xdb   :  { %v1399_v11 = vpop.f32.mrf.mxu0 }
  0xdc   :  { %v183_v12 = vpop.f32.mrf.mxu1 }
  0xdd   :  { %v184_v15 = vadd.f32 %v1314_v8, %v183_v12  ;;  %v119_v16 = vpop.f32.mrf.mxu0  ;;  %v721_v8 = vstv %s1330_s23 }
  0xde   :  { %v1408_v17 = vpop.f32.mrf.mxu1  ;;  %v120_v18 = vadd.f32 %v1309_v10, %v119_v16  ;;  %vm722_vm4 = vcmp.lt.s32.totalorder %v255_v47, %v721_v8 }
  0xdf   :  { %v252_v19 = vpack.c.bf16 %v184_v15, %v181_v13  ;;  %v1400_v20 = vpop.f32.mrf.mxu0 }
  0xe0   :  { %v251_v21 = vpack.c.bf16 %v120_v18, %v117_v14  ;;  %v723_v14 = vsel %vm722_vm4, 0.0, %v1597_v49 }
  0xe1   :  { %489 = vrot.lane.b32.xlu1 %v252_v19, %s1594_s18  ;;  %372 = vrot.lane.b32.xlu0 %v252_v19, %s1595_s5  ;;  %v266_v22 = vsel %vm261_vm2, %v252_v19, 0  ;;  %v725_v23 = vrot.slane %v252_v19, 4 }
  0xe2   :  { %1418 = vmatpush3.bf16.xpose.msra.mxu1 %v266_v22  ;;  %v724_v24 = vrot.slane %v251_v21, 4 }
  0xe3   :  { %1429 = vmatprep.subr.bf16.mxu1 %v1592_v1  ;;  %v730_v36 = vsel %vm261_vm2, %v725_v23, 0 }
  0xe5   :  { %487 = vrot.lane.b32.xlu1 %v251_v21, %s1594_s18  ;;  %369 = vrot.lane.b32.xlu0 %v251_v21, %s1595_s5 }
  0xe9   :  { %603 = vrot.lane.b32.xlu1 %v251_v21, %s1596_s3  ;;  %605 = vrot.lane.b32.xlu0 %v252_v19, %s1596_s3 }
  0xea   :  { %1420 = vmatmul.mubr.msk.bf16.vlgmr.msra.gmra.mxu1 %vm261_vm2, %v251_v21 }
  0xeb   :  { %1431 = vmatprep.mubr.msk.bf16.mxu1 %vm1593_vm0, %v1592_v1 }
  0xed   :  { %834 = vrot.lane.b32.xlu0 %v725_v23, %s1595_s5  ;;  %832 = vrot.lane.b32.xlu1 %v724_v24, %s1595_s5 }
  0xf1   :  { %949 = vrot.lane.b32.xlu0 %v725_v23, %s1594_s18  ;;  %947 = vrot.lane.b32.xlu1 %v724_v24, %s1594_s18 }
  0xf5   :  { %1064 = vrot.lane.b32.xlu0 %v725_v23, %s1596_s3  ;;  %1062 = vrot.lane.b32.xlu1 %v724_v24, %s1596_s3 }
 0x153   :  { %v373_v27 = vpop.permute.xlu0 %372  ;;  %v490_v29 = vpop.permute.xlu1 %489 }
 0x154   :  { %v378_v28 = vsel %vm261_vm2, %v373_v27, 0  ;;  %v495_v31 = vsel %vm261_vm2, %v490_v29, 0 }
 0x155   :  { %1430 = vmatpush3.bf16.xpose.msra.mxu1 %v378_v28 }
 0x156   :  { %1441 = vmatprep.subr.bf16.mxu1 %v1592_v1 }
 0x157   :  { %v370_v30 = vpop.permute.xlu0 %369  ;;  %v488_v33 = vpop.permute.xlu1 %487 }
 0x15b   :  { %v606_v32 = vpop.permute.xlu0 %605  ;;  %v604_v35 = vpop.permute.xlu1 %603 }
 0x15c   :  { %1432 = vmatmul.mubr.msk.bf16.vlgmr.msra.gmra.mxu1 %vm261_vm2, %v370_v30  ;;  %v611_v34 = vsel %vm261_vm2, %v606_v32, 0 }
 0x15d   :  { %1442 = vmatpush3.bf16.xpose.msra.mxu1 %v495_v31  ;;  %1443 = vmatprep.mubr.msk.bf16.mxu1 %vm1593_vm0, %v1592_v1 }
 0x15e   :  { %1453 = vmatprep.subr.bf16.mxu1 %v1592_v1 }
 0x15f   :  { %v835_v37 = vpop.permute.xlu0 %834  ;;  %v833_v40 = vpop.permute.xlu1 %832 }
 0x160   :  { %v840_v38 = vsel %vm261_vm2, %v835_v37, 0 }
 0x163   :  { %v950_v39 = vpop.permute.xlu0 %949  ;;  %v948_v43 = vpop.permute.xlu1 %947 }
 0x164   :  { %1444 = vmatmul.mubr.msk.bf16.vlgmr.msra.gmra.mxu1 %vm261_vm2, %v488_v33  ;;  %v955_v41 = vsel %vm261_vm2, %v950_v39, 0  ;;  %v244_v33 = vpop.f32.mrf.mxu0 }
 0x165   :  { %1454 = vmatpush3.bf16.xpose.msra.mxu1 %v611_v34  ;;  %1455 = vmatprep.mubr.msk.bf16.mxu1 %vm1593_vm0, %v1592_v1 }
 0x166   :  { %1465 = vmatprep.subr.bf16.mxu1 %v1592_v1 }
 0x167   :  { %v1065_v42 = vpop.permute.xlu0 %1064  ;;  %v1063_v45 = vpop.permute.xlu1 %1062 }
 0x168   :  { %v1070_v44 = vsel %vm261_vm2, %v1065_v42, 0 }
 0x16c   :  { %1456 = vmatmul.mubr.msk.bf16.vlgmr.msra.gmra.mxu1 %vm261_vm2, %v604_v35 }
 0x16d   :  { %1466 = vmatpush3.bf16.xpose.msra.mxu1 %v730_v36  ;;  %1467 = vmatprep.mubr.msk.bf16.mxu1 %vm1593_vm0, %v1592_v1  ;;  %v1415_v36 = vpop.f32.mrf.mxu0 }
 0x16e   :  { %1477 = vmatprep.subr.bf16.mxu1 %v1592_v1 }
 0x174   :  { %1468 = vmatmul.mubr.msk.bf16.vlgmr.msra.gmra.mxu1 %vm261_vm2, %v724_v24 }
 0x175   :  { %1478 = vmatpush3.bf16.xpose.msra.mxu1 %v840_v38  ;;  %1479 = vmatprep.mubr.msk.bf16.mxu1 %vm1593_vm0, %v1592_v1  ;;  %v1318_v38 = vld [vmem:[%s1925_s7] ss:$0 sm:$0xff]  ;;  %s1598_s7 = smov 8  }
 0x176   :  { %1489 = vmatprep.subr.bf16.mxu1 %v1592_v1  ;;  %v245_v42 = vadd.f32 %v1318_v38, %v244_v33 }
 0x17c   :  { %1480 = vmatmul.mubr.msk.bf16.vlgmr.msra.gmra.mxu1 %vm261_vm2, %v833_v40 }
 0x17d   :  { %1490 = vmatpush3.bf16.xpose.msra.mxu1 %v955_v41  ;;  %1491 = vmatprep.mubr.msk.bf16.mxu1 %vm1593_vm0, %v1592_v1 }
 0x17e   :  { %1501 = vmatprep.subr.bf16.mxu1 %v1592_v1 }
 0x184   :  { %1492 = vmatmul.mubr.msk.bf16.vlgmr.msra.gmra.mxu1 %vm261_vm2, %v948_v43  ;;  %v247_v43 = vpop.f32.mrf.mxu0 }
 0x185   :  { %1502 = vmatpush3.bf16.xpose.msra.mxu1 %v1070_v44  ;;  %1503 = vmatprep.mubr.msk.bf16.mxu1 %vm1593_vm0, %v1592_v1  ;;  %v248_v46 = vadd.f32 %v1318_v38, %v247_v43 }
 0x186   :  { %1513 = vmatprep.subr.bf16.mxu1 %v1592_v1  ;;  %v1416_v47 = vpop.f32.mrf.mxu0 }
 0x18c   :  { %1504 = vmatmul.mubr.msk.bf16.vlgmr.msra.gmra.mxu1 %vm261_vm2, %v1063_v45 }
 0x18d   :  { %1517 = vmatprep.mubr.msk.bf16.mxu1 %vm1593_vm0, %v1592_v1 }
 0x1aa   :  { %v302_v51 = vpop.f32.mrf.mxu1 }
 0x1ab   :  { %v303_v52 = vadd.f32 %v302_v51, %v260_v50 }
 0x1ac   :  { %v1421_v53 = vpop.f32.mrf.mxu1 }
 0x1ad   :  { %v308_v54 = vsel %vm261_vm2, %v303_v52, -inf }
 0x1ae   :  { %309 = vmax.xlane.f32.xlu0 %v308_v54  ;;  %v305_v55 = vpop.f32.mrf.mxu1 }
 0x1b0   :  { %v1422_v56 = vpop.f32.mrf.mxu1 }
 0x21c   :  { %v414_v57 = vpop.f32.mrf.mxu1 }
 0x21d   :  { %v1775_v58 = vadd.f32 %v414_v57, %v260_v50 }
 0x21e   :  { %v1433_v59 = vpop.f32.mrf.mxu1 }
 0x21f   :  { %v420_v60 = vsel %vm261_vm2, %v1775_v58, -inf }
 0x220   :  { %421 = vmax.xlane.f32.xlu1 %v420_v60  ;;  %v417_v61 = vpop.f32.mrf.mxu1 }
 0x222   :  { %v1434_v62 = vpop.f32.mrf.mxu1 }
 0x224   :  { %v531_v63 = vpop.f32.mrf.mxu1 }
 0x225   :  { %v1779_v0 = vadd.f32 %v531_v63, %v260_v50 }
 0x226   :  { %v1445_v2 = vpop.f32.mrf.mxu1 }
 0x227   :  { %v537_v3 = vsel %vm261_vm2, %v1779_v0, -inf }
 0x228   :  { %538 = vmax.xlane.f32.xlu0 %v537_v3  ;;  %v534_v4 = vpop.f32.mrf.mxu1 }
 0x22a   :  { %v1446_v6 = vpop.f32.mrf.mxu1 }
 0x22c   :  { %v647_v7 = vpop.f32.mrf.mxu1 }
 0x22d   :  { %v1783_v9 = vadd.f32 %v647_v7, %v260_v50  ;;  %v1804_v50 = vpack.c.bf16 %v248_v46, %v245_v42 }
 0x22e   :  { %v1457_v10 = vpop.f32.mrf.mxu1 }
 0x22f   :  { %v653_v11 = vsel %vm261_vm2, %v1783_v9, -inf }
 0x230   :  { %654 = vmax.xlane.f32.xlu0 %v653_v11  ;;  %v650_v12 = vpop.f32.mrf.mxu1 }
 0x232   :  { %v1458_v13 = vpop.f32.mrf.mxu1 }
 0x234   :  { %v766_v15 = vpop.f32.mrf.mxu1 }
 0x235   :  { %v1787_v16 = vadd.f32 %v766_v15, %v723_v14 }
 0x236   :  { %v1469_v17 = vpop.f32.mrf.mxu1 }
 0x237   :  { %v310_v18 = vpop.xlane.xlu0 %309  ;;  %v772_v19 = vsel %vm261_vm2, %v1787_v16, -inf }
 0x238   :  { %v311_v20 = vsub.f32 %v303_v52, %v310_v18  ;;  %773 = vmax.xlane.f32.xlu1 %v772_v19  ;;  %v769_v21 = vpop.f32.mrf.mxu1  ;;  %v325_v52 = vsel %vm323_vm5, %v1804_v50, 0 }
 0x239   :  { %1424 = vmatpush3.bf16.msra.mxu0 %v325_v52 }
 0x23a   :  { %v312_v22 = vmul.f32 1.442695, %v311_v20  ;;  %v1470_v23 = vpop.f32.mrf.mxu1  ;;  %1435 = vmatprep.subr.bf16.mxu0 %v1592_v1 }
 0x23c   :  { %1541 = vpow2.f32 %v312_v22  ;;  %v876_v24 = vpop.f32.mrf.mxu1 }
 0x23d   :  { %v1791_v25 = vadd.f32 %v876_v24, %v723_v14 }
 0x23e   :  { %v1481_v26 = vpop.f32.mrf.mxu1 }
 0x23f   :  { %v882_v27 = vsel %vm261_vm2, %v1791_v25, -inf }
 0x240   :  { %883 = vmax.xlane.f32.xlu0 %v882_v27  ;;  %v879_v28 = vpop.f32.mrf.mxu1 }
 0x242   :  { %v1482_v29 = vpop.f32.mrf.mxu1 }
 0x244   :  { %v991_v30 = vpop.f32.mrf.mxu1 }
 0x245   :  { %v1795_v31 = vadd.f32 %v991_v30, %v723_v14  ;;  %v784_v30 = vrot.slane %v1804_v50, 4 }
 0x246   :  { %v1493_v32 = vpop.f32.mrf.mxu1 }
 0x247   :  { %v997_v34 = vsel %vm261_vm2, %v1795_v31, -inf }
 0x248   :  { %998 = vmax.xlane.f32.xlu1 %v997_v34  ;;  %v994_v35 = vpop.f32.mrf.mxu1 }
 0x249   :  { %v1542_v37 = vpop.eup %1541 }
 0x24a   :  { %v1494_v39 = vpop.f32.mrf.mxu1  ;;  %v314_v40 = vsel %vm261_vm2, %v1542_v37, 0.0 }
 0x24c   :  { %315 = vadd.xlane.f32.xlu1 %v314_v40  ;;  %v1106_v41 = vpop.f32.mrf.mxu1 }
 0x24d   :  { %v1107_v44 = vadd.f32 %v1106_v41, %v723_v14 }
 0x24e   :  { %v1505_v45 = vpop.f32.mrf.mxu1 }
 0x24f   :  { %v1112_v48 = vsel %vm261_vm2, %v1107_v44, -inf }
 0x250   :  { %1113 = vmax.xlane.f32.xlu0 %v1112_v48  ;;  %v1109_v49 = vpop.f32.mrf.mxu1 }
 0x251   :  { %v789_v49 = vsel %vm323_vm5, %v784_v30, 0 }
 0x252   :  { %v1506_v51 = vpop.f32.mrf.mxu1 }
 0x2a9   :  { %v422_v53 = vpop.xlane.xlu1 %421 }
 0x2aa   :  { %v423_v54 = vsub.f32 %v1775_v58, %v422_v53 }
 0x2ac   :  { %v424_v55 = vmul.f32 1.442695, %v423_v54 }
 0x2ae   :  { %1543 = vpow2.f32 %v424_v55 }
 0x2b1   :  { %v539_v56 = vpop.xlane.xlu0 %538 }
 0x2b2   :  { %v540_v57 = vsub.f32 %v1779_v0, %v539_v56 }
 0x2b4   :  { %v541_v59 = vmul.f32 1.442695, %v540_v57 }
 0x2b6   :  { %1545 = vpow2.f32 %v541_v59 }
 0x2b9   :  { %v655_v60 = vpop.xlane.xlu0 %654 }
 0x2ba   :  { %v656_v61 = vsub.f32 %v1783_v9, %v655_v60 }
 0x2bb   :  { %v1544_v62 = vpop.eup %1543 }
 0x2bc   :  { %v657_v63 = vmul.f32 1.442695, %v656_v61  ;;  %v426_v2 = vsel %vm261_vm2, %v1544_v62, 0.0 }
 0x2bd   :  { %427 = vadd.xlane.f32.xlu0 %v426_v2 }
 0x2be   :  { %1547 = vpow2.f32 %v657_v63 }
 0x2c1   :  { %v774_v6 = vpop.xlane.xlu1 %773 }
 0x2c2   :  { %v775_v10 = vsub.f32 %v1787_v16, %v774_v6 }
 0x2c3   :  { %v1813_v3 = vpop.eup %1545 }
 0x2c4   :  { %v543_v58 = vsel %vm261_vm2, %v1813_v3, 0.0  ;;  %v776_v15 = vmul.f32 1.442695, %v775_v10 }
 0x2c5   :  { %544 = vadd.xlane.f32.xlu1 %v543_v58 }
 0x2c9   :  { %v884_v11 = vpop.xlane.xlu0 %883 }
 0x2ca   :  { %v885_v14 = vsub.f32 %v1791_v25, %v884_v11 }
 0x2cb   :  { %v1817_v4 = vpop.eup %1547 }
 0x2cc   :  { %v659_v0 = vsel %vm261_vm2, %v1817_v4, 0.0  ;;  %v886_v19 = vmul.f32 1.442695, %v885_v14 }
 0x2cd   :  { %660 = vadd.xlane.f32.xlu0 %v659_v0 }
 0x2d1   :  { %v999_v7 = vpop.xlane.xlu1 %998 }
 0x2d2   :  { %v1000_v17 = vsub.f32 %v1795_v31, %v999_v7 }
 0x2d4   :  { %v1001_v20 = vmul.f32 1.442695, %v1000_v17 }
 0x2d5   :  { %v316_v8 = vpop.xlane.xlu1 %315 }
 0x2d6   :  { %549 = vrot.lane.b32.xlu1 %v1804_v50, %s1594_s18  ;;  %1549 = vrcp.f32 %v316_v8 }
 0x2d7   :  { %1551 = vpow2.f32 %v776_v15 }
 0x2d8   :  { %1553 = vpow2.f32 %v886_v19 }
 0x2d9   :  { %v1114_v18 = vpop.xlane.xlu0 %1113  ;;  %1555 = vpow2.f32 %v1001_v20 }
 0x2da   :  { %665 = vrot.lane.b32.xlu1 %v1804_v50, %s1596_s3  ;;  %v1115_v21 = vsub.f32 %v1107_v44, %v1114_v18 }
 0x2dc   :  { %v1116_v16 = vmul.f32 1.442695, %v1115_v21 }
 0x2de   :  { %1557 = vpow2.f32 %v1116_v16 }
 0x2e3   :  { %433 = vrot.lane.b32.xlu0 %v1804_v50, %s1595_s5  ;;  %v1550_v9 = vpop.eup %1549 }
 0x2e4   :  { %v318_v12 = vmul.f32 %v1550_v9, %v1542_v37  ;;  %v1552_v22 = vpop.eup %1551 }
 0x2e5   :  { %v1833_v23 = vpop.eup %1553  ;;  %v778_v24 = vsel %vm261_vm2, %v1552_v22, 0.0 }
 0x2e6   :  { %v319_v13 = vpack.c.bf16 %v318_v12, %v318_v12  ;;  %v1836_v25 = vpop.eup %1555  ;;  %v888_v26 = vsel %vm261_vm2, %v1833_v23, 0.0 }
 0x2e7   :  { %v1003_v27 = vsel %vm261_vm2, %v1836_v25, 0.0 }
 0x2e8   :  { %1426 = vmatmul.mubr.msk.bf16.vlgmr.msra.gmra.mxu0 %vm261_vm2, %v319_v13 }
 0x2e9   :  { %1437 = vmatprep.mubr.msk.bf16.mxu0 %vm1593_vm0, %v1592_v1 }
 0x2eb   :  { %v1842_v28 = vpop.eup %1557 }
 0x2ec   :  { %v1118_v29 = vsel %vm261_vm2, %v1842_v28, 0.0 }
 0x2fe   :  { %779 = vadd.xlane.f32.xlu1 %v778_v24 }
 0x302   :  { %889 = vadd.xlane.f32.xlu1 %v888_v26  ;;  %1004 = vadd.xlane.f32.xlu0 %v1003_v27 }
 0x306   :  { %1119 = vadd.xlane.f32.xlu1 %v1118_v29 }
 0x317   :  { %1009 = vrot.lane.b32.xlu1 %v784_v30, %s1594_s18 }
 0x318   :  { %894 = vrot.lane.b32.xlu0 %v784_v30, %s1595_s5 }
 0x31c   :  { %1124 = vrot.lane.b32.xlu0 %v784_v30, %s1596_s3 }
 0x346   :  { %v428_v31 = vpop.xlane.xlu0 %427 }
 0x347   :  { %1559 = vrcp.f32 %v428_v31 }
 0x34e   :  { %v545_v32 = vpop.xlane.xlu1 %544 }
 0x34f   :  { %1561 = vrcp.f32 %v545_v32 }
 0x352   :  { %v550_v38 = vpop.permute.xlu1 %549 }
 0x353   :  { %v555_v41 = vsel %vm323_vm5, %v550_v38, 0 }
 0x354   :  { %v1560_v33 = vpop.eup %1559 }
 0x355   :  { %v430_v35 = vmul.f32 %v1560_v33, %v1544_v62  ;;  %v1538_v33 = vld [vmem:[%s1926_s8 + $0x8] sm:$0xff]  }
 0x356   :  { %v661_v34 = vpop.xlane.xlu0 %660  ;;  %v666_v43 = vpop.permute.xlu1 %665  ;;  %1514 = vmatpush3.bf16.msra.mxu1 %v1538_v33 }
 0x357   :  { %1563 = vrcp.f32 %v661_v34  ;;  %v431_v39 = vpack.c.bf16 %v430_v35, %v430_v35  ;;  %v671_v46 = vsel %vm323_vm5, %v666_v43, 0  ;;  %v1539_v35 = vld [vmem:[%s1926_s8] sm:$0xff]   ;;  %1515 = vmatprep.subr.bf16.mxu1 %v1592_v1 }
 0x35a   :  { %v434_v36 = vpop.permute.xlu0 %433  ;;  %1516 = vmatpush3.bf16.msra.mxu1 %v1539_v35 }
 0x35b   :  { %v439_v37 = vsel %vm323_vm5, %v434_v36, 0 }
 0x35c   :  { %1436 = vmatpush3.bf16.msra.mxu0 %v439_v37  ;;  %v1562_v40 = vpop.eup %1561 }
 0x35d   :  { %1447 = vmatprep.subr.bf16.mxu0 %v1592_v1  ;;  %v547_v42 = vmul.f32 %v1562_v40, %v1813_v3 }
 0x35f   :  { %1438 = vmatmul.mubr.msk.bf16.vlgmr.msra.gmra.mxu0 %vm261_vm2, %v431_v39  ;;  %v548_v44 = vpack.c.bf16 %v547_v42, %v547_v42 }
 0x360   :  { %1448 = vmatpush3.bf16.msra.mxu0 %v555_v41  ;;  %1449 = vmatprep.mubr.msk.bf16.mxu0 %vm1593_vm0, %v1592_v1 }
 0x361   :  { %1459 = vmatprep.subr.bf16.mxu0 %v1592_v1 }
 0x364   :  { %v1564_v45 = vpop.eup %1563 }
 0x365   :  { %v663_v47 = vmul.f32 %v1564_v45, %v1817_v4 }
 0x367   :  { %1450 = vmatmul.mubr.msk.bf16.vlgmr.msra.gmra.mxu0 %vm261_vm2, %v548_v44  ;;  %v664_v48 = vpack.c.bf16 %v663_v47, %v663_v47 }
 0x368   :  { %1460 = vmatpush3.bf16.msra.mxu0 %v671_v46  ;;  %1461 = vmatprep.mubr.msk.bf16.mxu0 %vm1593_vm0, %v1592_v1 }
 0x369   :  { %1471 = vmatprep.subr.bf16.mxu0 %v1592_v1 }
 0x36f   :  { %1462 = vmatmul.mubr.msk.bf16.vlgmr.msra.gmra.mxu0 %vm261_vm2, %v664_v48 }
 0x370   :  { %1472 = vmatpush3.bf16.msra.mxu0 %v789_v49  ;;  %1473 = vmatprep.mubr.msk.bf16.mxu0 %vm1593_vm0, %v1592_v1 }
 0x371   :  { %1483 = vmatprep.subr.bf16.mxu0 %v1592_v1 }
 0x387   :  { %v780_v50 = vpop.xlane.xlu1 %779 }
 0x388   :  { %1565 = vrcp.f32 %v780_v50 }
 0x38b   :  { %v890_v51 = vpop.xlane.xlu1 %889  ;;  %v1005_v52 = vpop.xlane.xlu0 %1004 }
 0x38c   :  { %1567 = vrcp.f32 %v890_v51 }
 0x38d   :  { %1569 = vrcp.f32 %v1005_v52  ;;  %v1339_v52 = vld [vmem:[%s1927_s9] ss:$0 sm:$0xff] }
 0x38f   :  { %v895_v55 = vpop.permute.xlu0 %894  ;;  %v1120_v59 = vpop.xlane.xlu1 %1119 }
 0x390   :  { %v900_v60 = vsel %vm323_vm5, %v895_v55, 0  ;;  %1571 = vrcp.f32 %v1120_v59  ;;  %v49_v59 = vunpack.c.h.bf16 %v1690_v5 }
 0x393   :  { %v1010_v62 = vpop.permute.xlu1 %1009  ;;  %v1125_v4 = vpop.permute.xlu0 %1124 }
 0x394   :  { %v1015_v3 = vsel %vm323_vm5, %v1010_v62, 0  ;;  %v1130_v8 = vsel %vm323_vm5, %v1125_v4, 0 }
 0x395   :  { %v1566_v53 = vpop.eup %1565 }
 0x396   :  { %v782_v54 = vmul.f32 %v1566_v53, %v1552_v22  ;;  %v48_v53 = vunpack.c.l.bf16 %v1690_v5 }
 0x398   :  { %v783_v56 = vpack.c.bf16 %v782_v54, %v782_v54 }
 0x399   :  { %v1568_v57 = vpop.eup %1567 }
 0x39a   :  { %1474 = vmatmul.mubr.msk.bf16.vlgmr.msra.gmra.mxu0 %vm261_vm2, %v783_v56  ;;  %v892_v61 = vmul.f32 %v1568_v57, %v1833_v23  ;;  %v1570_v2 = vpop.eup %1569 }
 0x39b   :  { %1484 = vmatpush3.bf16.msra.mxu0 %v900_v60  ;;  %1485 = vmatprep.mubr.msk.bf16.mxu0 %vm1593_vm0, %v1592_v1  ;;  %v1007_v58 = vmul.f32 %v1570_v2, %v1836_v25 }
 0x39c   :  { %1495 = vmatprep.subr.bf16.mxu0 %v1592_v1  ;;  %v893_v63 = vpack.c.bf16 %v892_v61, %v892_v61 }
 0x39d   :  { %v1008_v0 = vpack.c.bf16 %v1007_v58, %v1007_v58  ;;  %v1572_v6 = vpop.eup %1571 }
 0x39e   :  { %v1122_v10 = vmul.f32 %v1572_v6, %v1842_v28 }
 0x3a0   :  { %v1123_v13 = vpack.c.bf16 %v1122_v10, %v1122_v10 }
 0x3a2   :  { %1486 = vmatmul.mubr.msk.bf16.vlgmr.msra.gmra.mxu0 %vm261_vm2, %v893_v63 }
 0x3a3   :  { %1496 = vmatpush3.bf16.msra.mxu0 %v1015_v3  ;;  %1497 = vmatprep.mubr.msk.bf16.mxu0 %vm1593_vm0, %v1592_v1 }
 0x3a4   :  { %1507 = vmatprep.subr.bf16.mxu0 %v1592_v1 }
 0x3a8   :  { %v361_v7 = vpop.f32.mrf.mxu0 }
 0x3a9   :  { %367 = vst.msk [vmem:[#allocation2] sm:$0xff] %vm261_vm2, %v361_v7 }
 0x3aa   :  { %1498 = vmatmul.mubr.msk.bf16.vlgmr.msra.gmra.mxu0 %vm261_vm2, %v1008_v0  ;;  %v1427_v9 = vpop.f32.mrf.mxu0 }
 0x3ab   :  { %1508 = vmatpush3.bf16.msra.mxu0 %v1130_v8  ;;  %1509 = vmatprep.mubr.msk.bf16.mxu0 %vm1593_vm0, %v1592_v1 }
 0x3ac   :  { %v364_v11 = vpop.f32.mrf.mxu0 }
 0x3ae   :  { %v1428_v12 = vpop.f32.mrf.mxu0 }
 0x3b2   :  { %1510 = vmatmul.mubr.msk.bf16.vlgmr.msra.gmra.mxu0 %vm261_vm2, %v1123_v13 }
 0x41f   :  { %v475_v14 = vpop.f32.mrf.mxu0 }
 0x420   :  { %482 = vrot.lane.b32.xlu0 %v475_v14, %s1598_s7 }
 0x421   :  { %v1439_v15 = vpop.f32.mrf.mxu0 }
 0x423   :  { %v478_v17 = vpop.f32.mrf.mxu0 }
 0x425   :  { %v1440_v18 = vpop.f32.mrf.mxu0 }
 0x427   :  { %v591_v19 = vpop.f32.mrf.mxu0 }
 0x428   :  { %598 = vrot.lane.b32.xlu0 %v591_v19, %s1599_s26 }
 0x429   :  { %v1451_v20 = vpop.f32.mrf.mxu0 }
 0x42a   :  { %v1343_v20 = vld [vmem:[%s1928_s10] ss:$0 sm:$0xff] }
 0x42b   :  { %v594_v21 = vpop.f32.mrf.mxu0 }
 0x42d   :  { %v1452_v16 = vpop.f32.mrf.mxu0 }
 0x42e   :  { %v1344_v16 = vld [vmem:[%s1929_s11] ss:$0 sm:$0xff] }
 0x42f   :  { %v707_v22 = vpop.f32.mrf.mxu0 }
 0x430   :  { %714 = vrot.lane.b32.xlu0 %v707_v22, %s1600_s27 }
 0x431   :  { %v1463_v23 = vpop.f32.mrf.mxu0 }
 0x433   :  { %v710_v24 = vpop.f32.mrf.mxu0 }
 0x435   :  { %v1464_v25 = vpop.f32.mrf.mxu0 }
 0x45a   :  { %v825_v26 = vpop.f32.mrf.mxu0 }
 0x45b   :  { %831 = vst.msk [vmem:[#allocation2 + $0x8] sm:$0xff] %vm261_vm2, %v825_v26 }
 0x45c   :  { %v1475_v27 = vpop.f32.mrf.mxu0 }
 0x45e   :  { %v828_v28 = vpop.f32.mrf.mxu0 }
 0x460   :  { %v1476_v29 = vpop.f32.mrf.mxu0 }
 0x462   :  { %v936_v30 = vpop.f32.mrf.mxu0 }
 0x463   :  { %943 = vrot.lane.b32.xlu1 %v936_v30, %s1598_s7 }
 0x464   :  { %v1487_v31 = vpop.f32.mrf.mxu0 }
 0x466   :  { %v939_v32 = vpop.f32.mrf.mxu0 }
 0x468   :  { %v1488_v34 = vpop.f32.mrf.mxu0 }
 0x46a   :  { %v1051_v36 = vpop.f32.mrf.mxu0 }
 0x46b   :  { %1058 = vrot.lane.b32.xlu1 %v1051_v36, %s1599_s26 }
 0x46c   :  { %v1499_v37 = vpop.f32.mrf.mxu0 }
 0x46e   :  { %v1054_v38 = vpop.f32.mrf.mxu0 }
 0x470   :  { %v1500_v39 = vpop.f32.mrf.mxu0 }
 0x472   :  { %v1166_v40 = vpop.f32.mrf.mxu0 }
 0x473   :  { %1173 = vrot.lane.b32.xlu1 %v1166_v40, %s1600_s27 }
 0x474   :  { %v1511_v41 = vpop.f32.mrf.mxu0 }
 0x476   :  { %v1169_v42 = vpop.f32.mrf.mxu0 }
 0x478   :  { %v1512_v43 = vpop.f32.mrf.mxu0 }
 0x492   :  { %v483_v44 = vpop.permute.xlu0 %482 }
 0x493   :  { %486 = vst.msk [vmem:[#allocation2] sm:$0xff] %vm485_vm6, %v483_v44 }
 0x49a   :  { %v599_v45 = vpop.permute.xlu0 %598 }
 0x49b   :  { %602 = vst.msk [vmem:[#allocation2] sm:$0xff] %vm601_vm7, %v599_v45 }
 0x4a2   :  { %v715_v46 = vpop.permute.xlu0 %714 }
 0x4a3   :  { %718 = vst.msk [vmem:[#allocation2] sm:$0xff] %vm717_vm8, %v715_v46 }
 0x4aa   :  { %v1177_v49 = vld [vmem:[#allocation2] sm:$0xff] }
 0x4d5   :  { %v944_v1 = vpop.permute.xlu1 %943 }
 0x4d6   :  { %946 = vst.msk [vmem:[#allocation2 + $0x8] sm:$0xff] %vm485_vm6, %v944_v1 }
 0x4dd   :  { %v1059_v47 = vpop.permute.xlu1 %1058 }
 0x4de   :  { %1061 = vst.msk [vmem:[#allocation2 + $0x8] sm:$0xff] %vm601_vm7, %v1059_v47 }
 0x4e5   :  { %v1174_v48 = vpop.permute.xlu1 %1173 }
 0x4e6   :  { %1176 = vst.msk [vmem:[#allocation2 + $0x8] sm:$0xff] %vm717_vm8, %v1174_v48 }
 0x4ed   :  { %v1178_v50 = vld [vmem:[#allocation2 + $0x8] sm:$0xff] }
 0x4ee   :  { %v1179_v51 = vpack.c.bf16 %v1178_v50, %v1177_v49 }
 0x4f0   :  { %1518 = vmatmul.mubr.msk.bf16.vlgmr.msra.gmra.mxu1 %vm78_vm1, %v1179_v51 }
 0x5b0   :  { %v1240_v54 = vpop.f32.mrf.mxu1 }
 0x5b1   :  { %v1241_v55 = vadd.f32 %v1339_v52, %v1240_v54 }
 0x5b2   :  { %v1519_v56 = vpop.f32.mrf.mxu1 }
 0x5b3   :  { %v1247_v57 = vadd.f32 %v1241_v55, %v48_v53 }
 0x5b4   :  { %v1243_v60 = vpop.f32.mrf.mxu1 }
 0x5b5   :  { %v1244_v61 = vadd.f32 %v1339_v52, %v1243_v60  ;;  %v1249_v62 = vsel %vm78_vm1, %v1247_v57, 0.0 }
 0x5b6   :  { %v1520_v63 = vpop.f32.mrf.mxu1  ;;  %1250 = vadd.xlane.f32.xlu0 %v1249_v62 }
 0x5b7   :  { %v1248_v2 = vadd.f32 %v1244_v61, %v49_v59 }
 0x5b9   :  { %v1252_v3 = vsel %vm78_vm1, %v1248_v2, 0.0 }
 0x5ba   :  { %1253 = vadd.xlane.f32.xlu1 %v1252_v3 }
 0x63f   :  { %v1251_v58 = vpop.xlane.xlu0 %1250 }
 0x640   :  { %v1256_v4 = vmul.f32 0.03125, %v1251_v58 }
 0x642   :  { %v1258_v0 = vsub.f32 %v1247_v57, %v1256_v4 }
 0x643   :  { %v1254_v6 = vpop.xlane.xlu1 %1253 }
 0x644   :  { %v1257_v7 = vmul.f32 0.03125, %v1254_v6  ;;  %v1260_v8 = vmul.f32 %v1258_v0, %v1258_v0 }
 0x646   :  { %v1259_v9 = vsub.f32 %v1248_v2, %v1257_v7  ;;  %v1262_v10 = vsel %vm78_vm1, %v1260_v8, 0.0 }
 0x647   :  { %1263 = vadd.xlane.f32.xlu0 %v1262_v10 }
 0x648   :  { %v1261_v5 = vmul.f32 %v1259_v9, %v1259_v9 }
 0x64a   :  { %v1265_v11 = vsel %vm78_vm1, %v1261_v5, 0.0 }
 0x64b   :  { %1266 = vadd.xlane.f32.xlu0 %v1265_v11 }
 0x6d0   :  { %v1264_v12 = vpop.xlane.xlu0 %1263 }
 0x6d1   :  { %v1268_v13 = vmul.f32 0.03125, %v1264_v12 }
 0x6d3   :  { %v1270_v14 = vadd.f32 1e-05, %v1268_v13 }
 0x6d4   :  { %v1267_v15 = vpop.xlane.xlu0 %1266 }
 0x6d5   :  { %1573 = vrsqrt.f32 %v1270_v14  ;;  %v1269_v17 = vmul.f32 0.03125, %v1267_v15 }
 0x6d7   :  { %v1271_v18 = vadd.f32 1e-05, %v1269_v17 }
 0x6d9   :  { %1575 = vrsqrt.f32 %v1271_v18 }
 0x6e2   :  { %v1574_v19 = vpop.eup %1573 }
 0x6e3   :  { %v1274_v21 = vmul.f32 %v1574_v19, %v1258_v0 }
 0x6e5   :  { %v1283_v22 = vmul.f32 %v1343_v20, %v1274_v21 }
 0x6e6   :  { %v1576_v23 = vpop.eup %1575 }
 0x6e7   :  { %v1292_v24 = vadd.f32 %v1344_v16, %v1283_v22  ;;  %v1275_v25 = vmul.f32 %v1576_v23, %v1259_v9 }
 0x6e9   :  { %v1347_v26 = vpack.c.bf16 %v1292_v24, %v1292_v24  ;;  %v1284_v27 = vmul.f32 %v1343_v20, %v1275_v25 }
 0x6eb   :  { %1303 = vst.msk [vmem:[%s1930_s12] sm:$0xf] %vm1302_vm9, %v1347_v26  ;;  %v1293_v28 = vadd.f32 %v1344_v16, %v1284_v27 }
 0x6ed   :  { %v1348_v29 = vpack.c.bf16 %v1293_v28, %v1293_v28 }
 0x6ef   :  { %1304 = vst.msk [vmem:[%s1930_s12 + $0x4] sm:$0xf] %vm1302_vm9, %v1348_v29 }

// kernel: fmri_transformer_forward.25
= control target key start
LH: loop header
LB: loop body
LE: loop exit
PB: predicated region body
PF: predicated region fallthrough
CT: control target
= control target key end

     0   :  { %vm26_vm0 = vcmask 261120   ;;  %s274_s0 = inlined_call_operand.vmem [shape: bf16[16,32], index: 0, kind: input, shape index: {}]   ;;  %s275_s1 = inlined_call_operand.vmem [shape: f32[1,32], index: 1, kind: input, shape index: {}]   ;;  %s276_s2 = inlined_call_operand.vmem [shape: f32[1,32], index: 2, kind: input, shape index: {}]   ;;  %s277_s3 = inlined_call_operand.vmem [shape: bf16[32,24], index: 3, kind: input, shape index: {}]   ;;  %s278_s4 = inlined_call_operand.vmem [shape: f32[1,24], index: 4, kind: input, shape index: {}]   ;;  %s279_s5 = inlined_call_operand.hbm [shape: f32[16,24], index: 5, kind: output, shape index: {}]  }
   0x1   :  { %v166_v0 = vld [vmem:[%s274_s0] sm:$0xff]  }
   0x2   :  { %v167_v1 = vunpack.c.l.bf16 %v166_v0  ;;  %v168_v2 = vunpack.c.h.bf16 %v166_v0 }
   0x3   :  { %10 = vsyncpa [#allocation3], 0  ;;  %v185_v15 = vld [vmem:[%s277_s3 + $0x8] sm:$0xff]   ;;  %v213_v16 = vmov 0.0   ;;  %vm214_vm1 = vmmov 0   ;;  %v186_v17 = vld [vmem:[%s277_s3] sm:$0xff]  }
   0x4   :  { %v27_v3 = vsel %vm26_vm0, %v167_v1, 0.0  ;;  %v30_v4 = vsel %vm26_vm0, %v168_v2, 0.0  ;;  %172 = vmatprep.subr.bf16.mxu0 %v213_v16  ;;  %176 = vmatprep.mubr.msk.bf16.mxu0 %vm214_vm1, %v213_v16  ;;  %v159_v26 = vld [vmem:[%s275_s1] ss:$0 sm:$0xff]  ;;  %vm140_vm2 = vcmask 195584   ;;  %s215_s1 = smov [#allocation2]  }
   0x5   :  { %28 = vadd.xlane.f32.xlu0 %v27_v3  ;;  %173 = vmatpush3.bf16.msra.mxu0 %v185_v15  ;;  %v160_v30 = vld [vmem:[%s276_s2] ss:$0 sm:$0xff]  ;;  %s148_s28 = sshll.u32 %s215_s1, 4  ;;  %s149_s28 = int_to_ptr.vmem [resolvable:$true] %s148_s28 }
   0x6   :  { %174 = vmatprep.subr.bf16.mxu0 %v213_v16  ;;  %v161_v35 = vld [vmem:[%s278_s4] ss:$0 sm:$0xff]  ;;  %s191_s2 = scalar_lea.vmem %s149_s28, 256  ;;  %p196_p1 = scmp.lt.s32.totalorder %s149_s28, %s149_s28 }
   0x7   :  { %p192_p0 = scmp.ne.s32.totalorder %s149_s28, %s191_s2  ;;  %p197_p2 = scmp.lt.s32.totalorder %s191_s2, %s191_s2 }
   0x9   :  { %31 = vadd.xlane.f32.xlu0 %v30_v4  ;;  %175 = vmatpush3.bf16.msra.mxu0 %v186_v17  ;;  %p198_p3 = por %p197_p2, %p196_p1 }
   0xb   :  { %p199_p4 = pnand %p198_p3, %p192_p0 }
  0x8e   :  { %v29_v5 = vpop.xlane.xlu0 %28 }
  0x8f   :  { %v34_v6 = vmul.f32 0.03125, %v29_v5 }
  0x91   :  { %v36_v7 = vsub.f32 %v167_v1, %v34_v6 }
  0x92   :  { %v32_v8 = vpop.xlane.xlu0 %31 }
  0x93   :  { %v35_v9 = vmul.f32 0.03125, %v32_v8  ;;  %v38_v10 = vmul.f32 %v36_v7, %v36_v7 }
  0x95   :  { %v37_v11 = vsub.f32 %v168_v2, %v35_v9  ;;  %v40_v12 = vsel %vm26_vm0, %v38_v10, 0.0 }
  0x96   :  { %41 = vadd.xlane.f32.xlu1 %v40_v12 }
  0x97   :  { %v39_v13 = vmul.f32 %v37_v11, %v37_v11 }
  0x99   :  { %v43_v14 = vsel %vm26_vm0, %v39_v13, 0.0 }
  0x9a   :  { %44 = vadd.xlane.f32.xlu1 %v43_v14 }
 0x11f   :  { %v42_v18 = vpop.xlane.xlu1 %41 }
 0x120   :  { %v46_v19 = vmul.f32 0.03125, %v42_v18 }
 0x122   :  { %v48_v20 = vadd.f32 1e-05, %v46_v19 }
 0x123   :  { %v45_v21 = vpop.xlane.xlu1 %44 }
 0x124   :  { %187 = vrsqrt.f32 %v48_v20  ;;  %v47_v22 = vmul.f32 0.03125, %v45_v21 }
 0x126   :  { %v49_v23 = vadd.f32 1e-05, %v47_v22 }
 0x128   :  { %189 = vrsqrt.f32 %v49_v23 }
 0x131   :  { %v188_v24 = vpop.eup %187 }
 0x132   :  { %v52_v25 = vmul.f32 %v188_v24, %v36_v7 }
 0x134   :  { %v61_v29 = vmul.f32 %v159_v26, %v52_v25 }
 0x135   :  { %v190_v27 = vpop.eup %189 }
 0x136   :  { %v53_v28 = vmul.f32 %v190_v27, %v37_v11  ;;  %v70_v32 = vadd.f32 %v160_v30, %v61_v29 }
 0x138   :  { %v62_v31 = vmul.f32 %v159_v26, %v53_v28 }
 0x13a   :  { %v71_v33 = vadd.f32 %v160_v30, %v62_v31 }
 0x13c   :  { %v72_v34 = vpack.c.bf16 %v71_v33, %v70_v32 }
 0x13e   :  { %177 = vmatmul.mubr.msk.bf16.vlgmr.msra.gmra.mxu0 %vm26_vm0, %v72_v34 }
 0x1fe   :  { %v133_v36 = vpop.f32.mrf.mxu0 }
 0x1ff   :  { %v134_v37 = vadd.f32 %v161_v35, %v133_v36 }
 0x200   :  { %v178_v38 = vpop.f32.mrf.mxu0 }
 0x201   :  { %141 = vst.msk [vmem:[#allocation2] sm:$0xff] %vm140_vm2, %v134_v37 }
 0x202   :  { %v136_v39 = vpop.f32.mrf.mxu0 }
 0x203   :  { %v137_v40 = vadd.f32 %v161_v35, %v136_v39 }
 0x204   :  { %v179_v41 = vpop.f32.mrf.mxu0 }
 0x205   :  { %142 = vst.msk [vmem:[#allocation2 + $0x8] sm:$0xff] %vm140_vm2, %v137_v40 }
 0x206   :  { %202 = shalt.err (!%p199_p4)
}
 0x207   :  { %s216_s4 = smov 128   ;;  %s217_s29 = smov 8  }
 0x208   :  { %154 = dma.vmem_to_hbm [thread:$0]  %s149_s28, 256, %s279_s5, [#allocation3], %s216_s4, %s216_s4, %s217_s29  }
 0x209   :  { %211 = dma.done.wait [#allocation3], 256  }
 0x20a   :  { %212 = vsyncadd [#allocation3], 4294967040 }
 0x20b   :  { %158 = vsyncpa [#allocation3], 1 }

// kernel: fmri_transformer_forward.19
= control target key start
LH: loop header
LB: loop body
LE: loop exit
PB: predicated region body
PF: predicated region fallthrough
CT: control target
= control target key end

     0   :  { %s1925_s0 = inlined_call_operand.vmem [shape: s32[2], index: 0, kind: input, shape index: {}]   ;;  %s1926_s1 = inlined_call_operand.vmem [shape: bf16[16,32], index: 1, kind: input, shape index: {}]   ;;  %s1927_s2 = inlined_call_operand.vmem [shape: bf16[32,32], index: 2, kind: input, shape index: {}]   ;;  %s1928_s3 = inlined_call_operand.vmem [shape: f32[1,32], index: 3, kind: input, shape index: {}]   ;;  %s1929_s4 = inlined_call_operand.vmem [shape: bf16[32,32], index: 4, kind: input, shape index: {}]   ;;  %s1930_s5 = inlined_call_operand.vmem [shape: f32[1,32], index: 5, kind: input, shape index: {}]   ;;  %s1931_s6 = inlined_call_operand.vmem [shape: bf16[32,32], index: 6, kind: input, shape index: {}]   ;;  %s1932_s7 = inlined_call_operand.vmem [shape: f32[1,32], index: 7, kind: input, shape index: {}]   ;;  %s1933_s8 = inlined_call_operand.vmem [shape: bf16[32,32], index: 8, kind: input, shape index: {}]   ;;  %s1934_s9 = inlined_call_operand.vmem [shape: f32[1,32], index: 9, kind: input, shape index: {}]   ;;  %s1935_s10 = inlined_call_operand.vmem [shape: f32[1,32], index: 10, kind: input, shape index: {}]   ;;  %s1936_s11 = inlined_call_operand.vmem [shape: f32[1,32], index: 11, kind: input, shape index: {}]   ;;  %s1937_s12 = inlined_call_operand.vmem [shape: bf16[16,32], index: 12, kind: output, shape index: {}]  }
   0x1   :  { %s17_s23 = sshll.u32 %s1925_s0, 4  ;;  %s18_s23 = int_to_ptr.vmem [resolvable:$true] %s17_s23 }
   0x2   :  { %s1582_s24 = scalar_lea.vmem %s18_s23, 16  ;;  %p1587_p1 = scmp.lt.s32.totalorder %s18_s23, %s18_s23 }
   0x3   :  { %p1583_p0 = scmp.ne.s32.totalorder %s18_s23, %s1582_s24  ;;  %p1588_p2 = scmp.lt.s32.totalorder %s1582_s24, %s1582_s24 }
   0x5   :  { %p1589_p3 = por %p1588_p2, %p1587_p1 }
   0x7   :  { %p1590_p4 = pnand %p1589_p3, %p1583_p0 }
   0x9   :  { %1593 = shalt.err (!%p1590_p4)  }
   0xa   :  { %s1596_s25 = smov [#allocation4]  }
   0xb   :  { %20 = dma.vmem_to_smem %s18_s23, 16, %s1596_s25, [#allocation3] }
   0xc   :  { %1594 = dma.done.wait [#allocation3], 16 }
   0xd   :  { %1595 = vsyncadd [#allocation3], 4294967280 }
   0xe   :  { %22 = sfence }
   0xf   :  { %v1536_v0 = vld [vmem:[%s1929_s4 + $0x8] sm:$0xff]   ;;  %v1597_v1 = vmov 0.0   ;;  %v1538_v3 = vld [vmem:[%s1929_s4] sm:$0xff]   ;;  %vm1598_vm0 = vmmov 0   ;;  %vm78_vm1 = vcmask 261120   ;;  %vm265_vm2 = vcmask 64512  }
  0x10   :  { %1406 = vmatprep.subr.bf16.mxu1 %v1597_v1  ;;  %1398 = vmatprep.subr.bf16.mxu0 %v1597_v1  ;;  %v1537_v2 = vld [vmem:[%s1927_s2 + $0x8] sm:$0xff]   ;;  %v1539_v4 = vld [vmem:[%s1927_s2] sm:$0xff]   ;;  %s1599_s18 = smov 112   ;;  %v254_v46 = vlaneseq  ;;  %v1602_v50 = vmov -1e+30   ;;  %s1335_s23 = sld [smem:[#allocation4 + $0x1]] }
  0x11   :  { %1407 = vmatpush3.bf16.msra.mxu1 %v1536_v0  ;;  %1410 = vmatprep.mubr.msk.bf16.mxu1 %vm1598_vm0, %v1597_v1  ;;  %v1695_v5 = vld [vmem:[%s1926_s1] sm:$0xff]   ;;  %v1541_v25 = vld [vmem:[%s1931_s6 + $0x8] sm:$0xff]   ;;  %vm327_vm8 = vcmask 1043456   ;;  %s1604_s26 = smov 16   ;;  %s1605_s27 = smov 24   ;;  %vm489_vm9 = vcmask 130112  }
  0x12   :  { %1399 = vmatpush3.bf16.msra.mxu0 %v1537_v2  ;;  %1408 = vmatprep.subr.bf16.mxu1 %v1597_v1  ;;  %v1319_v8 = vld [vmem:[%s1930_s5] ss:$0 sm:$0xff]  ;;  %s1600_s5 = smov 120   ;;  %v255_v47 = vand.u32 127, %v254_v46  ;;  %v257_v48 = vshrl.u32 %v254_v46, 7  ;;  %vm605_vm10 = vcmask 195712  }
  0x13   :  { %1400 = vmatprep.subr.bf16.mxu0 %v1597_v1  ;;  %1402 = vmatprep.mubr.msk.bf16.mxu0 %vm1598_vm0, %v1597_v1  ;;  %v1314_v10 = vld [vmem:[%s1928_s3] ss:$0 sm:$0xff]  ;;  %s1601_s3 = smov 104   ;;  %vm721_vm11 = vcmask 261312   ;;  %vm1307_vm12 = vcmask 257024  }
  0x14   :  { %v1542_v26 = vld [vmem:[%s1931_s6] sm:$0xff]   ;;  %s259_s6 = sld [smem:[#allocation4]]  ;;  %vm262_vm4 = vcmp.le.s32.totalorder %v255_v47, %v257_v48 }
  0x15   :  { %1409 = vmatpush3.bf16.msra.mxu1 %v1538_v3 }
  0x16   :  { %1401 = vmatpush3.bf16.msra.mxu0 %v1539_v4  ;;  %1422 = vmatprep.subr.bf16.mxu1 %v1597_v1 }
  0x17   :  { %1414 = vmatprep.subr.bf16.mxu0 %v1597_v1 }
  0x18   :  { %1411 = vmatmul.mubr.msk.bf16.vlgmr.msra.gmra.mxu1 %vm78_vm1, %v1695_v5 }
  0x19   :  { %1403 = vmatmul.mubr.msk.bf16.vlgmr.msra.gmra.mxu0 %vm78_vm1, %v1695_v5  ;;  %1424 = vmatprep.mubr.msk.bf16.mxu1 %vm1598_vm0, %v1597_v1 }
  0x1a   :  { %1418 = vmatprep.mubr.msk.bf16.mxu0 %vm1598_vm0, %v1597_v1  ;;  %1415 = vmatpush3.bf16.msra.mxu0 %v1541_v25  ;;  %v260_v49 = vstv %s259_s6 }
  0x1b   :  { %1416 = vmatprep.subr.bf16.mxu0 %v1597_v1  ;;  %vm261_vm3 = vcmp.lt.s32.totalorder %v255_v47, %v260_v49 }
  0x1c   :  { %vm263_vm5 = vmand %vm261_vm3, %vm262_vm4 }
  0x1d   :  { %v264_v51 = vsel %vm263_vm5, 0.0, %v1602_v50 }
  0x1e   :  { %1417 = vmatpush3.bf16.msra.mxu0 %v1542_v26 }
  0x1f   :  { %1428 = vmatprep.subr.bf16.mxu0 %v1597_v1 }
  0x21   :  { %1419 = vmatmul.mubr.msk.bf16.vlgmr.msra.gmra.mxu0 %vm78_vm1, %v1695_v5 }
  0x22   :  { %1430 = vmatprep.mubr.msk.bf16.mxu0 %vm1598_vm0, %v1597_v1 }
  0xd8   :  { %v180_v6 = vpop.f32.mrf.mxu1 }
  0xd9   :  { %v116_v7 = vpop.f32.mrf.mxu0  ;;  %v181_v13 = vadd.f32 %v1319_v8, %v180_v6 }
  0xda   :  { %v1412_v9 = vpop.f32.mrf.mxu1  ;;  %v117_v14 = vadd.f32 %v1314_v10, %v116_v7  ;;  %v725_v7 = vstv %s1335_s23 }
  0xdb   :  { %v1404_v11 = vpop.f32.mrf.mxu0  ;;  %vm726_vm6 = vcmp.lt.s32.totalorder %v255_v47, %v725_v7 }
  0xdc   :  { %v183_v12 = vpop.f32.mrf.mxu1  ;;  %vm727_vm7 = vmand %vm726_vm6, %vm262_vm4 }
  0xdd   :  { %v184_v15 = vadd.f32 %v1319_v8, %v183_v12  ;;  %v119_v16 = vpop.f32.mrf.mxu0 }
  0xde   :  { %v1413_v17 = vpop.f32.mrf.mxu1  ;;  %v120_v18 = vadd.f32 %v1314_v10, %v119_v16 }
  0xdf   :  { %v252_v19 = vpack.c.bf16 %v184_v15, %v181_v13  ;;  %v1405_v20 = vpop.f32.mrf.mxu0  ;;  %v728_v15 = vsel %vm727_vm7, 0.0, %v1602_v50 }
  0xe0   :  { %v251_v21 = vpack.c.bf16 %v120_v18, %v117_v14 }
  0xe1   :  { %493 = vrot.lane.b32.xlu1 %v252_v19, %s1599_s18  ;;  %376 = vrot.lane.b32.xlu0 %v252_v19, %s1600_s5  ;;  %v270_v22 = vsel %vm265_vm2, %v252_v19, 0  ;;  %v730_v23 = vrot.slane %v252_v19, 4 }
  0xe2   :  { %1423 = vmatpush3.bf16.xpose.msra.mxu1 %v270_v22  ;;  %v729_v24 = vrot.slane %v251_v21, 4 }
  0xe3   :  { %1434 = vmatprep.subr.bf16.mxu1 %v1597_v1  ;;  %v735_v36 = vsel %vm265_vm2, %v730_v23, 0 }
  0xe5   :  { %491 = vrot.lane.b32.xlu1 %v251_v21, %s1599_s18  ;;  %373 = vrot.lane.b32.xlu0 %v251_v21, %s1600_s5 }
  0xe9   :  { %607 = vrot.lane.b32.xlu1 %v251_v21, %s1601_s3  ;;  %609 = vrot.lane.b32.xlu0 %v252_v19, %s1601_s3 }
  0xea   :  { %1425 = vmatmul.mubr.msk.bf16.vlgmr.msra.gmra.mxu1 %vm265_vm2, %v251_v21 }
  0xeb   :  { %1436 = vmatprep.mubr.msk.bf16.mxu1 %vm1598_vm0, %v1597_v1 }
  0xed   :  { %839 = vrot.lane.b32.xlu0 %v730_v23, %s1600_s5  ;;  %837 = vrot.lane.b32.xlu1 %v729_v24, %s1600_s5 }
  0xf1   :  { %954 = vrot.lane.b32.xlu0 %v730_v23, %s1599_s18  ;;  %952 = vrot.lane.b32.xlu1 %v729_v24, %s1599_s18 }
  0xf5   :  { %1069 = vrot.lane.b32.xlu0 %v730_v23, %s1601_s3  ;;  %1067 = vrot.lane.b32.xlu1 %v729_v24, %s1601_s3 }
 0x153   :  { %v377_v27 = vpop.permute.xlu0 %376  ;;  %v494_v29 = vpop.permute.xlu1 %493 }
 0x154   :  { %v382_v28 = vsel %vm265_vm2, %v377_v27, 0  ;;  %v499_v31 = vsel %vm265_vm2, %v494_v29, 0 }
 0x155   :  { %1435 = vmatpush3.bf16.xpose.msra.mxu1 %v382_v28 }
 0x156   :  { %1446 = vmatprep.subr.bf16.mxu1 %v1597_v1 }
 0x157   :  { %v374_v30 = vpop.permute.xlu0 %373  ;;  %v492_v33 = vpop.permute.xlu1 %491 }
 0x15b   :  { %v610_v32 = vpop.permute.xlu0 %609  ;;  %v608_v35 = vpop.permute.xlu1 %607 }
 0x15c   :  { %1437 = vmatmul.mubr.msk.bf16.vlgmr.msra.gmra.mxu1 %vm265_vm2, %v374_v30  ;;  %v615_v34 = vsel %vm265_vm2, %v610_v32, 0 }
 0x15d   :  { %1447 = vmatpush3.bf16.xpose.msra.mxu1 %v499_v31  ;;  %1448 = vmatprep.mubr.msk.bf16.mxu1 %vm1598_vm0, %v1597_v1 }
 0x15e   :  { %1458 = vmatprep.subr.bf16.mxu1 %v1597_v1 }
 0x15f   :  { %v840_v37 = vpop.permute.xlu0 %839  ;;  %v838_v40 = vpop.permute.xlu1 %837 }
 0x160   :  { %v845_v38 = vsel %vm265_vm2, %v840_v37, 0 }
 0x163   :  { %v955_v39 = vpop.permute.xlu0 %954  ;;  %v953_v43 = vpop.permute.xlu1 %952 }
 0x164   :  { %1449 = vmatmul.mubr.msk.bf16.vlgmr.msra.gmra.mxu1 %vm265_vm2, %v492_v33  ;;  %v960_v41 = vsel %vm265_vm2, %v955_v39, 0  ;;  %v1323_v39 = vld [vmem:[%s1932_s7] ss:$0 sm:$0xff]  ;;  %s1603_s7 = smov 8  }
 0x165   :  { %1459 = vmatpush3.bf16.xpose.msra.mxu1 %v615_v34  ;;  %1460 = vmatprep.mubr.msk.bf16.mxu1 %vm1598_vm0, %v1597_v1  ;;  %v244_v34 = vpop.f32.mrf.mxu0 }
 0x166   :  { %1470 = vmatprep.subr.bf16.mxu1 %v1597_v1 }
 0x167   :  { %v1070_v42 = vpop.permute.xlu0 %1069  ;;  %v1068_v45 = vpop.permute.xlu1 %1067 }
 0x168   :  { %v1075_v44 = vsel %vm265_vm2, %v1070_v42, 0  ;;  %v1420_v37 = vpop.f32.mrf.mxu0 }
 0x16c   :  { %1461 = vmatmul.mubr.msk.bf16.vlgmr.msra.gmra.mxu1 %vm265_vm2, %v608_v35 }
 0x16d   :  { %1471 = vmatpush3.bf16.xpose.msra.mxu1 %v735_v36  ;;  %1472 = vmatprep.mubr.msk.bf16.mxu1 %vm1598_vm0, %v1597_v1 }
 0x16e   :  { %1482 = vmatprep.subr.bf16.mxu1 %v1597_v1 }
 0x174   :  { %1473 = vmatmul.mubr.msk.bf16.vlgmr.msra.gmra.mxu1 %vm265_vm2, %v729_v24 }
 0x175   :  { %1483 = vmatpush3.bf16.xpose.msra.mxu1 %v845_v38  ;;  %1484 = vmatprep.mubr.msk.bf16.mxu1 %vm1598_vm0, %v1597_v1 }
 0x176   :  { %1494 = vmatprep.subr.bf16.mxu1 %v1597_v1 }
 0x17c   :  { %1485 = vmatmul.mubr.msk.bf16.vlgmr.msra.gmra.mxu1 %vm265_vm2, %v838_v40 }
 0x17d   :  { %1495 = vmatpush3.bf16.xpose.msra.mxu1 %v960_v41  ;;  %1496 = vmatprep.mubr.msk.bf16.mxu1 %vm1598_vm0, %v1597_v1 }
 0x17e   :  { %1506 = vmatprep.subr.bf16.mxu1 %v1597_v1 }
 0x184   :  { %1497 = vmatmul.mubr.msk.bf16.vlgmr.msra.gmra.mxu1 %vm265_vm2, %v953_v43  ;;  %v245_v43 = vadd.f32 %v1323_v39, %v244_v34 }
 0x185   :  { %1507 = vmatpush3.bf16.xpose.msra.mxu1 %v1075_v44  ;;  %1508 = vmatprep.mubr.msk.bf16.mxu1 %vm1598_vm0, %v1597_v1  ;;  %v247_v44 = vpop.f32.mrf.mxu0 }
 0x186   :  { %1518 = vmatprep.subr.bf16.mxu1 %v1597_v1  ;;  %v248_v47 = vadd.f32 %v1323_v39, %v247_v44 }
 0x187   :  { %v1421_v48 = vpop.f32.mrf.mxu0 }
 0x18c   :  { %1509 = vmatmul.mubr.msk.bf16.vlgmr.msra.gmra.mxu1 %vm265_vm2, %v1068_v45 }
 0x18d   :  { %1522 = vmatprep.mubr.msk.bf16.mxu1 %vm1598_vm0, %v1597_v1 }
 0x1aa   :  { %v306_v52 = vpop.f32.mrf.mxu1 }
 0x1ab   :  { %v307_v53 = vadd.f32 %v306_v52, %v264_v51 }
 0x1ac   :  { %v1426_v54 = vpop.f32.mrf.mxu1 }
 0x1ad   :  { %v312_v55 = vsel %vm265_vm2, %v307_v53, -inf }
 0x1ae   :  { %313 = vmax.xlane.f32.xlu0 %v312_v55  ;;  %v309_v56 = vpop.f32.mrf.mxu1 }
 0x1b0   :  { %v1427_v57 = vpop.f32.mrf.mxu1 }
 0x21c   :  { %v418_v58 = vpop.f32.mrf.mxu1 }
 0x21d   :  { %v1781_v59 = vadd.f32 %v418_v58, %v264_v51 }
 0x21e   :  { %v1438_v60 = vpop.f32.mrf.mxu1 }
 0x21f   :  { %v424_v61 = vsel %vm265_vm2, %v1781_v59, -inf }
 0x220   :  { %425 = vmax.xlane.f32.xlu1 %v424_v61  ;;  %v421_v62 = vpop.f32.mrf.mxu1 }
 0x222   :  { %v1439_v63 = vpop.f32.mrf.mxu1 }
 0x224   :  { %v535_v0 = vpop.f32.mrf.mxu1 }
 0x225   :  { %v1785_v2 = vadd.f32 %v535_v0, %v264_v51 }
 0x226   :  { %v1450_v3 = vpop.f32.mrf.mxu1 }
 0x227   :  { %v541_v4 = vsel %vm265_vm2, %v1785_v2, -inf }
 0x228   :  { %542 = vmax.xlane.f32.xlu0 %v541_v4  ;;  %v538_v6 = vpop.f32.mrf.mxu1 }
 0x22a   :  { %v1451_v8 = vpop.f32.mrf.mxu1 }
 0x22c   :  { %v651_v9 = vpop.f32.mrf.mxu1 }
 0x22d   :  { %v1789_v10 = vadd.f32 %v651_v9, %v264_v51  ;;  %v1811_v51 = vpack.c.bf16 %v248_v47, %v245_v43 }
 0x22e   :  { %v1462_v11 = vpop.f32.mrf.mxu1 }
 0x22f   :  { %v657_v12 = vsel %vm265_vm2, %v1789_v10, -inf }
 0x230   :  { %658 = vmax.xlane.f32.xlu0 %v657_v12  ;;  %v654_v13 = vpop.f32.mrf.mxu1 }
 0x232   :  { %v1463_v14 = vpop.f32.mrf.mxu1 }
 0x234   :  { %v771_v16 = vpop.f32.mrf.mxu1 }
 0x235   :  { %v1794_v17 = vadd.f32 %v771_v16, %v728_v15 }
 0x236   :  { %v1474_v18 = vpop.f32.mrf.mxu1 }
 0x237   :  { %v314_v19 = vpop.xlane.xlu0 %313  ;;  %v777_v20 = vsel %vm265_vm2, %v1794_v17, -inf }
 0x238   :  { %v315_v21 = vsub.f32 %v307_v53, %v314_v19  ;;  %778 = vmax.xlane.f32.xlu1 %v777_v20  ;;  %v774_v22 = vpop.f32.mrf.mxu1  ;;  %v329_v53 = vsel %vm327_vm8, %v1811_v51, 0 }
 0x239   :  { %1429 = vmatpush3.bf16.msra.mxu0 %v329_v53 }
 0x23a   :  { %v316_v23 = vmul.f32 1.442695, %v315_v21  ;;  %v1475_v24 = vpop.f32.mrf.mxu1  ;;  %1440 = vmatprep.subr.bf16.mxu0 %v1597_v1 }
 0x23c   :  { %1546 = vpow2.f32 %v316_v23  ;;  %v881_v25 = vpop.f32.mrf.mxu1 }
 0x23d   :  { %v1798_v26 = vadd.f32 %v881_v25, %v728_v15 }
 0x23e   :  { %v1486_v27 = vpop.f32.mrf.mxu1 }
 0x23f   :  { %v887_v28 = vsel %vm265_vm2, %v1798_v26, -inf }
 0x240   :  { %888 = vmax.xlane.f32.xlu0 %v887_v28  ;;  %v884_v29 = vpop.f32.mrf.mxu1 }
 0x242   :  { %v1487_v30 = vpop.f32.mrf.mxu1 }
 0x244   :  { %v996_v31 = vpop.f32.mrf.mxu1 }
 0x245   :  { %v1802_v32 = vadd.f32 %v996_v31, %v728_v15  ;;  %v789_v31 = vrot.slane %v1811_v51, 4 }
 0x246   :  { %v1498_v33 = vpop.f32.mrf.mxu1 }
 0x247   :  { %v1002_v35 = vsel %vm265_vm2, %v1802_v32, -inf }
 0x248   :  { %1003 = vmax.xlane.f32.xlu1 %v1002_v35  ;;  %v999_v36 = vpop.f32.mrf.mxu1 }
 0x249   :  { %v1547_v38 = vpop.eup %1546 }
 0x24a   :  { %v1499_v40 = vpop.f32.mrf.mxu1  ;;  %v318_v41 = vsel %vm265_vm2, %v1547_v38, 0.0 }
 0x24c   :  { %319 = vadd.xlane.f32.xlu1 %v318_v41  ;;  %v1111_v42 = vpop.f32.mrf.mxu1 }
 0x24d   :  { %v1112_v45 = vadd.f32 %v1111_v42, %v728_v15 }
 0x24e   :  { %v1510_v46 = vpop.f32.mrf.mxu1 }
 0x24f   :  { %v1117_v49 = vsel %vm265_vm2, %v1112_v45, -inf }
 0x250   :  { %1118 = vmax.xlane.f32.xlu0 %v1117_v49  ;;  %v1114_v50 = vpop.f32.mrf.mxu1 }
 0x251   :  { %v794_v50 = vsel %vm327_vm8, %v789_v31, 0 }
 0x252   :  { %v1511_v52 = vpop.f32.mrf.mxu1 }
 0x2a9   :  { %v426_v54 = vpop.xlane.xlu1 %425 }
 0x2aa   :  { %v427_v55 = vsub.f32 %v1781_v59, %v426_v54 }
 0x2ac   :  { %v428_v56 = vmul.f32 1.442695, %v427_v55 }
 0x2ae   :  { %1548 = vpow2.f32 %v428_v56 }
 0x2b1   :  { %v543_v57 = vpop.xlane.xlu0 %542 }
 0x2b2   :  { %v544_v58 = vsub.f32 %v1785_v2, %v543_v57 }
 0x2b4   :  { %v545_v60 = vmul.f32 1.442695, %v544_v58 }
 0x2b6   :  { %1550 = vpow2.f32 %v545_v60 }
 0x2b9   :  { %v659_v61 = vpop.xlane.xlu0 %658 }
 0x2ba   :  { %v660_v62 = vsub.f32 %v1789_v10, %v659_v61 }
 0x2bb   :  { %v1549_v63 = vpop.eup %1548 }
 0x2bc   :  { %v661_v0 = vmul.f32 1.442695, %v660_v62  ;;  %v430_v3 = vsel %vm265_vm2, %v1549_v63, 0.0 }
 0x2bd   :  { %431 = vadd.xlane.f32.xlu0 %v430_v3 }
 0x2be   :  { %1552 = vpow2.f32 %v661_v0 }
 0x2c1   :  { %v779_v7 = vpop.xlane.xlu1 %778 }
 0x2c2   :  { %v780_v11 = vsub.f32 %v1794_v17, %v779_v7 }
 0x2c3   :  { %v1820_v4 = vpop.eup %1550 }
 0x2c4   :  { %v547_v59 = vsel %vm265_vm2, %v1820_v4, 0.0  ;;  %v781_v16 = vmul.f32 1.442695, %v780_v11 }
 0x2c5   :  { %548 = vadd.xlane.f32.xlu1 %v547_v59 }
 0x2c9   :  { %v889_v12 = vpop.xlane.xlu0 %888 }
 0x2ca   :  { %v890_v15 = vsub.f32 %v1798_v26, %v889_v12 }
 0x2cb   :  { %v1824_v6 = vpop.eup %1552 }
 0x2cc   :  { %v663_v2 = vsel %vm265_vm2, %v1824_v6, 0.0  ;;  %v891_v20 = vmul.f32 1.442695, %v890_v15 }
 0x2cd   :  { %664 = vadd.xlane.f32.xlu0 %v663_v2 }
 0x2d1   :  { %v1004_v8 = vpop.xlane.xlu1 %1003 }
 0x2d2   :  { %v1005_v18 = vsub.f32 %v1802_v32, %v1004_v8 }
 0x2d4   :  { %v1006_v21 = vmul.f32 1.442695, %v1005_v18 }
 0x2d5   :  { %v320_v9 = vpop.xlane.xlu1 %319 }
 0x2d6   :  { %553 = vrot.lane.b32.xlu1 %v1811_v51, %s1599_s18  ;;  %1554 = vrcp.f32 %v320_v9 }
 0x2d7   :  { %1556 = vpow2.f32 %v781_v16 }
 0x2d8   :  { %1558 = vpow2.f32 %v891_v20 }
 0x2d9   :  { %v1119_v19 = vpop.xlane.xlu0 %1118  ;;  %1560 = vpow2.f32 %v1006_v21 }
 0x2da   :  { %669 = vrot.lane.b32.xlu1 %v1811_v51, %s1601_s3  ;;  %v1120_v22 = vsub.f32 %v1112_v45, %v1119_v19 }
 0x2dc   :  { %v1121_v17 = vmul.f32 1.442695, %v1120_v22 }
 0x2de   :  { %1562 = vpow2.f32 %v1121_v17 }
 0x2e3   :  { %437 = vrot.lane.b32.xlu0 %v1811_v51, %s1600_s5  ;;  %v1555_v10 = vpop.eup %1554 }
 0x2e4   :  { %v322_v13 = vmul.f32 %v1555_v10, %v1547_v38  ;;  %v1557_v23 = vpop.eup %1556 }
 0x2e5   :  { %v1840_v24 = vpop.eup %1558  ;;  %v783_v25 = vsel %vm265_vm2, %v1557_v23, 0.0 }
 0x2e6   :  { %v323_v14 = vpack.c.bf16 %v322_v13, %v322_v13  ;;  %v1843_v26 = vpop.eup %1560  ;;  %v893_v27 = vsel %vm265_vm2, %v1840_v24, 0.0 }
 0x2e7   :  { %v1008_v28 = vsel %vm265_vm2, %v1843_v26, 0.0 }
 0x2e8   :  { %1431 = vmatmul.mubr.msk.bf16.vlgmr.msra.gmra.mxu0 %vm265_vm2, %v323_v14 }
 0x2e9   :  { %1442 = vmatprep.mubr.msk.bf16.mxu0 %vm1598_vm0, %v1597_v1 }
 0x2eb   :  { %v1849_v29 = vpop.eup %1562 }
 0x2ec   :  { %v1123_v30 = vsel %vm265_vm2, %v1849_v29, 0.0 }
 0x2fe   :  { %784 = vadd.xlane.f32.xlu1 %v783_v25 }
 0x302   :  { %894 = vadd.xlane.f32.xlu1 %v893_v27  ;;  %1009 = vadd.xlane.f32.xlu0 %v1008_v28 }
 0x306   :  { %1124 = vadd.xlane.f32.xlu1 %v1123_v30 }
 0x317   :  { %1014 = vrot.lane.b32.xlu1 %v789_v31, %s1599_s18 }
 0x318   :  { %899 = vrot.lane.b32.xlu0 %v789_v31, %s1600_s5 }
 0x31c   :  { %1129 = vrot.lane.b32.xlu0 %v789_v31, %s1601_s3 }
 0x346   :  { %v432_v32 = vpop.xlane.xlu0 %431 }
 0x347   :  { %1564 = vrcp.f32 %v432_v32 }
 0x34e   :  { %v549_v33 = vpop.xlane.xlu1 %548 }
 0x34f   :  { %1566 = vrcp.f32 %v549_v33 }
 0x352   :  { %v554_v39 = vpop.permute.xlu1 %553 }
 0x353   :  { %v559_v42 = vsel %vm327_vm8, %v554_v39, 0 }
 0x354   :  { %v1565_v34 = vpop.eup %1564 }
 0x355   :  { %v434_v36 = vmul.f32 %v1565_v34, %v1549_v63  ;;  %v1543_v34 = vld [vmem:[%s1933_s8 + $0x8] sm:$0xff]  }
 0x356   :  { %v665_v35 = vpop.xlane.xlu0 %664  ;;  %v670_v44 = vpop.permute.xlu1 %669  ;;  %1519 = vmatpush3.bf16.msra.mxu1 %v1543_v34 }
 0x357   :  { %1568 = vrcp.f32 %v665_v35  ;;  %v435_v40 = vpack.c.bf16 %v434_v36, %v434_v36  ;;  %v675_v47 = vsel %vm327_vm8, %v670_v44, 0  ;;  %v1544_v36 = vld [vmem:[%s1933_s8] sm:$0xff]   ;;  %1520 = vmatprep.subr.bf16.mxu1 %v1597_v1 }
 0x35a   :  { %v438_v37 = vpop.permute.xlu0 %437  ;;  %1521 = vmatpush3.bf16.msra.mxu1 %v1544_v36 }
 0x35b   :  { %v443_v38 = vsel %vm327_vm8, %v438_v37, 0 }
 0x35c   :  { %1441 = vmatpush3.bf16.msra.mxu0 %v443_v38  ;;  %v1567_v41 = vpop.eup %1566 }
 0x35d   :  { %1452 = vmatprep.subr.bf16.mxu0 %v1597_v1  ;;  %v551_v43 = vmul.f32 %v1567_v41, %v1820_v4 }
 0x35f   :  { %1443 = vmatmul.mubr.msk.bf16.vlgmr.msra.gmra.mxu0 %vm265_vm2, %v435_v40  ;;  %v552_v45 = vpack.c.bf16 %v551_v43, %v551_v43 }
 0x360   :  { %1453 = vmatpush3.bf16.msra.mxu0 %v559_v42  ;;  %1454 = vmatprep.mubr.msk.bf16.mxu0 %vm1598_vm0, %v1597_v1 }
 0x361   :  { %1464 = vmatprep.subr.bf16.mxu0 %v1597_v1 }
 0x364   :  { %v1569_v46 = vpop.eup %1568 }
 0x365   :  { %v667_v48 = vmul.f32 %v1569_v46, %v1824_v6 }
 0x367   :  { %1455 = vmatmul.mubr.msk.bf16.vlgmr.msra.gmra.mxu0 %vm265_vm2, %v552_v45  ;;  %v668_v49 = vpack.c.bf16 %v667_v48, %v667_v48 }
 0x368   :  { %1465 = vmatpush3.bf16.msra.mxu0 %v675_v47  ;;  %1466 = vmatprep.mubr.msk.bf16.mxu0 %vm1598_vm0, %v1597_v1 }
 0x369   :  { %1476 = vmatprep.subr.bf16.mxu0 %v1597_v1 }
 0x36f   :  { %1467 = vmatmul.mubr.msk.bf16.vlgmr.msra.gmra.mxu0 %vm265_vm2, %v668_v49 }
 0x370   :  { %1477 = vmatpush3.bf16.msra.mxu0 %v794_v50  ;;  %1478 = vmatprep.mubr.msk.bf16.mxu0 %vm1598_vm0, %v1597_v1 }
 0x371   :  { %1488 = vmatprep.subr.bf16.mxu0 %v1597_v1 }
 0x387   :  { %v785_v51 = vpop.xlane.xlu1 %784 }
 0x388   :  { %1570 = vrcp.f32 %v785_v51 }
 0x38b   :  { %v895_v52 = vpop.xlane.xlu1 %894  ;;  %v1010_v53 = vpop.xlane.xlu0 %1009 }
 0x38c   :  { %1572 = vrcp.f32 %v895_v52 }
 0x38d   :  { %1574 = vrcp.f32 %v1010_v53  ;;  %v1344_v53 = vld [vmem:[%s1934_s9] ss:$0 sm:$0xff] }
 0x38f   :  { %v900_v56 = vpop.permute.xlu0 %899  ;;  %v1125_v60 = vpop.xlane.xlu1 %1124 }
 0x390   :  { %v905_v61 = vsel %vm327_vm8, %v900_v56, 0  ;;  %1576 = vrcp.f32 %v1125_v60  ;;  %v49_v60 = vunpack.c.h.bf16 %v1695_v5 }
 0x393   :  { %v1015_v63 = vpop.permute.xlu1 %1014  ;;  %v1130_v6 = vpop.permute.xlu0 %1129 }
 0x394   :  { %v1020_v4 = vsel %vm327_vm8, %v1015_v63, 0  ;;  %v1135_v9 = vsel %vm327_vm8, %v1130_v6, 0 }
 0x395   :  { %v1571_v54 = vpop.eup %1570 }
 0x396   :  { %v787_v55 = vmul.f32 %v1571_v54, %v1557_v23  ;;  %v48_v54 = vunpack.c.l.bf16 %v1695_v5 }
 0x398   :  { %v788_v57 = vpack.c.bf16 %v787_v55, %v787_v55 }
 0x399   :  { %v1573_v58 = vpop.eup %1572 }
 0x39a   :  { %1479 = vmatmul.mubr.msk.bf16.vlgmr.msra.gmra.mxu0 %vm265_vm2, %v788_v57  ;;  %v897_v62 = vmul.f32 %v1573_v58, %v1840_v24  ;;  %v1575_v3 = vpop.eup %1574 }
 0x39b   :  { %1489 = vmatpush3.bf16.msra.mxu0 %v905_v61  ;;  %1490 = vmatprep.mubr.msk.bf16.mxu0 %vm1598_vm0, %v1597_v1  ;;  %v1012_v59 = vmul.f32 %v1575_v3, %v1843_v26 }
 0x39c   :  { %1500 = vmatprep.subr.bf16.mxu0 %v1597_v1  ;;  %v898_v0 = vpack.c.bf16 %v897_v62, %v897_v62 }
 0x39d   :  { %v1013_v2 = vpack.c.bf16 %v1012_v59, %v1012_v59  ;;  %v1577_v7 = vpop.eup %1576 }
 0x39e   :  { %v1127_v11 = vmul.f32 %v1577_v7, %v1849_v29 }
 0x3a0   :  { %v1128_v14 = vpack.c.bf16 %v1127_v11, %v1127_v11 }
 0x3a2   :  { %1491 = vmatmul.mubr.msk.bf16.vlgmr.msra.gmra.mxu0 %vm265_vm2, %v898_v0 }
 0x3a3   :  { %1501 = vmatpush3.bf16.msra.mxu0 %v1020_v4  ;;  %1502 = vmatprep.mubr.msk.bf16.mxu0 %vm1598_vm0, %v1597_v1 }
 0x3a4   :  { %1512 = vmatprep.subr.bf16.mxu0 %v1597_v1 }
 0x3a8   :  { %v365_v8 = vpop.f32.mrf.mxu0 }
 0x3a9   :  { %371 = vst.msk [vmem:[#allocation2] sm:$0xff] %vm265_vm2, %v365_v8 }
 0x3aa   :  { %1503 = vmatmul.mubr.msk.bf16.vlgmr.msra.gmra.mxu0 %vm265_vm2, %v1013_v2  ;;  %v1432_v10 = vpop.f32.mrf.mxu0 }
 0x3ab   :  { %1513 = vmatpush3.bf16.msra.mxu0 %v1135_v9  ;;  %1514 = vmatprep.mubr.msk.bf16.mxu0 %vm1598_vm0, %v1597_v1 }
 0x3ac   :  { %v368_v12 = vpop.f32.mrf.mxu0 }
 0x3ae   :  { %v1433_v13 = vpop.f32.mrf.mxu0 }
 0x3b2   :  { %1515 = vmatmul.mubr.msk.bf16.vlgmr.msra.gmra.mxu0 %vm265_vm2, %v1128_v14 }
 0x41f   :  { %v479_v15 = vpop.f32.mrf.mxu0 }
 0x420   :  { %486 = vrot.lane.b32.xlu0 %v479_v15, %s1603_s7 }
 0x421   :  { %v1444_v16 = vpop.f32.mrf.mxu0 }
 0x423   :  { %v482_v18 = vpop.f32.mrf.mxu0 }
 0x425   :  { %v1445_v19 = vpop.f32.mrf.mxu0 }
 0x427   :  { %v595_v20 = vpop.f32.mrf.mxu0 }
 0x428   :  { %602 = vrot.lane.b32.xlu0 %v595_v20, %s1604_s26 }
 0x429   :  { %v1456_v21 = vpop.f32.mrf.mxu0 }
 0x42a   :  { %v1348_v21 = vld [vmem:[%s1935_s10] ss:$0 sm:$0xff] }
 0x42b   :  { %v598_v22 = vpop.f32.mrf.mxu0 }
 0x42d   :  { %v1457_v17 = vpop.f32.mrf.mxu0 }
 0x42e   :  { %v1349_v17 = vld [vmem:[%s1936_s11] ss:$0 sm:$0xff] }
 0x42f   :  { %v711_v23 = vpop.f32.mrf.mxu0 }
 0x430   :  { %718 = vrot.lane.b32.xlu0 %v711_v23, %s1605_s27 }
 0x431   :  { %v1468_v24 = vpop.f32.mrf.mxu0 }
 0x433   :  { %v714_v25 = vpop.f32.mrf.mxu0 }
 0x435   :  { %v1469_v26 = vpop.f32.mrf.mxu0 }
 0x45a   :  { %v830_v27 = vpop.f32.mrf.mxu0 }
 0x45b   :  { %836 = vst.msk [vmem:[#allocation2 + $0x8] sm:$0xff] %vm265_vm2, %v830_v27 }
 0x45c   :  { %v1480_v28 = vpop.f32.mrf.mxu0 }
 0x45e   :  { %v833_v29 = vpop.f32.mrf.mxu0 }
 0x460   :  { %v1481_v30 = vpop.f32.mrf.mxu0 }
 0x462   :  { %v941_v31 = vpop.f32.mrf.mxu0 }
 0x463   :  { %948 = vrot.lane.b32.xlu1 %v941_v31, %s1603_s7 }
 0x464   :  { %v1492_v32 = vpop.f32.mrf.mxu0 }
 0x466   :  { %v944_v33 = vpop.f32.mrf.mxu0 }
 0x468   :  { %v1493_v35 = vpop.f32.mrf.mxu0 }
 0x46a   :  { %v1056_v37 = vpop.f32.mrf.mxu0 }
 0x46b   :  { %1063 = vrot.lane.b32.xlu1 %v1056_v37, %s1604_s26 }
 0x46c   :  { %v1504_v38 = vpop.f32.mrf.mxu0 }
 0x46e   :  { %v1059_v39 = vpop.f32.mrf.mxu0 }
 0x470   :  { %v1505_v40 = vpop.f32.mrf.mxu0 }
 0x472   :  { %v1171_v41 = vpop.f32.mrf.mxu0 }
 0x473   :  { %1178 = vrot.lane.b32.xlu1 %v1171_v41, %s1605_s27 }
 0x474   :  { %v1516_v42 = vpop.f32.mrf.mxu0 }
 0x476   :  { %v1174_v43 = vpop.f32.mrf.mxu0 }
 0x478   :  { %v1517_v44 = vpop.f32.mrf.mxu0 }
 0x492   :  { %v487_v45 = vpop.permute.xlu0 %486 }
 0x493   :  { %490 = vst.msk [vmem:[#allocation2] sm:$0xff] %vm489_vm9, %v487_v45 }
 0x49a   :  { %v603_v46 = vpop.permute.xlu0 %602 }
 0x49b   :  { %606 = vst.msk [vmem:[#allocation2] sm:$0xff] %vm605_vm10, %v603_v46 }
 0x4a2   :  { %v719_v47 = vpop.permute.xlu0 %718 }
 0x4a3   :  { %722 = vst.msk [vmem:[#allocation2] sm:$0xff] %vm721_vm11, %v719_v47 }
 0x4aa   :  { %v1182_v50 = vld [vmem:[#allocation2] sm:$0xff] }
 0x4d5   :  { %v949_v1 = vpop.permute.xlu1 %948 }
 0x4d6   :  { %951 = vst.msk [vmem:[#allocation2 + $0x8] sm:$0xff] %vm489_vm9, %v949_v1 }
 0x4dd   :  { %v1064_v48 = vpop.permute.xlu1 %1063 }
 0x4de   :  { %1066 = vst.msk [vmem:[#allocation2 + $0x8] sm:$0xff] %vm605_vm10, %v1064_v48 }
 0x4e5   :  { %v1179_v49 = vpop.permute.xlu1 %1178 }
 0x4e6   :  { %1181 = vst.msk [vmem:[#allocation2 + $0x8] sm:$0xff] %vm721_vm11, %v1179_v49 }
 0x4ed   :  { %v1183_v51 = vld [vmem:[#allocation2 + $0x8] sm:$0xff] }
 0x4ee   :  { %v1184_v52 = vpack.c.bf16 %v1183_v51, %v1182_v50 }
 0x4f0   :  { %1523 = vmatmul.mubr.msk.bf16.vlgmr.msra.gmra.mxu1 %vm78_vm1, %v1184_v52 }
 0x5b0   :  { %v1245_v55 = vpop.f32.mrf.mxu1 }
 0x5b1   :  { %v1246_v56 = vadd.f32 %v1344_v53, %v1245_v55 }
 0x5b2   :  { %v1524_v57 = vpop.f32.mrf.mxu1 }
 0x5b3   :  { %v1252_v58 = vadd.f32 %v1246_v56, %v48_v54 }
 0x5b4   :  { %v1248_v61 = vpop.f32.mrf.mxu1 }
 0x5b5   :  { %v1249_v62 = vadd.f32 %v1344_v53, %v1248_v61  ;;  %v1254_v63 = vsel %vm78_vm1, %v1252_v58, 0.0 }
 0x5b6   :  { %v1525_v0 = vpop.f32.mrf.mxu1  ;;  %1255 = vadd.xlane.f32.xlu0 %v1254_v63 }
 0x5b7   :  { %v1253_v3 = vadd.f32 %v1249_v62, %v49_v60 }
 0x5b9   :  { %v1257_v4 = vsel %vm78_vm1, %v1253_v3, 0.0 }
 0x5ba   :  { %1258 = vadd.xlane.f32.xlu1 %v1257_v4 }
 0x63f   :  { %v1256_v59 = vpop.xlane.xlu0 %1255 }
 0x640   :  { %v1261_v6 = vmul.f32 0.03125, %v1256_v59 }
 0x642   :  { %v1263_v2 = vsub.f32 %v1252_v58, %v1261_v6 }
 0x643   :  { %v1259_v7 = vpop.xlane.xlu1 %1258 }
 0x644   :  { %v1262_v8 = vmul.f32 0.03125, %v1259_v7  ;;  %v1265_v9 = vmul.f32 %v1263_v2, %v1263_v2 }
 0x646   :  { %v1264_v10 = vsub.f32 %v1253_v3, %v1262_v8  ;;  %v1267_v11 = vsel %vm78_vm1, %v1265_v9, 0.0 }
 0x647   :  { %1268 = vadd.xlane.f32.xlu0 %v1267_v11 }
 0x648   :  { %v1266_v5 = vmul.f32 %v1264_v10, %v1264_v10 }
 0x64a   :  { %v1270_v12 = vsel %vm78_vm1, %v1266_v5, 0.0 }
 0x64b   :  { %1271 = vadd.xlane.f32.xlu0 %v1270_v12 }
 0x6d0   :  { %v1269_v13 = vpop.xlane.xlu0 %1268 }
 0x6d1   :  { %v1273_v14 = vmul.f32 0.03125, %v1269_v13 }
 0x6d3   :  { %v1275_v15 = vadd.f32 1e-05, %v1273_v14 }
 0x6d4   :  { %v1272_v16 = vpop.xlane.xlu0 %1271 }
 0x6d5   :  { %1578 = vrsqrt.f32 %v1275_v15  ;;  %v1274_v18 = vmul.f32 0.03125, %v1272_v16 }
 0x6d7   :  { %v1276_v19 = vadd.f32 1e-05, %v1274_v18 }
 0x6d9   :  { %1580 = vrsqrt.f32 %v1276_v19 }
 0x6e2   :  { %v1579_v20 = vpop.eup %1578 }
 0x6e3   :  { %v1279_v22 = vmul.f32 %v1579_v20, %v1263_v2 }
 0x6e5   :  { %v1288_v23 = vmul.f32 %v1348_v21, %v1279_v22 }
 0x6e6   :  { %v1581_v24 = vpop.eup %1580 }
 0x6e7   :  { %v1297_v25 = vadd.f32 %v1349_v17, %v1288_v23  ;;  %v1280_v26 = vmul.f32 %v1581_v24, %v1264_v10 }
 0x6e9   :  { %v1352_v27 = vpack.c.bf16 %v1297_v25, %v1297_v25  ;;  %v1289_v28 = vmul.f32 %v1348_v21, %v1280_v26 }
 0x6eb   :  { %1308 = vst.msk [vmem:[%s1937_s12] sm:$0xf] %vm1307_vm12, %v1352_v27  ;;  %v1298_v29 = vadd.f32 %v1349_v17, %v1289_v28 }
 0x6ed   :  { %v1353_v30 = vpack.c.bf16 %v1298_v29, %v1298_v29 }
 0x6ef   :  { %1309 = vst.msk [vmem:[%s1937_s12 + $0x4] sm:$0xf] %vm1307_vm12, %v1353_v30 }

// kernel: fmri_transformer_forward.20
= control target key start
LH: loop header
LB: loop body
LE: loop exit
PB: predicated region body
PF: predicated region fallthrough
CT: control target
= control target key end

     0   :  { %s1939_s0 = inlined_call_operand.vmem [shape: s32[2], index: 0, kind: input, shape index: {}]   ;;  %s1940_s1 = inlined_call_operand.vmem [shape: bf16[16,32], index: 1, kind: input, shape index: {}]   ;;  %s1941_s2 = inlined_call_operand.vmem [shape: bf16[16,32], index: 2, kind: input, shape index: {}]   ;;  %s1942_s3 = inlined_call_operand.vmem [shape: bf16[32,32], index: 3, kind: input, shape index: {}]   ;;  %s1943_s4 = inlined_call_operand.vmem [shape: f32[1,32], index: 4, kind: input, shape index: {}]   ;;  %s1944_s5 = inlined_call_operand.vmem [shape: bf16[32,32], index: 5, kind: input, shape index: {}]   ;;  %s1945_s6 = inlined_call_operand.vmem [shape: f32[1,32], index: 6, kind: input, shape index: {}]   ;;  %s1946_s7 = inlined_call_operand.vmem [shape: bf16[32,32], index: 7, kind: input, shape index: {}]   ;;  %s1947_s8 = inlined_call_operand.vmem [shape: f32[1,32], index: 8, kind: input, shape index: {}]   ;;  %s1948_s9 = inlined_call_operand.vmem [shape: bf16[32,32], index: 9, kind: input, shape index: {}]   ;;  %s1949_s10 = inlined_call_operand.vmem [shape: f32[1,32], index: 10, kind: input, shape index: {}]   ;;  %s1950_s11 = inlined_call_operand.vmem [shape: f32[1,32], index: 11, kind: input, shape index: {}]   ;;  %s1951_s12 = inlined_call_operand.vmem [shape: f32[1,32], index: 12, kind: input, shape index: {}]   ;;  %s1952_s13 = inlined_call_operand.vmem [shape: bf16[16,32], index: 13, kind: output, shape index: {}]  }
   0x1   :  { %s18_s27 = sshll.u32 %s1939_s0, 4  ;;  %s19_s27 = int_to_ptr.vmem [resolvable:$true] %s18_s27 }
   0x2   :  { %s1592_s28 = scalar_lea.vmem %s19_s27, 16  ;;  %p1597_p1 = scmp.lt.s32.totalorder %s19_s27, %s19_s27 }
   0x3   :  { %p1593_p0 = scmp.ne.s32.totalorder %s19_s27, %s1592_s28  ;;  %p1598_p2 = scmp.lt.s32.totalorder %s1592_s28, %s1592_s28 }
   0x5   :  { %p1599_p3 = por %p1598_p2, %p1597_p1 }
   0x7   :  { %p1600_p4 = pnand %p1599_p3, %p1593_p0 }
   0x9   :  { %1603 = shalt.err (!%p1600_p4)  }
   0xa   :  { %s1606_s29 = smov [#allocation4]  }
   0xb   :  { %21 = dma.vmem_to_smem %s19_s27, 16, %s1606_s29, [#allocation3] }
   0xc   :  { %1604 = dma.done.wait [#allocation3], 16 }
   0xd   :  { %1605 = vsyncadd [#allocation3], 4294967280 }
   0xe   :  { %23 = sfence }
   0xf   :  { %v1545_v0 = vld [vmem:[%s1944_s5 + $0x8] sm:$0xff]   ;;  %v1607_v1 = vmov 0.0   ;;  %v1547_v3 = vld [vmem:[%s1944_s5] sm:$0xff]   ;;  %vm1608_vm0 = vmmov 0   ;;  %vm83_vm1 = vcmask 261120   ;;  %vm274_vm2 = vcmask 64512  }
  0x10   :  { %1415 = vmatprep.subr.bf16.mxu1 %v1607_v1  ;;  %1407 = vmatprep.subr.bf16.mxu0 %v1607_v1  ;;  %v1546_v2 = vld [vmem:[%s1942_s3 + $0x8] sm:$0xff]   ;;  %v1548_v4 = vld [vmem:[%s1942_s3] sm:$0xff]   ;;  %s1609_s24 = smov 112   ;;  %v267_v47 = vlaneseq  ;;  %v1612_v50 = vmov -1e+30   ;;  %s1344_s29 = sld [smem:[#allocation4 + $0x1]] }
  0x11   :  { %1416 = vmatpush3.bf16.msra.mxu1 %v1545_v0  ;;  %1419 = vmatprep.mubr.msk.bf16.mxu1 %vm1608_vm0, %v1607_v1  ;;  %v1549_v5 = vld [vmem:[%s1941_s2] sm:$0xff]   ;;  %v1551_v26 = vld [vmem:[%s1946_s7 + $0x8] sm:$0xff]   ;;  %vm336_vm5 = vcmask 1043456   ;;  %s1614_s0 = smov 16   ;;  %s1615_s15 = smov 24   ;;  %vm498_vm6 = vcmask 130112  }
  0x12   :  { %1408 = vmatpush3.bf16.msra.mxu0 %v1546_v2  ;;  %1417 = vmatprep.subr.bf16.mxu1 %v1607_v1  ;;  %v1715_v6 = vld [vmem:[%s1940_s1] sm:$0xff]   ;;  %v268_v48 = vand.u32 127, %v267_v47  ;;  %vm614_vm7 = vcmask 195712   ;;  %vm730_vm8 = vcmask 261312   ;;  %vm1315_vm9 = vcmask 257024  }
  0x13   :  { %1409 = vmatprep.subr.bf16.mxu0 %v1607_v1  ;;  %1411 = vmatprep.mubr.msk.bf16.mxu0 %vm1608_vm0, %v1607_v1  ;;  %v1327_v9 = vld [vmem:[%s1945_s6] ss:$0 sm:$0xff]  ;;  %s1610_s6 = smov 120  }
  0x14   :  { %v1322_v11 = vld [vmem:[%s1943_s4] ss:$0 sm:$0xff]  ;;  %s1611_s4 = smov 104  }
  0x15   :  { %1418 = vmatpush3.bf16.msra.mxu1 %v1547_v3  ;;  %v1552_v27 = vld [vmem:[%s1946_s7] sm:$0xff]   ;;  %s270_s7 = sld [smem:[#allocation4]] }
  0x16   :  { %1410 = vmatpush3.bf16.msra.mxu0 %v1548_v4  ;;  %1431 = vmatprep.subr.bf16.mxu1 %v1607_v1 }
  0x17   :  { %1423 = vmatprep.subr.bf16.mxu0 %v1607_v1 }
  0x18   :  { %1420 = vmatmul.mubr.msk.bf16.vlgmr.msra.gmra.mxu1 %vm83_vm1, %v1549_v5 }
  0x19   :  { %1412 = vmatmul.mubr.msk.bf16.vlgmr.msra.gmra.mxu0 %vm83_vm1, %v1715_v6  ;;  %1433 = vmatprep.mubr.msk.bf16.mxu1 %vm1608_vm0, %v1607_v1 }
  0x1a   :  { %1427 = vmatprep.mubr.msk.bf16.mxu0 %vm1608_vm0, %v1607_v1  ;;  %1424 = vmatpush3.bf16.msra.mxu0 %v1551_v26 }
  0x1b   :  { %1425 = vmatprep.subr.bf16.mxu0 %v1607_v1  ;;  %v271_v49 = vstv %s270_s7 }
  0x1c   :  { %vm272_vm3 = vcmp.lt.s32.totalorder %v268_v48, %v271_v49 }
  0x1d   :  { %v273_v51 = vsel %vm272_vm3, 0.0, %v1612_v50 }
  0x1e   :  { %1426 = vmatpush3.bf16.msra.mxu0 %v1552_v27 }
  0x1f   :  { %1437 = vmatprep.subr.bf16.mxu0 %v1607_v1 }
  0x21   :  { %1428 = vmatmul.mubr.msk.bf16.vlgmr.msra.gmra.mxu0 %vm83_vm1, %v1549_v5 }
  0x22   :  { %1439 = vmatprep.mubr.msk.bf16.mxu0 %vm1608_vm0, %v1607_v1 }
  0xd8   :  { %v193_v7 = vpop.f32.mrf.mxu1 }
  0xd9   :  { %v121_v8 = vpop.f32.mrf.mxu0  ;;  %v194_v14 = vadd.f32 %v1327_v9, %v193_v7 }
  0xda   :  { %v1421_v10 = vpop.f32.mrf.mxu1  ;;  %v122_v15 = vadd.f32 %v1322_v11, %v121_v8 }
  0xdb   :  { %v1413_v12 = vpop.f32.mrf.mxu0 }
  0xdc   :  { %v196_v13 = vpop.f32.mrf.mxu1 }
  0xdd   :  { %v197_v16 = vadd.f32 %v1327_v9, %v196_v13  ;;  %v124_v17 = vpop.f32.mrf.mxu0  ;;  %v734_v9 = vstv %s1344_s29 }
  0xde   :  { %v1422_v18 = vpop.f32.mrf.mxu1  ;;  %v125_v19 = vadd.f32 %v1322_v11, %v124_v17  ;;  %vm735_vm4 = vcmp.lt.s32.totalorder %v268_v48, %v734_v9 }
  0xdf   :  { %v265_v20 = vpack.c.bf16 %v197_v16, %v194_v14  ;;  %v1414_v21 = vpop.f32.mrf.mxu0 }
  0xe0   :  { %v264_v22 = vpack.c.bf16 %v125_v19, %v122_v15  ;;  %v736_v15 = vsel %vm735_vm4, 0.0, %v1612_v50 }
  0xe1   :  { %502 = vrot.lane.b32.xlu1 %v265_v20, %s1609_s24  ;;  %385 = vrot.lane.b32.xlu0 %v265_v20, %s1610_s6  ;;  %v279_v23 = vsel %vm274_vm2, %v265_v20, 0  ;;  %v738_v24 = vrot.slane %v265_v20, 4 }
  0xe2   :  { %1432 = vmatpush3.bf16.xpose.msra.mxu1 %v279_v23  ;;  %v737_v25 = vrot.slane %v264_v22, 4 }
  0xe3   :  { %1443 = vmatprep.subr.bf16.mxu1 %v1607_v1  ;;  %v743_v37 = vsel %vm274_vm2, %v738_v24, 0 }
  0xe5   :  { %500 = vrot.lane.b32.xlu1 %v264_v22, %s1609_s24  ;;  %382 = vrot.lane.b32.xlu0 %v264_v22, %s1610_s6 }
  0xe9   :  { %616 = vrot.lane.b32.xlu1 %v264_v22, %s1611_s4  ;;  %618 = vrot.lane.b32.xlu0 %v265_v20, %s1611_s4 }
  0xea   :  { %1434 = vmatmul.mubr.msk.bf16.vlgmr.msra.gmra.mxu1 %vm274_vm2, %v264_v22 }
  0xeb   :  { %1445 = vmatprep.mubr.msk.bf16.mxu1 %vm1608_vm0, %v1607_v1 }
  0xed   :  { %847 = vrot.lane.b32.xlu0 %v738_v24, %s1610_s6  ;;  %845 = vrot.lane.b32.xlu1 %v737_v25, %s1610_s6 }
  0xf1   :  { %962 = vrot.lane.b32.xlu0 %v738_v24, %s1609_s24  ;;  %960 = vrot.lane.b32.xlu1 %v737_v25, %s1609_s24 }
  0xf5   :  { %1077 = vrot.lane.b32.xlu0 %v738_v24, %s1611_s4  ;;  %1075 = vrot.lane.b32.xlu1 %v737_v25, %s1611_s4 }
 0x153   :  { %v386_v28 = vpop.permute.xlu0 %385  ;;  %v503_v30 = vpop.permute.xlu1 %502 }
 0x154   :  { %v391_v29 = vsel %vm274_vm2, %v386_v28, 0  ;;  %v508_v32 = vsel %vm274_vm2, %v503_v30, 0 }
 0x155   :  { %1444 = vmatpush3.bf16.xpose.msra.mxu1 %v391_v29 }
 0x156   :  { %1455 = vmatprep.subr.bf16.mxu1 %v1607_v1 }
 0x157   :  { %v383_v31 = vpop.permute.xlu0 %382  ;;  %v501_v34 = vpop.permute.xlu1 %500 }
 0x15b   :  { %v619_v33 = vpop.permute.xlu0 %618  ;;  %v617_v36 = vpop.permute.xlu1 %616 }
 0x15c   :  { %1446 = vmatmul.mubr.msk.bf16.vlgmr.msra.gmra.mxu1 %vm274_vm2, %v383_v31  ;;  %v624_v35 = vsel %vm274_vm2, %v619_v33, 0 }
 0x15d   :  { %1456 = vmatpush3.bf16.xpose.msra.mxu1 %v508_v32  ;;  %1457 = vmatprep.mubr.msk.bf16.mxu1 %vm1608_vm0, %v1607_v1 }
 0x15e   :  { %1467 = vmatprep.subr.bf16.mxu1 %v1607_v1 }
 0x15f   :  { %v848_v38 = vpop.permute.xlu0 %847  ;;  %v846_v41 = vpop.permute.xlu1 %845 }
 0x160   :  { %v853_v39 = vsel %vm274_vm2, %v848_v38, 0 }
 0x163   :  { %v963_v40 = vpop.permute.xlu0 %962  ;;  %v961_v44 = vpop.permute.xlu1 %960 }
 0x164   :  { %1458 = vmatmul.mubr.msk.bf16.vlgmr.msra.gmra.mxu1 %vm274_vm2, %v501_v34  ;;  %v968_v42 = vsel %vm274_vm2, %v963_v40, 0  ;;  %v257_v34 = vpop.f32.mrf.mxu0 }
 0x165   :  { %1468 = vmatpush3.bf16.xpose.msra.mxu1 %v624_v35  ;;  %1469 = vmatprep.mubr.msk.bf16.mxu1 %vm1608_vm0, %v1607_v1 }
 0x166   :  { %1479 = vmatprep.subr.bf16.mxu1 %v1607_v1 }
 0x167   :  { %v1078_v43 = vpop.permute.xlu0 %1077  ;;  %v1076_v46 = vpop.permute.xlu1 %1075 }
 0x168   :  { %v1083_v45 = vsel %vm274_vm2, %v1078_v43, 0 }
 0x16c   :  { %1470 = vmatmul.mubr.msk.bf16.vlgmr.msra.gmra.mxu1 %vm274_vm2, %v617_v36 }
 0x16d   :  { %1480 = vmatpush3.bf16.xpose.msra.mxu1 %v743_v37  ;;  %1481 = vmatprep.mubr.msk.bf16.mxu1 %vm1608_vm0, %v1607_v1  ;;  %v1429_v37 = vpop.f32.mrf.mxu0 }
 0x16e   :  { %1491 = vmatprep.subr.bf16.mxu1 %v1607_v1 }
 0x174   :  { %1482 = vmatmul.mubr.msk.bf16.vlgmr.msra.gmra.mxu1 %vm274_vm2, %v737_v25 }
 0x175   :  { %1492 = vmatpush3.bf16.xpose.msra.mxu1 %v853_v39  ;;  %1493 = vmatprep.mubr.msk.bf16.mxu1 %vm1608_vm0, %v1607_v1  ;;  %v1332_v39 = vld [vmem:[%s1947_s8] ss:$0 sm:$0xff]  ;;  %s1613_s8 = smov 8  }
 0x176   :  { %1503 = vmatprep.subr.bf16.mxu1 %v1607_v1  ;;  %v258_v43 = vadd.f32 %v1332_v39, %v257_v34 }
 0x17c   :  { %1494 = vmatmul.mubr.msk.bf16.vlgmr.msra.gmra.mxu1 %vm274_vm2, %v846_v41 }
 0x17d   :  { %1504 = vmatpush3.bf16.xpose.msra.mxu1 %v968_v42  ;;  %1505 = vmatprep.mubr.msk.bf16.mxu1 %vm1608_vm0, %v1607_v1 }
 0x17e   :  { %1515 = vmatprep.subr.bf16.mxu1 %v1607_v1 }
 0x184   :  { %1506 = vmatmul.mubr.msk.bf16.vlgmr.msra.gmra.mxu1 %vm274_vm2, %v961_v44  ;;  %v260_v44 = vpop.f32.mrf.mxu0 }
 0x185   :  { %1516 = vmatpush3.bf16.xpose.msra.mxu1 %v1083_v45  ;;  %1517 = vmatprep.mubr.msk.bf16.mxu1 %vm1608_vm0, %v1607_v1  ;;  %v261_v47 = vadd.f32 %v1332_v39, %v260_v44 }
 0x186   :  { %1527 = vmatprep.subr.bf16.mxu1 %v1607_v1  ;;  %v1430_v48 = vpop.f32.mrf.mxu0 }
 0x18c   :  { %1518 = vmatmul.mubr.msk.bf16.vlgmr.msra.gmra.mxu1 %vm274_vm2, %v1076_v46 }
 0x18d   :  { %1531 = vmatprep.mubr.msk.bf16.mxu1 %vm1608_vm0, %v1607_v1 }
 0x1aa   :  { %v315_v52 = vpop.f32.mrf.mxu1 }
 0x1ab   :  { %v316_v53 = vadd.f32 %v315_v52, %v273_v51 }
 0x1ac   :  { %v1435_v54 = vpop.f32.mrf.mxu1 }
 0x1ad   :  { %v321_v55 = vsel %vm274_vm2, %v316_v53, -inf }
 0x1ae   :  { %322 = vmax.xlane.f32.xlu0 %v321_v55  ;;  %v318_v56 = vpop.f32.mrf.mxu1 }
 0x1b0   :  { %v1436_v57 = vpop.f32.mrf.mxu1 }
 0x21c   :  { %v427_v58 = vpop.f32.mrf.mxu1 }
 0x21d   :  { %v1796_v59 = vadd.f32 %v427_v58, %v273_v51 }
 0x21e   :  { %v1447_v60 = vpop.f32.mrf.mxu1 }
 0x21f   :  { %v433_v61 = vsel %vm274_vm2, %v1796_v59, -inf }
 0x220   :  { %434 = vmax.xlane.f32.xlu1 %v433_v61  ;;  %v430_v62 = vpop.f32.mrf.mxu1 }
 0x222   :  { %v1448_v63 = vpop.f32.mrf.mxu1 }
 0x224   :  { %v544_v0 = vpop.f32.mrf.mxu1 }
 0x225   :  { %v1800_v2 = vadd.f32 %v544_v0, %v273_v51 }
 0x226   :  { %v1459_v3 = vpop.f32.mrf.mxu1 }
 0x227   :  { %v550_v4 = vsel %vm274_vm2, %v1800_v2, -inf }
 0x228   :  { %551 = vmax.xlane.f32.xlu0 %v550_v4  ;;  %v547_v5 = vpop.f32.mrf.mxu1 }
 0x22a   :  { %v1460_v7 = vpop.f32.mrf.mxu1 }
 0x22c   :  { %v660_v8 = vpop.f32.mrf.mxu1 }
 0x22d   :  { %v1804_v10 = vadd.f32 %v660_v8, %v273_v51  ;;  %v1825_v51 = vpack.c.bf16 %v261_v47, %v258_v43 }
 0x22e   :  { %v1471_v11 = vpop.f32.mrf.mxu1 }
 0x22f   :  { %v666_v12 = vsel %vm274_vm2, %v1804_v10, -inf }
 0x230   :  { %667 = vmax.xlane.f32.xlu0 %v666_v12  ;;  %v663_v13 = vpop.f32.mrf.mxu1 }
 0x232   :  { %v1472_v14 = vpop.f32.mrf.mxu1 }
 0x234   :  { %v779_v16 = vpop.f32.mrf.mxu1 }
 0x235   :  { %v1808_v17 = vadd.f32 %v779_v16, %v736_v15 }
 0x236   :  { %v1483_v18 = vpop.f32.mrf.mxu1 }
 0x237   :  { %v323_v19 = vpop.xlane.xlu0 %322  ;;  %v785_v20 = vsel %vm274_vm2, %v1808_v17, -inf }
 0x238   :  { %v324_v21 = vsub.f32 %v316_v53, %v323_v19  ;;  %786 = vmax.xlane.f32.xlu1 %v785_v20  ;;  %v782_v22 = vpop.f32.mrf.mxu1  ;;  %v338_v53 = vsel %vm336_vm5, %v1825_v51, 0 }
 0x239   :  { %1438 = vmatpush3.bf16.msra.mxu0 %v338_v53 }
 0x23a   :  { %v325_v23 = vmul.f32 1.442695, %v324_v21  ;;  %v1484_v24 = vpop.f32.mrf.mxu1  ;;  %1449 = vmatprep.subr.bf16.mxu0 %v1607_v1 }
 0x23c   :  { %1556 = vpow2.f32 %v325_v23  ;;  %v889_v25 = vpop.f32.mrf.mxu1 }
 0x23d   :  { %v1812_v26 = vadd.f32 %v889_v25, %v736_v15 }
 0x23e   :  { %v1495_v27 = vpop.f32.mrf.mxu1 }
 0x23f   :  { %v895_v28 = vsel %vm274_vm2, %v1812_v26, -inf }
 0x240   :  { %896 = vmax.xlane.f32.xlu0 %v895_v28  ;;  %v892_v29 = vpop.f32.mrf.mxu1 }
 0x242   :  { %v1496_v30 = vpop.f32.mrf.mxu1 }
 0x244   :  { %v1004_v31 = vpop.f32.mrf.mxu1 }
 0x245   :  { %v1816_v32 = vadd.f32 %v1004_v31, %v736_v15  ;;  %v797_v31 = vrot.slane %v1825_v51, 4 }
 0x246   :  { %v1507_v33 = vpop.f32.mrf.mxu1 }
 0x247   :  { %v1010_v35 = vsel %vm274_vm2, %v1816_v32, -inf }
 0x248   :  { %1011 = vmax.xlane.f32.xlu1 %v1010_v35  ;;  %v1007_v36 = vpop.f32.mrf.mxu1 }
 0x249   :  { %v1557_v38 = vpop.eup %1556 }
 0x24a   :  { %v1508_v40 = vpop.f32.mrf.mxu1  ;;  %v327_v41 = vsel %vm274_vm2, %v1557_v38, 0.0 }
 0x24c   :  { %328 = vadd.xlane.f32.xlu1 %v327_v41  ;;  %v1119_v42 = vpop.f32.mrf.mxu1 }
 0x24d   :  { %v1120_v45 = vadd.f32 %v1119_v42, %v736_v15 }
 0x24e   :  { %v1519_v46 = vpop.f32.mrf.mxu1 }
 0x24f   :  { %v1125_v49 = vsel %vm274_vm2, %v1120_v45, -inf }
 0x250   :  { %1126 = vmax.xlane.f32.xlu0 %v1125_v49  ;;  %v1122_v50 = vpop.f32.mrf.mxu1 }
 0x251   :  { %v802_v50 = vsel %vm336_vm5, %v797_v31, 0 }
 0x252   :  { %v1520_v52 = vpop.f32.mrf.mxu1 }
 0x2a9   :  { %v435_v54 = vpop.xlane.xlu1 %434 }
 0x2aa   :  { %v436_v55 = vsub.f32 %v1796_v59, %v435_v54 }
 0x2ac   :  { %v437_v56 = vmul.f32 1.442695, %v436_v55 }
 0x2ae   :  { %1558 = vpow2.f32 %v437_v56 }
 0x2b1   :  { %v552_v57 = vpop.xlane.xlu0 %551 }
 0x2b2   :  { %v553_v58 = vsub.f32 %v1800_v2, %v552_v57 }
 0x2b4   :  { %v554_v60 = vmul.f32 1.442695, %v553_v58 }
 0x2b6   :  { %1560 = vpow2.f32 %v554_v60 }
 0x2b9   :  { %v668_v61 = vpop.xlane.xlu0 %667 }
 0x2ba   :  { %v669_v62 = vsub.f32 %v1804_v10, %v668_v61 }
 0x2bb   :  { %v1559_v63 = vpop.eup %1558 }
 0x2bc   :  { %v670_v0 = vmul.f32 1.442695, %v669_v62  ;;  %v439_v3 = vsel %vm274_vm2, %v1559_v63, 0.0 }
 0x2bd   :  { %440 = vadd.xlane.f32.xlu0 %v439_v3 }
 0x2be   :  { %1562 = vpow2.f32 %v670_v0 }
 0x2c1   :  { %v787_v7 = vpop.xlane.xlu1 %786 }
 0x2c2   :  { %v788_v11 = vsub.f32 %v1808_v17, %v787_v7 }
 0x2c3   :  { %v1834_v4 = vpop.eup %1560 }
 0x2c4   :  { %v556_v59 = vsel %vm274_vm2, %v1834_v4, 0.0  ;;  %v789_v16 = vmul.f32 1.442695, %v788_v11 }
 0x2c5   :  { %557 = vadd.xlane.f32.xlu1 %v556_v59 }
 0x2c9   :  { %v897_v12 = vpop.xlane.xlu0 %896 }
 0x2ca   :  { %v898_v15 = vsub.f32 %v1812_v26, %v897_v12 }
 0x2cb   :  { %v1838_v5 = vpop.eup %1562 }
 0x2cc   :  { %v672_v2 = vsel %vm274_vm2, %v1838_v5, 0.0  ;;  %v899_v20 = vmul.f32 1.442695, %v898_v15 }
 0x2cd   :  { %673 = vadd.xlane.f32.xlu0 %v672_v2 }
 0x2d1   :  { %v1012_v8 = vpop.xlane.xlu1 %1011 }
 0x2d2   :  { %v1013_v18 = vsub.f32 %v1816_v32, %v1012_v8 }
 0x2d4   :  { %v1014_v21 = vmul.f32 1.442695, %v1013_v18 }
 0x2d5   :  { %v329_v9 = vpop.xlane.xlu1 %328 }
 0x2d6   :  { %562 = vrot.lane.b32.xlu1 %v1825_v51, %s1609_s24  ;;  %1564 = vrcp.f32 %v329_v9 }
 0x2d7   :  { %1566 = vpow2.f32 %v789_v16 }
 0x2d8   :  { %1568 = vpow2.f32 %v899_v20 }
 0x2d9   :  { %v1127_v19 = vpop.xlane.xlu0 %1126  ;;  %1570 = vpow2.f32 %v1014_v21 }
 0x2da   :  { %678 = vrot.lane.b32.xlu1 %v1825_v51, %s1611_s4  ;;  %v1128_v22 = vsub.f32 %v1120_v45, %v1127_v19 }
 0x2dc   :  { %v1129_v17 = vmul.f32 1.442695, %v1128_v22 }
 0x2de   :  { %1572 = vpow2.f32 %v1129_v17 }
 0x2e3   :  { %446 = vrot.lane.b32.xlu0 %v1825_v51, %s1610_s6  ;;  %v1565_v10 = vpop.eup %1564 }
 0x2e4   :  { %v331_v13 = vmul.f32 %v1565_v10, %v1557_v38  ;;  %v1567_v23 = vpop.eup %1566 }
 0x2e5   :  { %v1854_v24 = vpop.eup %1568  ;;  %v791_v25 = vsel %vm274_vm2, %v1567_v23, 0.0 }
 0x2e6   :  { %v332_v14 = vpack.c.bf16 %v331_v13, %v331_v13  ;;  %v1857_v26 = vpop.eup %1570  ;;  %v901_v27 = vsel %vm274_vm2, %v1854_v24, 0.0 }
 0x2e7   :  { %v1016_v28 = vsel %vm274_vm2, %v1857_v26, 0.0 }
 0x2e8   :  { %1440 = vmatmul.mubr.msk.bf16.vlgmr.msra.gmra.mxu0 %vm274_vm2, %v332_v14 }
 0x2e9   :  { %1451 = vmatprep.mubr.msk.bf16.mxu0 %vm1608_vm0, %v1607_v1 }
 0x2eb   :  { %v1863_v29 = vpop.eup %1572 }
 0x2ec   :  { %v1131_v30 = vsel %vm274_vm2, %v1863_v29, 0.0 }
 0x2fe   :  { %792 = vadd.xlane.f32.xlu1 %v791_v25 }
 0x302   :  { %902 = vadd.xlane.f32.xlu1 %v901_v27  ;;  %1017 = vadd.xlane.f32.xlu0 %v1016_v28 }
 0x306   :  { %1132 = vadd.xlane.f32.xlu1 %v1131_v30 }
 0x317   :  { %1022 = vrot.lane.b32.xlu1 %v797_v31, %s1609_s24 }
 0x318   :  { %907 = vrot.lane.b32.xlu0 %v797_v31, %s1610_s6 }
 0x31c   :  { %1137 = vrot.lane.b32.xlu0 %v797_v31, %s1611_s4 }
 0x346   :  { %v441_v32 = vpop.xlane.xlu0 %440 }
 0x347   :  { %1574 = vrcp.f32 %v441_v32 }
 0x34e   :  { %v558_v33 = vpop.xlane.xlu1 %557 }
 0x34f   :  { %1576 = vrcp.f32 %v558_v33 }
 0x352   :  { %v563_v39 = vpop.permute.xlu1 %562 }
 0x353   :  { %v568_v42 = vsel %vm336_vm5, %v563_v39, 0 }
 0x354   :  { %v1575_v34 = vpop.eup %1574 }
 0x355   :  { %v443_v36 = vmul.f32 %v1575_v34, %v1559_v63  ;;  %v1553_v34 = vld [vmem:[%s1948_s9 + $0x8] sm:$0xff]  }
 0x356   :  { %v674_v35 = vpop.xlane.xlu0 %673  ;;  %v679_v44 = vpop.permute.xlu1 %678  ;;  %1528 = vmatpush3.bf16.msra.mxu1 %v1553_v34 }
 0x357   :  { %1578 = vrcp.f32 %v674_v35  ;;  %v444_v40 = vpack.c.bf16 %v443_v36, %v443_v36  ;;  %v684_v47 = vsel %vm336_vm5, %v679_v44, 0  ;;  %v1554_v36 = vld [vmem:[%s1948_s9] sm:$0xff]   ;;  %1529 = vmatprep.subr.bf16.mxu1 %v1607_v1 }
 0x35a   :  { %v447_v37 = vpop.permute.xlu0 %446  ;;  %1530 = vmatpush3.bf16.msra.mxu1 %v1554_v36 }
 0x35b   :  { %v452_v38 = vsel %vm336_vm5, %v447_v37, 0 }
 0x35c   :  { %1450 = vmatpush3.bf16.msra.mxu0 %v452_v38  ;;  %v1577_v41 = vpop.eup %1576 }
 0x35d   :  { %1461 = vmatprep.subr.bf16.mxu0 %v1607_v1  ;;  %v560_v43 = vmul.f32 %v1577_v41, %v1834_v4 }
 0x35f   :  { %1452 = vmatmul.mubr.msk.bf16.vlgmr.msra.gmra.mxu0 %vm274_vm2, %v444_v40  ;;  %v561_v45 = vpack.c.bf16 %v560_v43, %v560_v43 }
 0x360   :  { %1462 = vmatpush3.bf16.msra.mxu0 %v568_v42  ;;  %1463 = vmatprep.mubr.msk.bf16.mxu0 %vm1608_vm0, %v1607_v1 }
 0x361   :  { %1473 = vmatprep.subr.bf16.mxu0 %v1607_v1 }
 0x364   :  { %v1579_v46 = vpop.eup %1578 }
 0x365   :  { %v676_v48 = vmul.f32 %v1579_v46, %v1838_v5 }
 0x367   :  { %1464 = vmatmul.mubr.msk.bf16.vlgmr.msra.gmra.mxu0 %vm274_vm2, %v561_v45  ;;  %v677_v49 = vpack.c.bf16 %v676_v48, %v676_v48 }
 0x368   :  { %1474 = vmatpush3.bf16.msra.mxu0 %v684_v47  ;;  %1475 = vmatprep.mubr.msk.bf16.mxu0 %vm1608_vm0, %v1607_v1 }
 0x369   :  { %1485 = vmatprep.subr.bf16.mxu0 %v1607_v1 }
 0x36f   :  { %1476 = vmatmul.mubr.msk.bf16.vlgmr.msra.gmra.mxu0 %vm274_vm2, %v677_v49 }
 0x370   :  { %1486 = vmatpush3.bf16.msra.mxu0 %v802_v50  ;;  %1487 = vmatprep.mubr.msk.bf16.mxu0 %vm1608_vm0, %v1607_v1 }
 0x371   :  { %1497 = vmatprep.subr.bf16.mxu0 %v1607_v1 }
 0x387   :  { %v793_v51 = vpop.xlane.xlu1 %792 }
 0x388   :  { %1580 = vrcp.f32 %v793_v51 }
 0x38b   :  { %v903_v52 = vpop.xlane.xlu1 %902  ;;  %v1018_v53 = vpop.xlane.xlu0 %1017 }
 0x38c   :  { %1582 = vrcp.f32 %v903_v52 }
 0x38d   :  { %1584 = vrcp.f32 %v1018_v53  ;;  %v1353_v53 = vld [vmem:[%s1949_s10] ss:$0 sm:$0xff] }
 0x38f   :  { %v908_v56 = vpop.permute.xlu0 %907  ;;  %v1133_v60 = vpop.xlane.xlu1 %1132 }
 0x390   :  { %v913_v61 = vsel %vm336_vm5, %v908_v56, 0  ;;  %1586 = vrcp.f32 %v1133_v60  ;;  %v54_v60 = vunpack.c.h.bf16 %v1715_v6 }
 0x393   :  { %v1023_v63 = vpop.permute.xlu1 %1022  ;;  %v1138_v5 = vpop.permute.xlu0 %1137 }
 0x394   :  { %v1028_v4 = vsel %vm336_vm5, %v1023_v63, 0  ;;  %v1143_v9 = vsel %vm336_vm5, %v1138_v5, 0 }
 0x395   :  { %v1581_v54 = vpop.eup %1580 }
 0x396   :  { %v795_v55 = vmul.f32 %v1581_v54, %v1567_v23  ;;  %v53_v54 = vunpack.c.l.bf16 %v1715_v6 }
 0x398   :  { %v796_v57 = vpack.c.bf16 %v795_v55, %v795_v55 }
 0x399   :  { %v1583_v58 = vpop.eup %1582 }
 0x39a   :  { %1488 = vmatmul.mubr.msk.bf16.vlgmr.msra.gmra.mxu0 %vm274_vm2, %v796_v57  ;;  %v905_v62 = vmul.f32 %v1583_v58, %v1854_v24  ;;  %v1585_v3 = vpop.eup %1584 }
 0x39b   :  { %1498 = vmatpush3.bf16.msra.mxu0 %v913_v61  ;;  %1499 = vmatprep.mubr.msk.bf16.mxu0 %vm1608_vm0, %v1607_v1  ;;  %v1020_v59 = vmul.f32 %v1585_v3, %v1857_v26 }
 0x39c   :  { %1509 = vmatprep.subr.bf16.mxu0 %v1607_v1  ;;  %v906_v0 = vpack.c.bf16 %v905_v62, %v905_v62 }
 0x39d   :  { %v1021_v2 = vpack.c.bf16 %v1020_v59, %v1020_v59  ;;  %v1587_v7 = vpop.eup %1586 }
 0x39e   :  { %v1135_v11 = vmul.f32 %v1587_v7, %v1863_v29 }
 0x3a0   :  { %v1136_v14 = vpack.c.bf16 %v1135_v11, %v1135_v11 }
 0x3a2   :  { %1500 = vmatmul.mubr.msk.bf16.vlgmr.msra.gmra.mxu0 %vm274_vm2, %v906_v0 }
 0x3a3   :  { %1510 = vmatpush3.bf16.msra.mxu0 %v1028_v4  ;;  %1511 = vmatprep.mubr.msk.bf16.mxu0 %vm1608_vm0, %v1607_v1 }
 0x3a4   :  { %1521 = vmatprep.subr.bf16.mxu0 %v1607_v1 }
 0x3a8   :  { %v374_v8 = vpop.f32.mrf.mxu0 }
 0x3a9   :  { %380 = vst.msk [vmem:[#allocation2] sm:$0xff] %vm274_vm2, %v374_v8 }
 0x3aa   :  { %1512 = vmatmul.mubr.msk.bf16.vlgmr.msra.gmra.mxu0 %vm274_vm2, %v1021_v2  ;;  %v1441_v10 = vpop.f32.mrf.mxu0 }
 0x3ab   :  { %1522 = vmatpush3.bf16.msra.mxu0 %v1143_v9  ;;  %1523 = vmatprep.mubr.msk.bf16.mxu0 %vm1608_vm0, %v1607_v1 }
 0x3ac   :  { %v377_v12 = vpop.f32.mrf.mxu0 }
 0x3ae   :  { %v1442_v13 = vpop.f32.mrf.mxu0 }
 0x3b2   :  { %1524 = vmatmul.mubr.msk.bf16.vlgmr.msra.gmra.mxu0 %vm274_vm2, %v1136_v14 }
 0x41f   :  { %v488_v15 = vpop.f32.mrf.mxu0 }
 0x420   :  { %495 = vrot.lane.b32.xlu0 %v488_v15, %s1613_s8 }
 0x421   :  { %v1453_v16 = vpop.f32.mrf.mxu0 }
 0x423   :  { %v491_v18 = vpop.f32.mrf.mxu0 }
 0x425   :  { %v1454_v19 = vpop.f32.mrf.mxu0 }
 0x427   :  { %v604_v20 = vpop.f32.mrf.mxu0 }
 0x428   :  { %611 = vrot.lane.b32.xlu0 %v604_v20, %s1614_s0 }
 0x429   :  { %v1465_v21 = vpop.f32.mrf.mxu0 }
 0x42a   :  { %v1357_v21 = vld [vmem:[%s1950_s11] ss:$0 sm:$0xff] }
 0x42b   :  { %v607_v22 = vpop.f32.mrf.mxu0 }
 0x42d   :  { %v1466_v17 = vpop.f32.mrf.mxu0 }
 0x42e   :  { %v1358_v17 = vld [vmem:[%s1951_s12] ss:$0 sm:$0xff] }
 0x42f   :  { %v720_v23 = vpop.f32.mrf.mxu0 }
 0x430   :  { %727 = vrot.lane.b32.xlu0 %v720_v23, %s1615_s15 }
 0x431   :  { %v1477_v24 = vpop.f32.mrf.mxu0 }
 0x433   :  { %v723_v25 = vpop.f32.mrf.mxu0 }
 0x435   :  { %v1478_v26 = vpop.f32.mrf.mxu0 }
 0x45a   :  { %v838_v27 = vpop.f32.mrf.mxu0 }
 0x45b   :  { %844 = vst.msk [vmem:[#allocation2 + $0x8] sm:$0xff] %vm274_vm2, %v838_v27 }
 0x45c   :  { %v1489_v28 = vpop.f32.mrf.mxu0 }
 0x45e   :  { %v841_v29 = vpop.f32.mrf.mxu0 }
 0x460   :  { %v1490_v30 = vpop.f32.mrf.mxu0 }
 0x462   :  { %v949_v31 = vpop.f32.mrf.mxu0 }
 0x463   :  { %956 = vrot.lane.b32.xlu1 %v949_v31, %s1613_s8 }
 0x464   :  { %v1501_v32 = vpop.f32.mrf.mxu0 }
 0x466   :  { %v952_v33 = vpop.f32.mrf.mxu0 }
 0x468   :  { %v1502_v35 = vpop.f32.mrf.mxu0 }
 0x46a   :  { %v1064_v37 = vpop.f32.mrf.mxu0 }
 0x46b   :  { %1071 = vrot.lane.b32.xlu1 %v1064_v37, %s1614_s0 }
 0x46c   :  { %v1513_v38 = vpop.f32.mrf.mxu0 }
 0x46e   :  { %v1067_v39 = vpop.f32.mrf.mxu0 }
 0x470   :  { %v1514_v40 = vpop.f32.mrf.mxu0 }
 0x472   :  { %v1179_v41 = vpop.f32.mrf.mxu0 }
 0x473   :  { %1186 = vrot.lane.b32.xlu1 %v1179_v41, %s1615_s15 }
 0x474   :  { %v1525_v42 = vpop.f32.mrf.mxu0 }
 0x476   :  { %v1182_v43 = vpop.f32.mrf.mxu0 }
 0x478   :  { %v1526_v44 = vpop.f32.mrf.mxu0 }
 0x492   :  { %v496_v45 = vpop.permute.xlu0 %495 }
 0x493   :  { %499 = vst.msk [vmem:[#allocation2] sm:$0xff] %vm498_vm6, %v496_v45 }
 0x49a   :  { %v612_v46 = vpop.permute.xlu0 %611 }
 0x49b   :  { %615 = vst.msk [vmem:[#allocation2] sm:$0xff] %vm614_vm7, %v612_v46 }
 0x4a2   :  { %v728_v47 = vpop.permute.xlu0 %727 }
 0x4a3   :  { %731 = vst.msk [vmem:[#allocation2] sm:$0xff] %vm730_vm8, %v728_v47 }
 0x4aa   :  { %v1190_v50 = vld [vmem:[#allocation2] sm:$0xff] }
 0x4d5   :  { %v957_v1 = vpop.permute.xlu1 %956 }
 0x4d6   :  { %959 = vst.msk [vmem:[#allocation2 + $0x8] sm:$0xff] %vm498_vm6, %v957_v1 }
 0x4dd   :  { %v1072_v48 = vpop.permute.xlu1 %1071 }
 0x4de   :  { %1074 = vst.msk [vmem:[#allocation2 + $0x8] sm:$0xff] %vm614_vm7, %v1072_v48 }
 0x4e5   :  { %v1187_v49 = vpop.permute.xlu1 %1186 }
 0x4e6   :  { %1189 = vst.msk [vmem:[#allocation2 + $0x8] sm:$0xff] %vm730_vm8, %v1187_v49 }
 0x4ed   :  { %v1191_v51 = vld [vmem:[#allocation2 + $0x8] sm:$0xff] }
 0x4ee   :  { %v1192_v52 = vpack.c.bf16 %v1191_v51, %v1190_v50 }
 0x4f0   :  { %1532 = vmatmul.mubr.msk.bf16.vlgmr.msra.gmra.mxu1 %vm83_vm1, %v1192_v52 }
 0x5b0   :  { %v1253_v55 = vpop.f32.mrf.mxu1 }
 0x5b1   :  { %v1254_v56 = vadd.f32 %v1353_v53, %v1253_v55 }
 0x5b2   :  { %v1533_v57 = vpop.f32.mrf.mxu1 }
 0x5b3   :  { %v1260_v58 = vadd.f32 %v1254_v56, %v53_v54 }
 0x5b4   :  { %v1256_v61 = vpop.f32.mrf.mxu1 }
 0x5b5   :  { %v1257_v62 = vadd.f32 %v1353_v53, %v1256_v61  ;;  %v1262_v63 = vsel %vm83_vm1, %v1260_v58, 0.0 }
 0x5b6   :  { %v1534_v0 = vpop.f32.mrf.mxu1  ;;  %1263 = vadd.xlane.f32.xlu0 %v1262_v63 }
 0x5b7   :  { %v1261_v3 = vadd.f32 %v1257_v62, %v54_v60 }
 0x5b9   :  { %v1265_v4 = vsel %vm83_vm1, %v1261_v3, 0.0 }
 0x5ba   :  { %1266 = vadd.xlane.f32.xlu1 %v1265_v4 }
 0x63f   :  { %v1264_v59 = vpop.xlane.xlu0 %1263 }
 0x640   :  { %v1269_v5 = vmul.f32 0.03125, %v1264_v59 }
 0x642   :  { %v1271_v2 = vsub.f32 %v1260_v58, %v1269_v5 }
 0x643   :  { %v1267_v7 = vpop.xlane.xlu1 %1266 }
 0x644   :  { %v1270_v8 = vmul.f32 0.03125, %v1267_v7  ;;  %v1273_v9 = vmul.f32 %v1271_v2, %v1271_v2 }
 0x646   :  { %v1272_v10 = vsub.f32 %v1261_v3, %v1270_v8  ;;  %v1275_v11 = vsel %vm83_vm1, %v1273_v9, 0.0 }
 0x647   :  { %1276 = vadd.xlane.f32.xlu0 %v1275_v11 }
 0x648   :  { %v1274_v6 = vmul.f32 %v1272_v10, %v1272_v10 }
 0x64a   :  { %v1278_v12 = vsel %vm83_vm1, %v1274_v6, 0.0 }
 0x64b   :  { %1279 = vadd.xlane.f32.xlu0 %v1278_v12 }
 0x6d0   :  { %v1277_v13 = vpop.xlane.xlu0 %1276 }
 0x6d1   :  { %v1281_v14 = vmul.f32 0.03125, %v1277_v13 }
 0x6d3   :  { %v1283_v15 = vadd.f32 1e-05, %v1281_v14 }
 0x6d4   :  { %v1280_v16 = vpop.xlane.xlu0 %1279 }
 0x6d5   :  { %1588 = vrsqrt.f32 %v1283_v15  ;;  %v1282_v18 = vmul.f32 0.03125, %v1280_v16 }
 0x6d7   :  { %v1284_v19 = vadd.f32 1e-05, %v1282_v18 }
 0x6d9   :  { %1590 = vrsqrt.f32 %v1284_v19 }
 0x6e2   :  { %v1589_v20 = vpop.eup %1588 }
 0x6e3   :  { %v1287_v22 = vmul.f32 %v1589_v20, %v1271_v2 }
 0x6e5   :  { %v1296_v23 = vmul.f32 %v1357_v21, %v1287_v22 }
 0x6e6   :  { %v1591_v24 = vpop.eup %1590 }
 0x6e7   :  { %v1305_v25 = vadd.f32 %v1358_v17, %v1296_v23  ;;  %v1288_v26 = vmul.f32 %v1591_v24, %v1272_v10 }
 0x6e9   :  { %v1361_v27 = vpack.c.bf16 %v1305_v25, %v1305_v25  ;;  %v1297_v28 = vmul.f32 %v1357_v21, %v1288_v26 }
 0x6eb   :  { %1316 = vst.msk [vmem:[%s1952_s13] sm:$0xf] %vm1315_vm9, %v1361_v27  ;;  %v1306_v29 = vadd.f32 %v1358_v17, %v1297_v28 }
 0x6ed   :  { %v1362_v30 = vpack.c.bf16 %v1306_v29, %v1306_v29 }
 0x6ef   :  { %1317 = vst.msk [vmem:[%s1952_s13 + $0x4] sm:$0xf] %vm1315_vm9, %v1362_v30 }

</bundles_post_ra>
